<compile_context>
chip_gen: v6e
topology: v6e:2x2x1
jax: 0.10.0
libtpu: 0.0.40
codegen_flags: <defaults>
</compile_context>

<pallas_src>
import functools

import jax
import jax.numpy as jnp
import numpy as np
from jax.experimental import pallas as pl
from jax.experimental.pallas import tpu as pltpu


def radius_gaussian(sq_r, sig, eps=1e-9):
    """Gaussian of squared distance (mirrors the PyTorch helper)."""
    return jnp.exp(-sq_r / (2.0 * sig ** 2 + eps))


def _round_up(x, m):
    return ((x + m - 1) // m) * m


# --------------------------------------------------------------------------- #
# Fused KPConv Pallas kernel: one tile of `tq` query points per grid step.
# --------------------------------------------------------------------------- #
def _kpconv_kernel(q_ref, nb_ref, x_ref, kp_ref, kpsq_ref, wflat_ref, o_ref, *,
                   extent, influence):
    tq, pdim = q_ref.shape            # (tq, p)
    H = nb_ref.shape[1]               # neighbours per query
    K = kp_ref.shape[0]               # kernel points
    cin = x_ref.shape[2]              # input channels

    q = q_ref[...]                    # (tq, p)        f32
    nb = nb_ref[...]                  # (tq, H, p)     f32
    x = x_ref[...]                    # (tq, H, Cin)   f32
    kp = kp_ref[...]                  # (K, p)         f32
    kp_sq = kpsq_ref[...]             # (1, K)         f32 (precomputed |kp|^2)

    # Centre the neighbours on their query point (f32 VPU math).
    n = nb - q[:, None, :]                                # (tq, H, p)
    n2 = n.reshape(tq * H, pdim)                          # rows = (query, neighbour)

    # Squared distances to every kernel point via the MXU expansion:
    #   d2 = |n|^2 + |kp|^2 - 2 n.kp      (|kp|^2 comes in pre-transposed)
    cross = jax.lax.dot_general(n2, kp, (((1,), (1,)), ((), ())),
                                preferred_element_type=jnp.float32)     # (tq*H, K)
    nn = jnp.sum(n2 * n2, axis=1, keepdims=True)                        # (tq*H, 1)
    d2 = jnp.maximum(nn + kp_sq - 2.0 * cross, 0.0)                     # (tq*H, K)

    # Kernel-point influence weights (kept in f32; v5e has no bf16 VPU/EUP).
    if influence == "constant":
        w = jnp.ones_like(d2)
    elif influence == "linear":
        w = jnp.maximum(1.0 - jnp.sqrt(d2) * (1.0 / extent), 0.0)
    else:  # "gaussian"
        w = radius_gaussian(d2, extent * 0.3)

    # Aggregate neighbour features per kernel point (batched MXU contraction):
    #   wf[q, k, c] = sum_h w[q, h, k] * x[q, h, c]
    w3 = w.reshape(tq, H, K)
    wf = jax.lax.dot_general(w3.astype(jnp.bfloat16), x.astype(jnp.bfloat16),
                             (((1,), (1,)), ((0,), (0,))),
                             preferred_element_type=jnp.float32)        # (tq, K, Cin)

    # Apply the kernel weights and sum over kernel points in ONE dense matmul
    # with a lane-dense (multiple-of-128) output block:
    #   out[q, o] = sum_{k, c} wf[q, k, c] * W[k, c, o]
    wf2 = wf.reshape(tq, K * cin)
    out = jnp.dot(wf2.astype(jnp.bfloat16), wflat_ref[...],
                  preferred_element_type=jnp.float32)                   # (tq, Cout_p)
    o_ref[...] = out.astype(o_ref.dtype)


def _tile_vmem_bytes(tq, H, pdim, cin, K, cout_p):
    """Rough per-step VMEM estimate (lane padding + double buffering)."""
    lane, f32 = 128, 4
    q_blk = tq * _round_up(pdim, lane) * f32
    nb_blk = tq * H * _round_up(pdim, lane) * f32
    x_blk = tq * H * _round_up(cin, lane) * f32
    o_blk = tq * _round_up(cout_p, lane) * f32
    streamed = 2 * (q_blk + nb_blk + x_blk + o_blk)          # double-buffered
    const = (_round_up(K, 8) * lane                          # kernel points
             + lane                                          # |kp|^2 row
             + _round_up(K * cin, 8) * _round_up(cout_p, lane)) * f32
    inter = (2 * tq * H * _round_up(K, lane) * f32           # d2, w
             + tq * H * _round_up(K, lane) * 2               # w bf16 copy
             + tq * H * _round_up(cin, lane) * 2             # x bf16 copy
             + tq * _round_up(K * cin, lane) * (f32 + 2))    # wf + wf2 bf16
    return streamed + const + inter


def kpconv_pallas(q_pts, neighbors, x, kernel_points, w_flat, *, KP_extent,
                  influence="linear", tile_q=256,
                  vmem_limit_bytes=32 * 1024 * 1024):
    """q_pts [B,Nq,p], neighbors [B,Nq,H,p], x [B,Nq,H,Cin] -> [B,Nq,Cout]."""
    if influence not in ("constant", "linear", "gaussian"):
        raise ValueError("Unknown influence function type")

    B, Nq, pdim = q_pts.shape
    H = neighbors.shape[2]
    cin = x.shape[3]
    K = kernel_points.shape[0]
    cout = w_flat.shape[1]

    # Lane-dense output block: pad Cout up to a multiple of 128 with zero weight
    # columns so stores are full unmasked vst; sliced off after the call.
    cout_p = max(_round_up(cout, 128), 128)
    w_flat = w_flat.astype(jnp.bfloat16)
    if cout_p != cout:
        w_flat = jnp.pad(w_flat, ((0, 0), (0, cout_p - cout)))

    # Flatten (B, Nq) -> one long query axis: bigger tiles, fewer grid steps.
    M = B * Nq
    q2 = q_pts.reshape(M, pdim).astype(jnp.float32)
    nb2 = neighbors.reshape(M, H, pdim).astype(jnp.float32)
    x2 = x.reshape(M, H, cin).astype(jnp.float32)

    # Biggest sublane-aligned query tile that fits a conservative VMEM budget.
    tq = min(tile_q, M)
    if tq < M:
        tq = max(8, (tq // 8) * 8)
    budget = int(vmem_limit_bytes * 0.75)
    while tq > 8 and _tile_vmem_bytes(tq, H, pdim, cin, K, cout_p) > budget:
        tq = max(8, ((tq // 2) // 8) * 8)

    Mp = pl.cdiv(M, tq) * tq
    if Mp != M:                               # pad instead of asserting divisibility
        pad = Mp - M
        q2 = jnp.pad(q2, ((0, pad), (0, 0)))
        nb2 = jnp.pad(nb2, ((0, pad), (0, 0), (0, 0)))
        x2 = jnp.pad(x2, ((0, pad), (0, 0), (0, 0)))

    # Constant term of the distance expansion, precomputed host-side as a row
    # so the kernel avoids a (K,1)->(1,K) lane<->sublane relayout.
    kp = kernel_points.astype(jnp.float32)
    kp_sq = jnp.sum(kp * kp, axis=-1, keepdims=True).T        # (1, K)

    grid = (Mp // tq,)
    out = pl.pallas_call(
        functools.partial(_kpconv_kernel,
                          extent=float(KP_extent), influence=influence),
        out_shape=jax.ShapeDtypeStruct((Mp, cout_p), jnp.float32),
        grid=grid,
        in_specs=[
            pl.BlockSpec((tq, pdim), lambda i: (i, 0)),
            pl.BlockSpec((tq, H, pdim), lambda i: (i, 0, 0)),
            pl.BlockSpec((tq, H, cin), lambda i: (i, 0, 0)),
            pl.BlockSpec((K, pdim), lambda i: (0, 0)),            # constant, resident
            pl.BlockSpec((1, K), lambda i: (0, 0)),               # constant, resident
            pl.BlockSpec((K * cin, cout_p), lambda i: (0, 0)),    # constant, resident
        ],
        out_specs=pl.BlockSpec((tq, cout_p), lambda i: (i, 0)),
        compiler_params=pltpu.CompilerParams(
            dimension_semantics=("parallel",),
            vmem_limit_bytes=vmem_limit_bytes),
    )(q2, nb2, x2, kp, kp_sq, w_flat)
    return out[:M, :cout].reshape(B, Nq, cout)


# --------------------------------------------------------------------------- #
# Module wrapper
# --------------------------------------------------------------------------- #
def _init_kernel_points(radius, K, p_dim, fixed="center"):
    # TODO(synk): the original load_kernels() loads an optimization-based kernel
    # point disposition from disk; we use a deterministic centre + Fibonacci
    # sphere layout instead (same shapes / downstream semantics).
    if p_dim == 3:
        n = K - 1 if fixed == "center" else K
        i = np.arange(n, dtype=np.float64) + 0.5
        phi = np.arccos(1.0 - 2.0 * i / n)
        theta = np.pi * (1.0 + 5.0 ** 0.5) * i
        pts = np.stack([np.cos(theta) * np.sin(phi),
                        np.sin(theta) * np.sin(phi),
                        np.cos(phi)], axis=1) * (0.66 * radius)
        if fixed == "center":
            pts = np.concatenate([np.zeros((1, 3)), pts], axis=0)
    else:
        rng = np.random.RandomState(0)
        pts = rng.uniform(-1.0, 1.0, size=(K, p_dim)) * (0.66 * radius)
        if fixed == "center":
            pts[0] = 0.0
    return jnp.asarray(pts, dtype=jnp.float32)


class KPConvPallas:
    """Rigid KPConv layer; forward pass runs as one fused Pallas TPU kernel."""

    def __init__(self, kernel_size, p_dim, in_channels, out_channels, KP_extent,
                 radius, fixed_kernel_points="center", KP_influence="linear",
                 aggregation_mode="sum", deformable=False, modulated=False,
                 *, key=None):
        if deformable:
            # TODO(synk): deformable KPConv needs a data-dependent top-k whose
            # size comes from .item() (dynamic shapes) -> no clean Pallas port.
            raise NotImplementedError("deformable KPConv is not supported")
        if aggregation_mode != "sum":
            # TODO(synk): the batched 'closest' path in the reference code is
            # dimensionally inconsistent (argmin over neighbours fed to a
            # K-class one-hot); only the default 'sum' aggregation is ported.
            raise NotImplementedError("only aggregation_mode='sum' is supported")
        if KP_influence not in ("constant", "linear", "gaussian"):
            raise ValueError("Unknown influence function type")

        self.K = kernel_size
        self.p_dim = p_dim
        self.in_channels = in_channels
        self.out_channels = out_channels
        self.radius = radius
        self.KP_extent = KP_extent
        self.KP_influence = KP_influence
        self.aggregation_mode = aggregation_mode

        key = jax.random.PRNGKey(0) if key is None else key
        bound = 1.0 / np.sqrt(kernel_size * in_channels)   # kaiming-style uniform
        self.weights = jax.random.uniform(
            key, (kernel_size, in_channels, out_channels), jnp.float32,
            -bound, bound)
        self.kernel_points = _init_kernel_points(radius, kernel_size, p_dim,
                                                 fixed_kernel_points)
        # Pre-fold the per-kernel-point weights into one (K*Cin, Cout) matrix so
        # the kernel does a single (tq, K*Cin) @ (K*Cin, Cout_p) MXU matmul.
        self.w_flat = self.weights.reshape(
            kernel_size * in_channels, out_channels)

    def __call__(self, q_pts, s_pts, neighbors, neighb_inds, x):
        # s_pts / neighb_inds are only needed by the deformable path; kept for
        # API parity with the PyTorch module.
        del s_pts, neighb_inds
        return kpconv_pallas(q_pts, neighbors, x, self.kernel_points,
                             self.w_flat, KP_extent=self.KP_extent,
                             influence=self.KP_influence)


# --------------------------------------------------------------------------- #
# Pure-JAX reference (exact math of the PyTorch forward) for correctness check.
# --------------------------------------------------------------------------- #
def reference_forward(mod, q_pts, s_pts, neighbors, neighb_inds, x):
    hi = jax.lax.Precision.HIGHEST
    n = neighbors - q_pts[:, :, None, :]                                 # (B,Nq,H,p)
    diff = n[:, :, :, None, :] - mod.kernel_points[None, None, None]     # (B,Nq,H,K,p)
    sq_d = jnp.sum(diff * diff, axis=-1)                                 # (B,Nq,H,K)
    if mod.KP_influence == "constant":
        aw = jnp.ones_like(sq_d)
    elif mod.KP_influence == "linear":
        aw = jnp.maximum(1.0 - jnp.sqrt(sq_d) / mod.KP_extent, 0.0)
    else:
        aw = radius_gaussian(sq_d, mod.KP_extent * 0.3)
    aw = jnp.swapaxes(aw, -2, -1)                                        # (B,Nq,K,H)
    wf = jnp.einsum("bqkh,bqhc->bqkc", aw, x, precision=hi)              # (B,Nq,K,Cin)
    ko = jnp.einsum("bqkc,kco->bqko", wf, mod.weights, precision=hi)     # (B,Nq,K,Cout)
    return jnp.sum(ko, axis=2)                                           # (B,Nq,Cout)


if __name__ == "__main__":
    key = jax.random.PRNGKey(0)
    k_s, k_idx, k_x, k_w = jax.random.split(key, 4)

    # Small deterministic shapes: batch=2, 16 queries, 32 supports,
    # 16 neighbours, 3-D points, 16 in-channels, 32 out-channels, 15 KP.
    B, Nq, Ns, H, pdim = 2, 16, 32, 16, 3
    Cin, Cout, K = 16, 32, 15
    radius, KP_extent = 1.2, 0.8

    s_pts = jax.random.uniform(k_s, (B, Ns, pdim), jnp.float32)
    q_pts = s_pts[:, :Nq, :]
    neighb_inds = jax.random.randint(k_idx, (B, Nq, H), 0, Ns)
    neighbors = s_pts[jnp.arange(B)[:, None, None], neighb_inds]   # (B,Nq,H,p)
    x = jax.random.normal(k_x, (B, Nq, H, Cin), jnp.float32)       # (B,Nq,H,Cin)

    conv = KPConvPallas(kernel_size=K, p_dim=pdim, in_channels=Cin,
                        out_channels=Cout, KP_extent=KP_extent, radius=radius,
                        key=k_w)

    out = conv(q_pts, s_pts, neighbors, neighb_inds, x)
    jax.block_until_ready(out)
    assert out.shape == (B, Nq, Cout)

    ref = reference_forward(conv, q_pts, s_pts, neighbors, neighb_inds, x)
    np.testing.assert_allclose(np.asarray(out), np.asarray(ref),
                               rtol=3e-2, atol=3e-2)

    print("KERNEL_OK")
</pallas_src>

<mosaic_0001>
module attributes {stable_mosaic.version = 11 : i64} {
  func.func @_kpconv_kernel(%arg0: i32, %arg1: memref<32x3xf32, #tpu.memory_space<vmem>>, %arg2: memref<32x16x3xf32, #tpu.memory_space<vmem>>, %arg3: memref<32x16x16xf32, #tpu.memory_space<vmem>>, %arg4: memref<15x3xf32, #tpu.memory_space<vmem>>, %arg5: memref<1x15xf32, #tpu.memory_space<vmem>>, %arg6: memref<240x128xbf16, #tpu.memory_space<vmem>>, %arg7: memref<32x128xf32, #tpu.memory_space<vmem>>) attributes {dimension_semantics = [#tpu.dimension_semantics<parallel>], iteration_bounds = array<i64: 1>, scalar_prefetch = 0 : i64, scratch_operands = 0 : i64, tpu.core_type = #tpu.core_type<tc>, window_params = [{transform_indices = @transform_0, window_bounds = array<i64: 32, 3>}, {transform_indices = @transform_1, window_bounds = array<i64: 32, 16, 3>}, {transform_indices = @transform_2, window_bounds = array<i64: 32, 16, 16>}, {pipeline_mode = #tpu.pipeline_mode<synchronous>, transform_indices = @transform_3, window_bounds = array<i64: 15, 3>}, {pipeline_mode = #tpu.pipeline_mode<synchronous>, transform_indices = @transform_4, window_bounds = array<i64: 1, 15>}, {pipeline_mode = #tpu.pipeline_mode<synchronous>, transform_indices = @transform_5, window_bounds = array<i64: 240, 128>}, {transform_indices = @transform_6, window_bounds = array<i64: 32, 128>}]} {
    %c0 = arith.constant 0 : index
    %c0_0 = arith.constant 0 : index
    %0 = vector.load %arg1[%c0, %c0_0] : memref<32x3xf32, #tpu.memory_space<vmem>>, vector<32x3xf32>
    %c0_1 = arith.constant 0 : index
    %c0_2 = arith.constant 0 : index
    %c0_3 = arith.constant 0 : index
    %1 = vector.load %arg2[%c0_1, %c0_2, %c0_3] : memref<32x16x3xf32, #tpu.memory_space<vmem>>, vector<32x16x3xf32>
    %c0_4 = arith.constant 0 : index
    %c0_5 = arith.constant 0 : index
    %c0_6 = arith.constant 0 : index
    %2 = vector.load %arg3[%c0_4, %c0_5, %c0_6] : memref<32x16x16xf32, #tpu.memory_space<vmem>>, vector<32x16x16xf32>
    %c0_7 = arith.constant 0 : index
    %c0_8 = arith.constant 0 : index
    %3 = vector.load %arg4[%c0_7, %c0_8] : memref<15x3xf32, #tpu.memory_space<vmem>>, vector<15x3xf32>
    %c0_9 = arith.constant 0 : index
    %c0_10 = arith.constant 0 : index
    %4 = vector.load %arg5[%c0_9, %c0_10] : memref<1x15xf32, #tpu.memory_space<vmem>>, vector<1x15xf32>
    %5 = vector.shape_cast %0 : vector<32x3xf32> to vector<32x1x3xf32>
    %6 = vector.broadcast %5 : vector<32x1x3xf32> to vector<32x16x3xf32>
    %7 = arith.subf %1, %6 : vector<32x16x3xf32>
    %8 = vector.shape_cast %7 : vector<32x16x3xf32> to vector<512x3xf32>
    %cst = arith.constant dense<0.000000e+00> : vector<512x15xf32>
    %9 = tpu.matmul %8, %3, %cst {dimension_numbers = #tpu.dot_dimension_numbers<[1], [1], [0], [0], [0, 0, 1, 0], [], []>} : vector<512x3xf32>, vector<15x3xf32>, vector<512x15xf32> -> vector<512x15xf32>
    %10 = arith.mulf %8, %8 : vector<512x3xf32>
    %cst_11 = arith.constant dense<0.000000e+00> : vector<512xf32>
    %11 = vector.multi_reduction <add>, %10, %cst_11 [1] : vector<512x3xf32> to vector<512xf32>
    %12 = vector.shape_cast %11 : vector<512xf32> to vector<512x1xf32>
    %13 = vector.broadcast %12 : vector<512x1xf32> to vector<512x15xf32>
    %14 = vector.broadcast %4 : vector<1x15xf32> to vector<512x15xf32>
    %15 = arith.addf %13, %14 : vector<512x15xf32>
    %cst_12 = arith.constant 2.000000e+00 : f32
    %16 = vector.broadcast %cst_12 : f32 to vector<512x15xf32>
    %17 = arith.mulf %16, %9 : vector<512x15xf32>
    %18 = arith.subf %15, %17 : vector<512x15xf32>
    %cst_13 = arith.constant 0.000000e+00 : f32
    %19 = vector.broadcast %cst_13 : f32 to vector<512x15xf32>
    %20 = arith.maximumf %18, %19 : vector<512x15xf32>
    %21 = math.sqrt %20 : vector<512x15xf32>
    %cst_14 = arith.constant 1.250000e+00 : f32
    %22 = vector.broadcast %cst_14 : f32 to vector<512x15xf32>
    %23 = arith.mulf %21, %22 : vector<512x15xf32>
    %cst_15 = arith.constant 1.000000e+00 : f32
    %24 = vector.broadcast %cst_15 : f32 to vector<512x15xf32>
    %25 = arith.subf %24, %23 : vector<512x15xf32>
    %cst_16 = arith.constant 0.000000e+00 : f32
    %26 = vector.broadcast %cst_16 : f32 to vector<512x15xf32>
    %27 = arith.maximumf %25, %26 : vector<512x15xf32>
    %28 = vector.shape_cast %27 : vector<512x15xf32> to vector<32x16x15xf32>
    %29 = arith.truncf %28 : vector<32x16x15xf32> to vector<32x16x15xbf16>
    %30 = arith.truncf %2 : vector<32x16x16xf32> to vector<32x16x16xbf16>
    %cst_17 = arith.constant dense<0.000000e+00> : vector<32x15x16xf32>
    %31 = tpu.matmul %29, %30, %cst_17 {dimension_numbers = #tpu.dot_dimension_numbers<[1], [1], [2], [2], [0, 0, 0, 2, 1, 2], [0], [0]>} : vector<32x16x15xbf16>, vector<32x16x16xbf16>, vector<32x15x16xf32> -> vector<32x15x16xf32>
    %32 = vector.shape_cast %31 : vector<32x15x16xf32> to vector<32x240xf32>
    %33 = arith.truncf %32 : vector<32x240xf32> to vector<32x240xbf16>
    %c0_18 = arith.constant 0 : index
    %c0_19 = arith.constant 0 : index
    %34 = vector.load %arg6[%c0_18, %c0_19] : memref<240x128xbf16, #tpu.memory_space<vmem>>, vector<240x128xbf16>
    %cst_20 = arith.constant dense<0.000000e+00> : vector<32x128xf32>
    %35 = tpu.matmul %33, %34, %cst_20 {dimension_numbers = #tpu.dot_dimension_numbers<[1], [0], [0], [1], [0, 0, 1, 1], [], []>} : vector<32x240xbf16>, vector<240x128xbf16>, vector<32x128xf32> -> vector<32x128xf32>
    %c0_21 = arith.constant 0 : index
    %c0_22 = arith.constant 0 : index
    %36 = vector.load %arg7[%c0_21, %c0_22] : memref<32x128xf32, #tpu.memory_space<vmem>>, vector<32x128xf32>
    tpu.vector_store %arg7[%c0_21, %c0_22], %35 {strides = array<i32>} : memref<32x128xf32, #tpu.memory_space<vmem>>, vector<32x128xf32>,
    return
  }
  func.func @transform_0(%arg0: i32) -> (i32, i32) {
    %c0_i32 = arith.constant 0 : i32
    %c0_i32_0 = arith.constant 0 : i32
    return %arg0, %c0_i32 : i32, i32
  }
  func.func @transform_1(%arg0: i32) -> (i32, i32, i32) {
    %c0_i32 = arith.constant 0 : i32
    %c0_i32_0 = arith.constant 0 : i32
    %c0_i32_1 = arith.constant 0 : i32
    return %arg0, %c0_i32, %c0_i32_0 : i32, i32, i32
  }
  func.func @transform_2(%arg0: i32) -> (i32, i32, i32) {
    %c0_i32 = arith.constant 0 : i32
    %c0_i32_0 = arith.constant 0 : i32
    %c0_i32_1 = arith.constant 0 : i32
    return %arg0, %c0_i32, %c0_i32_0 : i32, i32, i32
  }
  func.func @transform_3(%arg0: i32) -> (i32, i32) {
    %c0_i32 = arith.constant 0 : i32
    %c0_i32_0 = arith.constant 0 : i32
    %c0_i32_1 = arith.constant 0 : i32
    return %c0_i32, %c0_i32_0 : i32, i32
  }
  func.func @transform_4(%arg0: i32) -> (i32, i32) {
    %c0_i32 = arith.constant 0 : i32
    %c0_i32_0 = arith.constant 0 : i32
    %c0_i32_1 = arith.constant 0 : i32
    return %c0_i32, %c0_i32_0 : i32, i32
  }
  func.func @transform_5(%arg0: i32) -> (i32, i32) {
    %c0_i32 = arith.constant 0 : i32
    %c0_i32_0 = arith.constant 0 : i32
    %c0_i32_1 = arith.constant 0 : i32
    return %c0_i32, %c0_i32_0 : i32, i32
  }
  func.func @transform_6(%arg0: i32) -> (i32, i32) {
    %c0_i32 = arith.constant 0 : i32
    %c0_i32_0 = arith.constant 0 : i32
    return %arg0, %c0_i32 : i32, i32
  }
}

</mosaic_0001>

<bundles_post_ra>
// kernel: tpu_custom_call.1
= control target key start
LH: loop header
LB: loop body
LE: loop exit
PB: predicated region body
PF: predicated region fallthrough
CT: control target
= control target key end

     0   :  { %vm584_vm0 = vcmask 23552   ;;  %v168_v2 = vlaneseq  ;;  %v6715_v3 = vmov 1966171168   ;;  %s9499_s0 = inlined_call_operand.vmem [shape: f32[32,3], index: 0, kind: input, shape index: {}]   ;;  %s9500_s1 = inlined_call_operand.vmem [shape: f32[32,16,3], index: 1, kind: input, shape index: {}]   ;;  %s9501_s2 = inlined_call_operand.vmem [shape: f32[32,16,16], index: 2, kind: input, shape index: {}]   ;;  %s9502_s3 = inlined_call_operand.vmem [shape: f32[15,3], index: 3, kind: input, shape index: {}]   ;;  %s9503_s4 = inlined_call_operand.vmem [shape: f32[1,15], index: 4, kind: input, shape index: {}]   ;;  %s9504_s5 = inlined_call_operand.vmem [shape: bf16[240,128], index: 5, kind: input, shape index: {}]   ;;  %s9505_s6 = inlined_call_operand.hbm [shape: f32[32,128], index: 6, kind: output, shape index: {}]  }
   0x1   :  { %v158_v0 = vld [vmem:[%s9502_s3 + $0x8] sm:$0x7f]  ;;  %v157_v1 = vld [vmem:[%s9502_s3] sm:$0xff]  ;;  %v166_v4 = vunpack.c.l.s4 %v6715_v3  ;;  %v31_v29 = vld [vmem:[%s9500_s1 + $0x10] sm:$0xff] }
   0x2   :  { %6106 = vmatprep.subr.msk.mxu0 %vm584_vm0, %v158_v0  ;;  %v6774_v5 = vshrl.u32 %v168_v2, 7  ;;  %v25_v6 = vld [vmem:[%s9499_s0] sm:$0xff]  ;;  %v6783_v9 = vld [vmem:[%s9499_s0 + $0x8] sm:$0xff]  ;;  %v32_v30 = vld [vmem:[%s9500_s1 + $0x18] sm:$0xff] }
   0x3   :  { %6107 = vmatpush3.xpose.msk.msra.mxu0 %vm584_vm0, %v158_v0  ;;  %v164_v7 = vcombine.high %v25_v6, %v25_v6  ;;  %v167_v8 = vunpack.c.0.s8 %v166_v4  ;;  %v29_v19 = vld [vmem:[%s9500_s1] sm:$0xff]  ;;  %v30_v20 = vld [vmem:[%s9500_s1 + $0x8] sm:$0xff]  ;;  %v39_v38 = vld [vmem:[%s9500_s1 + $0x50] sm:$0xff] }
   0x4   :  { %9556 = vst [vmem:[#allocation5_spill] sm:$0xff] %v6774_v5  ;;  %6108 = vmatprep.subr.msk.mxu0 %vm584_vm0, %v157_v1  ;;  %v6791_v12 = vsub.s32 0, %v6774_v5  ;;  %v46_v26 = vld [vmem:[%s9500_s1 + $0x88] sm:$0xff]  ;;  %v37_v28 = vld [vmem:[%s9500_s1 + $0x40] sm:$0xff]  ;;  %v40_v44 = vld [vmem:[%s9500_s1 + $0x58] sm:$0xff] }
   0x5   :  { %v6787_v10 = vsub.s32 %v167_v8, %v6774_v5  ;;  %v33_v36 = vld [vmem:[%s9500_s1 + $0x20] sm:$0xff]  ;;  %v38_v43 = vld [vmem:[%s9500_s1 + $0x48] sm:$0xff]  ;;  %v35_v60 = vld [vmem:[%s9500_s1 + $0x30] sm:$0xff] }
   0x6   :  { %v45_v45 = vld [vmem:[%s9500_s1 + $0x80] sm:$0xff]  ;;  %v34_v54 = vld [vmem:[%s9500_s1 + $0x28] sm:$0xff] }
   0x7   :  { %6109 = vmatpush3.xpose.msk.msra.mxu0 %vm584_vm0, %v157_v1  ;;  %v171_v11 = vrot.slane %v25_v6, %v6787_v10  ;;  %v220_v13 = vrot.slane %v6783_v9, %v6787_v10  ;;  %v178_v14 = vrot.slane %v164_v7, %v6787_v10  ;;  %v42_v2 = vld [vmem:[%s9500_s1 + $0x68] sm:$0xff]  ;;  %v41_v3 = vld [vmem:[%s9500_s1 + $0x60] sm:$0xff]  ;;  %v36_v6 = vld [vmem:[%s9500_s1 + $0x38] sm:$0xff] }
   0x9   :  { %v179_v15 = vcombine.high %v171_v11, %v171_v11  ;;  %v187_v16 = vrot.slane %v171_v11, %v6787_v10  ;;  %v6798_v17 = vrot.slane %v220_v13, %v6787_v10  ;;  %v194_v18 = vrot.slane %v178_v14, %v6787_v10  ;;  %v48_v11 = vld [vmem:[%s9500_s1 + $0x98] sm:$0xff] }
   0xa   :  { %v180_v21 = vcombine.high %v178_v14, %v178_v14  ;;  %v228_v22 = vcombine.high %v220_v13, %v220_v13 }
   0xb   :  { %v209_v23 = vcombine.high %v187_v16, %v187_v16  ;;  %v363_v24 = vrot.slane %v187_v16, %v6791_v12  ;;  %v201_v25 = vrot.slane %v179_v15, %v6787_v10  ;;  %v395_v27 = vrot.slane %v6798_v17, %v6791_v12 }
   0xc   :  { %v379_v31 = vrot.slane %v194_v18, %v6791_v12  ;;  %v6825_v32 = vrot.slane %v180_v21, %v6787_v10  ;;  %v210_v48 = vcombine.high %v194_v18, %v194_v18  ;;  %v6861_v49 = vrot.slane %v228_v22, %v6787_v10  ;;  %v47_v18 = vld [vmem:[%s9500_s1 + $0x90] sm:$0xff] }
   0xd   :  { %v6827_v33 = vsub.f32 %v29_v19, %v363_v24  ;;  %v6829_v34 = vsub.f32 %v30_v20, %v363_v24  ;;  %v367_v35 = vrot.slane %v201_v25, %v6791_v12  ;;  %v371_v37 = vrot.slane %v209_v23, %v6791_v12  ;;  %v44_v23 = vld [vmem:[%s9500_s1 + $0x78] sm:$0xff] }
   0xe   :  { %v6839_v39 = vsub.f32 %v46_v26, %v395_v27  ;;  %v211_v40 = vcombine.high %v201_v25, %v201_v25  ;;  %v6841_v41 = vsub.f32 %v37_v28, %v379_v31  ;;  %v383_v42 = vrot.slane %v6825_v32, %v6791_v12 }
   0xf   :  { %6110 = vmatprep.mubr.msk.f32.mxu0 %vm584_vm0, %v6827_v33  ;;  %v6856_v46 = vsub.f32 %v31_v29, %v367_v35  ;;  %v6858_v47 = vsub.f32 %v32_v30, %v367_v35  ;;  %v6865_v50 = vsub.f32 %v33_v36, %v371_v37  ;;  %v6879_v56 = vsub.f32 %v38_v43, %v379_v31 }
  0x10   :  { %6111 = vmatmul.mubr.msk.f32.vlgmr.msra.gmra.mxu0 %vm584_vm0, %v6829_v34  ;;  %v1185_v51 = vmul.f32 %v6839_v39, %v6839_v39  ;;  %v1176_v52 = vmul.f32 %v6841_v41, %v6841_v41  ;;  %v6871_v53 = vsub.f32 %v39_v38, %v383_v42  ;;  %v375_v55 = vrot.slane %v211_v40, %v6791_v12  ;;  %v50_v38 = vld [vmem:[%s9500_s1 + $0xa8] sm:$0xff] }
  0x11   :  { %6113 = vmatprep.mubr.msk.f32.mxu0 %vm584_vm0, %v6856_v46  ;;  %v6881_v57 = vsub.f32 %v40_v44, %v383_v42  ;;  %v6883_v58 = vsub.f32 %v45_v45, %v395_v27  ;;  %v212_v62 = vcombine.high %v6825_v32, %v6825_v32  ;;  %v1177_v0 = vmul.f32 %v6879_v56, %v6879_v56  ;;  %v43_v32 = vld [vmem:[%s9500_s1 + $0x70] sm:$0xff] }
  0x12   :  { %v1283_v59 = vsel %vm584_vm0, %v1185_v51, 0.0  ;;  %v1256_v61 = vsel %vm584_vm0, %v1176_v52, 0.0  ;;  %v1178_v63 = vmul.f32 %v6871_v53, %v6871_v53  ;;  %v6906_v4 = vsub.f32 %v34_v54, %v371_v37  ;;  %v52_v52 = vld [vmem:[%s9500_s1 + $0xb8] sm:$0xff] }
  0x13   :  { %1284 = vadd.xlane.f32.xlu1 %v1283_v59  ;;  %1257 = vadd.xlane.f32.xlu0 %v1256_v61  ;;  %v1179_v1 = vmul.f32 %v6881_v57, %v6881_v57  ;;  %v1184_v7 = vmul.f32 %v6883_v58, %v6883_v58  ;;  %v387_v8 = vrot.slane %v210_v48, %v6791_v12  ;;  %v1259_v16 = vsel %vm584_vm0, %v1177_v0, 0.0 }
  0x14   :  { %6114 = vmatmul.mubr.msk.f32.gmra.mxu0 %vm584_vm0, %v6858_v47  ;;  %v399_v13 = vrot.slane %v6861_v49, %v6791_v12  ;;  %v6921_v14 = vsub.f32 %v35_v60, %v375_v55  ;;  %v1262_v15 = vsel %vm584_vm0, %v1178_v63, 0.0  ;;  %v6933_v24 = vsub.f32 %v36_v6, %v375_v55  ;;  %v51_v60 = vld [vmem:[%s9500_s1 + $0xb0] sm:$0xff] }
  0x15   :  { %6116 = vmatprep.mubr.msk.f32.mxu0 %vm584_vm0, %v6865_v50  ;;  %v1265_v19 = vsel %vm584_vm0, %v1179_v1, 0.0  ;;  %v1280_v20 = vsel %vm584_vm0, %v1184_v7, 0.0  ;;  %v533_v21 = vsub.f32 %v42_v2, %v387_v8  ;;  %v532_v22 = vsub.f32 %v41_v3, %v387_v8 }
  0x16   :  { %v6935_v25 = vsub.f32 %v48_v11, %v399_v13  ;;  %v391_v26 = vrot.slane %v212_v62, %v6791_v12  ;;  %v6940_v29 = vsub.f32 %v47_v18, %v399_v13  ;;  %v258_v30 = vcombine.high %v6798_v17, %v6798_v17 }
  0x17   :  { %1263 = vadd.xlane.f32.xlu1 %v1262_v15  ;;  %1260 = vadd.xlane.f32.xlu0 %v1259_v16  ;;  %v1181_v27 = vmul.f32 %v533_v21, %v533_v21  ;;  %v1180_v28 = vmul.f32 %v532_v22, %v532_v22  ;;  %v213_v31 = vcombine.high %v6783_v9, %v6783_v9  ;;  %v49_v9 = vld [vmem:[%s9500_s1 + $0xa0] sm:$0xff] }
  0x18   :  { %6117 = vmatmul.mubr.msk.f32.gmra.mxu0 %vm584_vm0, %v6906_v4  ;;  %v1187_v37 = vmul.f32 %v6935_v25, %v6935_v25  ;;  %v535_v17 = vsub.f32 %v44_v23, %v391_v26  ;;  %v1186_v40 = vmul.f32 %v6940_v29, %v6940_v29  ;;  %v403_v42 = vrot.slane %v258_v30, %v6791_v12 }
  0x19   :  { %6119 = vmatprep.mubr.msk.f32.mxu0 %vm584_vm0, %v6921_v14  ;;  %v1271_v35 = vsel %vm584_vm0, %v1181_v27, 0.0  ;;  %v1268_v36 = vsel %vm584_vm0, %v1180_v28, 0.0  ;;  %v260_v43 = vcombine.high %v6861_v49, %v6861_v49  ;;  %v534_v44 = vsub.f32 %v43_v32, %v391_v26 }
  0x1a   :  { %v1289_v45 = vsel %vm584_vm0, %v1187_v37, 0.0  ;;  %v1183_v48 = vmul.f32 %v535_v17, %v535_v17  ;;  %v227_v54 = vrot.slane %v213_v31, %v6787_v10  ;;  %v1286_v49 = vsel %vm584_vm0, %v1186_v40, 0.0 }
  0x1b   :  { %1266 = vadd.xlane.f32.xlu1 %v1265_v19  ;;  %1281 = vadd.xlane.f32.xlu0 %v1280_v20  ;;  %v1182_v51 = vmul.f32 %v534_v44, %v534_v44  ;;  %v6978_v55 = vsub.f32 %v50_v38, %v403_v42  ;;  %v407_v59 = vrot.slane %v260_v43, %v6791_v12 }
  0x1c   :  { %6120 = vmatmul.mubr.msk.f32.gmra.mxu0 %vm584_vm0, %v6933_v24  ;;  %v1277_v61 = vsel %vm584_vm0, %v1183_v48, 0.0  ;;  %v243_v62 = vrot.slane %v227_v54, %v6787_v10 }
  0x1d   :  { %6122 = vmatprep.mubr.msk.f32.mxu0 %vm584_vm0, %v6841_v41  ;;  %v540_v41 = vsub.f32 %v49_v9, %v403_v42 }
  0x1f   :  { %1272 = vadd.xlane.f32.xlu1 %v1271_v35  ;;  %1269 = vadd.xlane.f32.xlu0 %v1268_v36 }
  0x20   :  { %6123 = vmatmul.mubr.msk.f32.gmra.mxu0 %vm584_vm0, %v6879_v56  ;;  %v1274_v56 = vsel %vm584_vm0, %v1182_v51, 0.0 }
  0x21   :  { %6125 = vmatprep.mubr.msk.f32.mxu0 %vm584_vm0, %v6871_v53 }
  0x23   :  { %1290 = vadd.xlane.f32.xlu1 %v1289_v45  ;;  %1287 = vadd.xlane.f32.xlu0 %v1286_v49 }
  0x24   :  { %11 = vsyncpa [#allocation3], 0  ;;  %6126 = vmatmul.mubr.msk.f32.gmra.mxu0 %vm584_vm0, %v6881_v57  ;;  %v1189_v63 = vmul.f32 %v6978_v55, %v6978_v55  ;;  %v1188_v0 = vmul.f32 %v540_v41, %v540_v41  ;;  %v6993_v1 = vsub.f32 %v52_v52, %v407_v59  ;;  %v542_v2 = vsub.f32 %v51_v60, %v407_v59  ;;  %v54_v11 = vld [vmem:[%s9500_s1 + $0xc8] sm:$0xff]  ;;  %v53_v13 = vld [vmem:[%s9500_s1 + $0xc0] sm:$0xff]  ;;  %s6721_s22 = smov 16   ;;  %s6722_s23 = smov 32  }
  0x25   :  { %6128 = vmatprep.mubr.msk.f32.mxu0 %vm584_vm0, %v532_v22  ;;  %v411_v53 = vrot.slane %v243_v62, %v6791_v12  ;;  %v229_v3 = vcombine.high %v227_v54, %v227_v54  ;;  %v1169_v15 = vmul.f32 %v6829_v34, %v6829_v34  ;;  %v1168_v16 = vmul.f32 %v6827_v33, %v6827_v33  ;;  %v55_v28 = vld [vmem:[%s9500_s1 + $0xd0] sm:$0xff]  ;;  %v58_v38 = vld [vmem:[%s9500_s1 + $0xe8] sm:$0xff]  ;;  %v57_v9 = vld [vmem:[%s9500_s1 + $0xe0] sm:$0xff]  ;;  %s6723_s26 = smov 48   ;;  %s6725_s30 = smov 80  }
  0x26   :  { %v1295_v6 = vsel %vm584_vm0, %v1189_v63, 0.0  ;;  %v1292_v57 = vsel %vm584_vm0, %v1188_v0, 0.0  ;;  %v1191_v7 = vmul.f32 %v6993_v1, %v6993_v1  ;;  %v1190_v8 = vmul.f32 %v542_v2, %v542_v2  ;;  %v27_v40 = vld [vmem:[%s9499_s0 + $0x10] sm:$0xff]  ;;  %s6727_s9 = smov 112  }
  0x27   :  { %1278 = vadd.xlane.f32.xlu1 %v1277_v61  ;;  %1275 = vadd.xlane.f32.xlu0 %v1274_v56  ;;  %v545_v18 = vsub.f32 %v54_v11, %v411_v53  ;;  %v257_v22 = vrot.slane %v229_v3, %v6787_v10  ;;  %v1235_v34 = vsel %vm584_vm0, %v1169_v15, 0.0  ;;  %v1232_v33 = vsel %vm584_vm0, %v1168_v16, 0.0  ;;  %v59_v61 = vld [vmem:[%s9500_s1 + $0xf0] sm:$0xff] }
  0x28   :  { %6129 = vmatmul.mubr.msk.f32.gmra.mxu0 %vm584_vm0, %v533_v21  ;;  %v1301_v19 = vsel %vm584_vm0, %v1191_v7, 0.0  ;;  %v1298_v20 = vsel %vm584_vm0, %v1190_v8, 0.0  ;;  %v544_v21 = vsub.f32 %v53_v13, %v411_v53  ;;  %v1170_v30 = vmul.f32 %v6856_v46, %v6856_v46  ;;  %v61_v7 = vld [vmem:[%s9500_s1 + $0x100] sm:$0xff] }
  0x29   :  { %6131 = vmatprep.mubr.msk.f32.mxu0 %vm584_vm0, %v534_v44  ;;  %v1193_v23 = vmul.f32 %v545_v18, %v545_v18  ;;  %v415_v27 = vrot.slane %v257_v22, %v6791_v12  ;;  %v259_v31 = vcombine.high %v243_v62, %v243_v62  ;;  %v1173_v42 = vmul.f32 %v6906_v4, %v6906_v4  ;;  %v60_v62 = vld [vmem:[%s9500_s1 + $0xf8] sm:$0xff] }
  0x2a   :  { %v1192_v26 = vmul.f32 %v544_v21, %v544_v21  ;;  %v1238_v46 = vsel %vm584_vm0, %v1170_v30, 0.0  ;;  %v1172_v43 = vmul.f32 %v6865_v50, %v6865_v50  ;;  %v261_v52 = vcombine.high %v257_v22, %v257_v22 }
  0x2b   :  { %1296 = vadd.xlane.f32.xlu1 %v1295_v6  ;;  %1293 = vadd.xlane.f32.xlu0 %v1292_v57  ;;  %v546_v36 = vsub.f32 %v55_v28, %v415_v27  ;;  %v269_v54 = vrot.slane %v27_v40, %v6787_v10  ;;  %v1247_v50 = vsel %vm584_vm0, %v1173_v42, 0.0  ;;  %v262_v56 = vcombine.high %v27_v40, %v27_v40  ;;  %v67_v40 = vld [vmem:[%s9500_s1 + $0x130] sm:$0xff] }
  0x2c   :  { %6132 = vmatmul.mubr.msk.f32.gmra.mxu0 %vm584_vm0, %v535_v17  ;;  %v1304_v32 = vsel %vm584_vm0, %v1192_v26, 0.0  ;;  %v1244_v4 = vsel %vm584_vm0, %v1172_v43, 0.0 }
  0x2d   :  { %6134 = vmatprep.mubr.msk.f32.mxu0 %vm584_vm0, %v6883_v58  ;;  %v56_v58 = vld [vmem:[%s9500_s1 + $0xd8] sm:$0xff]  ;;  %v1194_v17 = vmul.f32 %v546_v36, %v546_v36  ;;  %v285_v59 = vrot.slane %v269_v54, %v6787_v10  ;;  %v277_v60 = vcombine.high %v269_v54, %v269_v54  ;;  %v276_v8 = vrot.slane %v262_v56, %v6787_v10 }
  0x2e   :  { %v547_v35 = vsub.f32 %v56_v58, %v415_v27 }
  0x2f   :  { %1302 = vadd.xlane.f32.xlu1 %v1301_v19  ;;  %1299 = vadd.xlane.f32.xlu0 %v1298_v20  ;;  %v1310_v45 = vsel %vm584_vm0, %v1194_v17, 0.0  ;;  %v427_v3 = vrot.slane %v285_v59, %v6791_v12  ;;  %v299_v6 = vrot.slane %v277_v60, %v6787_v10  ;;  %v307_v19 = vcombine.high %v285_v59, %v285_v59 }
  0x30   :  { %6135 = vmatmul.mubr.msk.f32.gmra.mxu0 %vm584_vm0, %v6839_v39  ;;  %v1171_v39 = vmul.f32 %v6858_v47, %v6858_v47  ;;  %v1195_v47 = vmul.f32 %v547_v35, %v547_v35  ;;  %v7104_v22 = vrot.slane %v276_v8, %v6787_v10 }
  0x31   :  { %6137 = vmatprep.mubr.msk.f32.mxu0 %vm584_vm0, %v6940_v29  ;;  %v1307_v29 = vsel %vm584_vm0, %v1193_v23, 0.0  ;;  %v552_v16 = vsub.f32 %v61_v7, %v427_v3  ;;  %v435_v28 = vrot.slane %v307_v19, %v6791_v12 }
  0x32   :  { %v1241_v37 = vsel %vm584_vm0, %v1171_v39, 0.0  ;;  %v1313_v44 = vsel %vm584_vm0, %v1195_v47, 0.0  ;;  %v309_v39 = vcombine.high %v299_v6, %v299_v6 }
  0x33   :  { %1236 = vadd.xlane.f32.xlu1 %v1235_v34  ;;  %1233 = vadd.xlane.f32.xlu0 %v1232_v33  ;;  %v64_v34 = vld [vmem:[%s9500_s1 + $0x118] sm:$0xff]  ;;  %v1200_v27 = vmul.f32 %v552_v16, %v552_v16 }
  0x34   :  { %6138 = vmatmul.mubr.msk.f32.gmra.mxu0 %vm584_vm0, %v6935_v25  ;;  %v419_v25 = vrot.slane %v259_v31, %v6791_v12  ;;  %v65_v31 = vld [vmem:[%s9500_s1 + $0x120] sm:$0xff] }
  0x35   :  { %6140 = vmatprep.mubr.msk.f32.mxu0 %vm584_vm0, %v540_v41  ;;  %v423_v41 = vrot.slane %v261_v52, %v6791_v12  ;;  %v1328_v17 = vsel %vm584_vm0, %v1200_v27, 0.0 }
  0x36   :  { %v549_v48 = vsub.f32 %v58_v38, %v419_v25  ;;  %v548_v51 = vsub.f32 %v57_v9, %v419_v25  ;;  %v556_v38 = vsub.f32 %v65_v31, %v435_v28  ;;  %v439_v9 = vrot.slane %v309_v39, %v6791_v12  ;;  %v79_v31 = vld [vmem:[%s9500_s1 + $0x190] sm:$0xff] }
  0x37   :  { %1308 = vadd.xlane.f32.xlu1 %v1307_v29  ;;  %1305 = vadd.xlane.f32.xlu0 %v1304_v32  ;;  %v550_v53 = vsub.f32 %v59_v61, %v423_v41  ;;  %v551_v57 = vsub.f32 %v60_v62, %v423_v41  ;;  %v443_v29 = vrot.slane %v7104_v22, %v6791_v12  ;;  %v72_v61 = vld [vmem:[%s9500_s1 + $0x158] sm:$0xff] }
  0x38   :  { %6141 = vmatmul.mubr.msk.f32.gmra.mxu0 %vm584_vm0, %v6978_v55  ;;  %v1197_v49 = vmul.f32 %v549_v48, %v549_v48  ;;  %v1196_v55 = vmul.f32 %v548_v51, %v548_v51  ;;  %v278_v32 = vcombine.high %v276_v8, %v276_v8  ;;  %v1204_v54 = vmul.f32 %v556_v38, %v556_v38 }
  0x39   :  { %6143 = vmatprep.mubr.msk.f32.mxu0 %vm584_vm0, %v542_v2  ;;  %v1174_v2 = vmul.f32 %v6921_v14, %v6921_v14  ;;  %v62_v14 = vld [vmem:[%s9500_s1 + $0x108] sm:$0xff]  ;;  %v1199_v13 = vmul.f32 %v551_v57, %v551_v57  ;;  %v1198_v15 = vmul.f32 %v550_v53, %v550_v53 }
  0x3a   :  { %v1319_v63 = vsel %vm584_vm0, %v1197_v49, 0.0  ;;  %v1316_v0 = vsel %vm584_vm0, %v1196_v55, 0.0  ;;  %v553_v20 = vsub.f32 %v62_v14, %v427_v3  ;;  %v306_v43 = vrot.slane %v278_v32, %v6787_v10 }
  0x3b   :  { %1242 = vadd.xlane.f32.xlu1 %v1241_v37  ;;  %1239 = vadd.xlane.f32.xlu0 %v1238_v46  ;;  %v1250_v11 = vsel %vm584_vm0, %v1174_v2, 0.0  ;;  %v1325_v33 = vsel %vm584_vm0, %v1199_v13, 0.0  ;;  %v1322_v26 = vsel %vm584_vm0, %v1198_v15, 0.0  ;;  %v66_v37 = vld [vmem:[%s9500_s1 + $0x128] sm:$0xff]  ;;  %v558_v49 = vsub.f32 %v67_v40, %v439_v9  ;;  %v71_v2 = vld [vmem:[%s9500_s1 + $0x150] sm:$0xff] }
  0x3c   :  { %6144 = vmatmul.mubr.msk.f32.gmra.mxu0 %vm584_vm0, %v6993_v1  ;;  %v1175_v1 = vmul.f32 %v6933_v24, %v6933_v24  ;;  %v1201_v23 = vmul.f32 %v553_v20, %v553_v20  ;;  %v447_v41 = vrot.slane %v306_v43, %v6791_v12  ;;  %v1340_v56 = vsel %vm584_vm0, %v1204_v54, 0.0 }
  0x3d   :  { %6146 = vmatprep.mubr.msk.f32.mxu0 %vm584_vm0, %v544_v21  ;;  %v63_v21 = vld [vmem:[%s9500_s1 + $0x110] sm:$0xff]  ;;  %v1206_v8 = vmul.f32 %v558_v49, %v558_v49  ;;  %v310_v15 = vcombine.high %v306_v43, %v306_v43 }
  0x3e   :  { %v1253_v24 = vsel %vm584_vm0, %v1175_v1, 0.0  ;;  %v1331_v46 = vsel %vm584_vm0, %v1201_v23, 0.0  ;;  %v308_v1 = vcombine.high %v7104_v22, %v7104_v22 }
  0x3f   :  { %1314 = vadd.xlane.f32.xlu1 %v1313_v44  ;;  %1311 = vadd.xlane.f32.xlu0 %v1310_v45  ;;  %v557_v45 = vsub.f32 %v66_v37, %v435_v28  ;;  %v1346_v22 = vsel %vm584_vm0, %v1206_v8, 0.0  ;;  %v455_v27 = vrot.slane %v310_v15, %v6791_v12 }
  0x40   :  { %6147 = vmatmul.mubr.msk.f32.gmra.mxu0 %vm584_vm0, %v545_v18  ;;  %v431_v18 = vrot.slane %v299_v6, %v6791_v12  ;;  %v451_v13 = vrot.slane %v308_v1, %v6791_v12 }
  0x41   :  { %6149 = vmatprep.mubr.msk.f32.mxu0 %vm584_vm0, %v546_v36  ;;  %v7125_v36 = vld [vmem:[%s9499_s0 + $0x18] sm:$0xff]  ;;  %v1205_v62 = vmul.f32 %v557_v45, %v557_v45 }
  0x42   :  { %v554_v58 = vsub.f32 %v63_v21, %v431_v18  ;;  %v555_v30 = vsub.f32 %v64_v34, %v431_v18  ;;  %v318_v44 = vrot.slane %v7125_v36, %v6787_v10  ;;  %v74_v21 = vld [vmem:[%s9500_s1 + $0x168] sm:$0xff]  ;;  %v311_v40 = vcombine.high %v7125_v36, %v7125_v36  ;;  %v81_v36 = vld [vmem:[%s9500_s1 + $0x1a0] sm:$0xff] }
  0x43   :  { %1248 = vadd.xlane.f32.xlu1 %v1247_v50  ;;  %1245 = vadd.xlane.f32.xlu0 %v1244_v4  ;;  %v1343_v7 = vsel %vm584_vm0, %v1205_v62, 0.0 }
  0x44   :  { %6150 = vmatmul.mubr.msk.f32.gmra.mxu0 %vm584_vm0, %v547_v35  ;;  %v69_v35 = vld [vmem:[%s9500_s1 + $0x140] sm:$0xff]  ;;  %v1203_v47 = vmul.f32 %v555_v30, %v555_v30  ;;  %v1202_v25 = vmul.f32 %v554_v58, %v554_v58  ;;  %v7153_v59 = vrot.slane %v318_v44, %v6787_v10  ;;  %v326_v6 = vcombine.high %v318_v44, %v318_v44 }
  0x45   :  { %6152 = vmatprep.mubr.msk.f32.mxu0 %vm584_vm0, %v548_v51  ;;  %v560_v42 = vsub.f32 %v69_v35, %v443_v29  ;;  %v68_v51 = vld [vmem:[%s9500_s1 + $0x138] sm:$0xff]  ;;  %v325_v54 = vrot.slane %v311_v40, %v6787_v10 }
  0x46   :  { %v1337_v52 = vsel %vm584_vm0, %v1203_v47, 0.0  ;;  %v1334_v50 = vsel %vm584_vm0, %v1202_v25, 0.0  ;;  %v559_v60 = vsub.f32 %v68_v51, %v439_v9  ;;  %v459_v3 = vrot.slane %v7153_v59, %v6791_v12  ;;  %v80_v9 = vld [vmem:[%s9500_s1 + $0x198] sm:$0xff] }
  0x47   :  { %1320 = vadd.xlane.f32.xlu1 %v1319_v63  ;;  %1317 = vadd.xlane.f32.xlu0 %v1316_v0  ;;  %v1208_v4 = vmul.f32 %v560_v42, %v560_v42  ;;  %v348_v19 = vrot.slane %v326_v6, %v6787_v10  ;;  %v356_v25 = vcombine.high %v7153_v59, %v7153_v59 }
  0x48   :  { %6153 = vmatmul.mubr.msk.f32.gmra.mxu0 %vm584_vm0, %v549_v48  ;;  %v70_v48 = vld [vmem:[%s9500_s1 + $0x148] sm:$0xff]  ;;  %v1207_v34 = vmul.f32 %v559_v60, %v559_v60 }
  0x49   :  { %6155 = vmatprep.mubr.msk.f32.mxu0 %vm584_vm0, %v550_v53  ;;  %v561_v55 = vsub.f32 %v70_v48, %v443_v29  ;;  %v1352_v63 = vsel %vm584_vm0, %v1208_v4, 0.0  ;;  %v563_v53 = vsub.f32 %v72_v61, %v447_v41  ;;  %v463_v39 = vrot.slane %v348_v19, %v6791_v12  ;;  %v76_v29 = vld [vmem:[%s9500_s1 + $0x178] sm:$0xff] }
  0x4a   :  { %v1349_v32 = vsel %vm584_vm0, %v1207_v34, 0.0  ;;  %v467_v51 = vrot.slane %v356_v25, %v6791_v12  ;;  %v341_v61 = vrot.slane %v325_v54, %v6787_v10 }
  0x4b   :  { %1254 = vadd.xlane.f32.xlu1 %v1253_v24  ;;  %1251 = vadd.xlane.f32.xlu0 %v1250_v11  ;;  %v1209_v0 = vmul.f32 %v561_v55, %v561_v55  ;;  %v1211_v24 = vmul.f32 %v563_v53, %v563_v53  ;;  %v562_v11 = vsub.f32 %v71_v2, %v447_v41 }
  0x4c   :  { %6156 = vmatmul.mubr.msk.f32.gmra.mxu0 %vm584_vm0, %v551_v57  ;;  %v77_v57 = vld [vmem:[%s9500_s1 + $0x180] sm:$0xff]  ;;  %v571_v48 = vsub.f32 %v80_v9, %v463_v39  ;;  %v572_v41 = vsub.f32 %v81_v36, %v467_v51  ;;  %v327_v2 = vcombine.high %v325_v54, %v325_v54 }
  0x4d   :  { %6158 = vmatprep.mubr.msk.f32.mxu0 %vm584_vm0, %v552_v16  ;;  %v1355_v14 = vsel %vm584_vm0, %v1209_v0, 0.0  ;;  %v73_v16 = vld [vmem:[%s9500_s1 + $0x160] sm:$0xff]  ;;  %v568_v18 = vsub.f32 %v77_v57, %v459_v3  ;;  %v1210_v35 = vmul.f32 %v562_v11, %v562_v11  ;;  %v84_v57 = vld [vmem:[%s9500_s1 + $0x1b8] sm:$0xff] }
  0x4e   :  { %v1220_v1 = vmul.f32 %v572_v41, %v572_v41 }
  0x4f   :  { %1326 = vadd.xlane.f32.xlu1 %v1325_v33  ;;  %1323 = vadd.xlane.f32.xlu0 %v1322_v26  ;;  %v1361_v33 = vsel %vm584_vm0, %v1211_v24, 0.0  ;;  %v1216_v23 = vmul.f32 %v568_v18, %v568_v18  ;;  %v564_v26 = vsub.f32 %v73_v16, %v451_v13  ;;  %v85_v16 = vld [vmem:[%s9500_s1 + $0x1c0] sm:$0xff] }
  0x50   :  { %6159 = vmatmul.mubr.msk.f32.gmra.mxu0 %vm584_vm0, %v553_v20  ;;  %v78_v20 = vld [vmem:[%s9500_s1 + $0x188] sm:$0xff] }
  0x51   :  { %6161 = vmatprep.mubr.msk.f32.mxu0 %vm584_vm0, %v554_v58  ;;  %v75_v58 = vld [vmem:[%s9500_s1 + $0x170] sm:$0xff]  ;;  %v569_v28 = vsub.f32 %v78_v20, %v459_v3  ;;  %v1376_v37 = vsel %vm584_vm0, %v1216_v23, 0.0  ;;  %v1212_v43 = vmul.f32 %v564_v26, %v564_v26  ;;  %v357_v3 = vcombine.high %v341_v61, %v341_v61  ;;  %v86_v20 = vld [vmem:[%s9500_s1 + $0x1c8] sm:$0xff] }
  0x52   :  { %v566_v47 = vsub.f32 %v75_v58, %v455_v27 }
  0x53   :  { %1332 = vadd.xlane.f32.xlu1 %v1331_v46  ;;  %1329 = vadd.xlane.f32.xlu0 %v1328_v17  ;;  %v1217_v46 = vmul.f32 %v569_v28, %v569_v28  ;;  %v570_v17 = vsub.f32 %v79_v31, %v463_v39  ;;  %v88_v39 = vld [vmem:[%s9500_s1 + $0x1d8] sm:$0xff] }
  0x54   :  { %6162 = vmatmul.mubr.msk.f32.gmra.mxu0 %vm584_vm0, %v555_v30  ;;  %v565_v30 = vsub.f32 %v74_v21, %v451_v13  ;;  %v355_v13 = vrot.slane %v327_v2, %v6787_v10 }
  0x55   :  { %6164 = vmatprep.mubr.msk.f32.mxu0 %vm584_vm0, %v556_v38  ;;  %v567_v38 = vsub.f32 %v76_v29, %v455_v27  ;;  %v1379_v44 = vsel %vm584_vm0, %v1217_v46, 0.0 }
  0x56   :  { %v1213_v4 = vmul.f32 %v565_v30, %v565_v30  ;;  %v479_v23 = vrot.slane %v355_v13, %v6791_v12 }
  0x57   :  { %1338 = vadd.xlane.f32.xlu1 %v1337_v52  ;;  %1335 = vadd.xlane.f32.xlu0 %v1334_v50  ;;  %v358_v52 = vcombine.high %v348_v19, %v348_v19  ;;  %v1364_v50 = vsel %vm584_vm0, %v1212_v43, 0.0  ;;  %v1215_v8 = vmul.f32 %v567_v38, %v567_v38  ;;  %v89_v19 = vld [vmem:[%s9500_s1 + $0x1e0] sm:$0xff] }
  0x58   :  { %6165 = vmatmul.mubr.msk.f32.gmra.mxu0 %vm584_vm0, %v557_v45  ;;  %v1218_v45 = vmul.f32 %v570_v17, %v570_v17  ;;  %v1367_v62 = vsel %vm584_vm0, %v1213_v4, 0.0 }
  0x59   :  { %6167 = vmatprep.mubr.msk.f32.mxu0 %vm584_vm0, %v558_v49  ;;  %v471_v59 = vrot.slane %v358_v52, %v6791_v12  ;;  %v1373_v10 = vsel %vm584_vm0, %v1215_v8, 0.0 }
  0x5a   :  { %v1382_v49 = vsel %vm584_vm0, %v1218_v45, 0.0 }
  0x5b   :  { %1341 = vadd.xlane.f32.xlu1 %v1340_v56  ;;  %1353 = vadd.xlane.f32.xlu0 %v1352_v63  ;;  %v82_v56 = vld [vmem:[%s9500_s1 + $0x1a8] sm:$0xff]  ;;  %v1214_v63 = vmul.f32 %v566_v47, %v566_v47  ;;  %v575_v15 = vsub.f32 %v84_v57, %v471_v59 }
  0x5c   :  { %6168 = vmatmul.mubr.msk.f32.gmra.mxu0 %vm584_vm0, %v559_v60  ;;  %v83_v60 = vld [vmem:[%s9500_s1 + $0x1b0] sm:$0xff]  ;;  %v573_v6 = vsub.f32 %v82_v56, %v467_v51 }
  0x5d   :  { %6170 = vmatprep.mubr.msk.f32.mxu0 %vm584_vm0, %v560_v42  ;;  %v1358_v42 = vsel %vm584_vm0, %v1210_v35, 0.0  ;;  %v1223_v34 = vmul.f32 %v575_v15, %v575_v15 }
  0x5e   :  { %v1221_v21 = vmul.f32 %v573_v6, %v573_v6 }
  0x5f   :  { %1344 = vadd.xlane.f32.xlu1 %v1343_v7  ;;  %1356 = vadd.xlane.f32.xlu0 %v1355_v14  ;;  %v1370_v7 = vsel %vm584_vm0, %v1214_v63, 0.0  ;;  %v1388_v14 = vsel %vm584_vm0, %v1220_v1, 0.0  ;;  %v1397_v29 = vsel %vm584_vm0, %v1223_v34, 0.0 }
  0x60   :  { %6171 = vmatmul.mubr.msk.f32.gmra.mxu0 %vm584_vm0, %v561_v55  ;;  %v1219_v55 = vmul.f32 %v571_v48, %v571_v48 }
  0x61   :  { %6173 = vmatprep.mubr.msk.f32.mxu0 %vm584_vm0, %v562_v11  ;;  %v475_v11 = vrot.slane %v341_v61, %v6791_v12 }
  0x62   :  { %v1385_v0 = vsel %vm584_vm0, %v1219_v55, 0.0 }
  0x63   :  { %1347 = vadd.xlane.f32.xlu1 %v1346_v22  ;;  %1362 = vadd.xlane.f32.xlu0 %v1361_v33  ;;  %v576_v33 = vsub.f32 %v85_v16, %v475_v11  ;;  %v577_v58 = vsub.f32 %v86_v20, %v475_v11 }
  0x64   :  { %6174 = vmatmul.mubr.msk.f32.gmra.mxu0 %vm584_vm0, %v563_v53  ;;  %v574_v53 = vsub.f32 %v83_v60, %v471_v59 }
  0x65   :  { %6176 = vmatprep.mubr.msk.f32.mxu0 %vm584_vm0, %v564_v26  ;;  %v87_v26 = vld [vmem:[%s9500_s1 + $0x1d0] sm:$0xff]  ;;  %v1224_v31 = vmul.f32 %v576_v33, %v576_v33  ;;  %v1225_v25 = vmul.f32 %v577_v58, %v577_v58 }
  0x66   :  { %v1222_v24 = vmul.f32 %v574_v53, %v574_v53  ;;  %v578_v35 = vsub.f32 %v87_v26, %v479_v23 }
  0x67   :  { %1350 = vadd.xlane.f32.xlu1 %v1349_v32  ;;  %1377 = vadd.xlane.f32.xlu0 %v1376_v37  ;;  %v359_v37 = vcombine.high %v355_v13, %v355_v13  ;;  %v1403_v43 = vsel %vm584_vm0, %v1225_v25, 0.0 }
  0x68   :  { %6177 = vmatmul.mubr.msk.f32.gmra.mxu0 %vm584_vm0, %v565_v30  ;;  %v1394_v22 = vsel %vm584_vm0, %v1222_v24, 0.0  ;;  %v1391_v30 = vsel %vm584_vm0, %v1221_v21, 0.0 }
  0x69   :  { %6179 = vmatprep.mubr.msk.f32.mxu0 %vm584_vm0, %v566_v47  ;;  %v579_v47 = vsub.f32 %v88_v39, %v479_v23  ;;  %v487_v40 = vrot.slane %v359_v37, %v6791_v12 }
  0x6b   :  { %1359 = vadd.xlane.f32.xlu1 %v1358_v42  ;;  %1380 = vadd.xlane.f32.xlu0 %v1379_v44  ;;  %v91_v42 = vld [vmem:[%s9500_s1 + $0x1f0] sm:$0xff]  ;;  %v1226_v44 = vmul.f32 %v578_v35, %v578_v35  ;;  %v1227_v52 = vmul.f32 %v579_v47, %v579_v47 }
  0x6c   :  { %6180 = vmatmul.mubr.msk.f32.gmra.mxu0 %vm584_vm0, %v567_v38 }
  0x6d   :  { %6182 = vmatprep.mubr.msk.f32.mxu0 %vm584_vm0, %v568_v18  ;;  %v483_v18 = vrot.slane %v357_v3, %v6791_v12  ;;  %v92_v12 = vld [vmem:[%s9500_s1 + $0x1f8] sm:$0xff]  ;;  %v1406_v51 = vsel %vm584_vm0, %v1226_v44, 0.0  ;;  %v1409_v54 = vsel %vm584_vm0, %v1227_v52, 0.0 }
  0x6e   :  { %v583_v36 = vsub.f32 %v92_v12, %v487_v40 }
  0x6f   :  { %1365 = vadd.xlane.f32.xlu1 %v1364_v50  ;;  %1383 = vadd.xlane.f32.xlu0 %v1382_v49  ;;  %v580_v27 = vsub.f32 %v89_v19, %v483_v18 }
  0x70   :  { %6183 = vmatmul.mubr.msk.f32.gmra.mxu0 %vm584_vm0, %v569_v28  ;;  %v90_v28 = vld [vmem:[%s9500_s1 + $0x1e8] sm:$0xff]  ;;  %s6726_s1 = smov 96  }
  0x71   :  { %6185 = vmatprep.mubr.msk.f32.mxu0 %vm584_vm0, %v570_v17  ;;  %v1228_v32 = vmul.f32 %v580_v27, %v580_v27  ;;  %v581_v46 = vsub.f32 %v90_v28, %v483_v18  ;;  %v1400_v17 = vsel %vm584_vm0, %v1224_v31, 0.0  ;;  %v7304_v18 = vld [vmem:[%s9503_s4] ss:$0 sm:$0xff] }
  0x73   :  { %1368 = vadd.xlane.f32.xlu1 %v1367_v62  ;;  %1386 = vadd.xlane.f32.xlu0 %v1385_v0  ;;  %v1412_v38 = vsel %vm584_vm0, %v1228_v32, 0.0  ;;  %v1229_v9 = vmul.f32 %v581_v46, %v581_v46 }
  0x74   :  { %6186 = vmatmul.mubr.msk.f32.gmra.mxu0 %vm584_vm0, %v571_v48  ;;  %v582_v48 = vsub.f32 %v91_v42, %v487_v40 }
  0x75   :  { %6188 = vmatprep.mubr.msk.f32.mxu0 %vm584_vm0, %v572_v41  ;;  %v1415_v45 = vsel %vm584_vm0, %v1229_v9, 0.0 }
  0x77   :  { %1371 = vadd.xlane.f32.xlu1 %v1370_v7  ;;  %1389 = vadd.xlane.f32.xlu0 %v1388_v14 }
  0x78   :  { %6189 = vmatmul.mubr.msk.f32.gmra.mxu0 %vm584_vm0, %v573_v6 }
  0x79   :  { %6191 = vmatprep.mubr.msk.f32.mxu0 %vm584_vm0, %v574_v53 }
  0x7b   :  { %1374 = vadd.xlane.f32.xlu1 %v1373_v10  ;;  %1395 = vadd.xlane.f32.xlu0 %v1394_v22 }
  0x7c   :  { %6192 = vmatmul.mubr.msk.f32.gmra.mxu0 %vm584_vm0, %v575_v15 }
  0x7d   :  { %6194 = vmatprep.mubr.msk.f32.mxu0 %vm584_vm0, %v576_v33 }
  0x7f   :  { %1392 = vadd.xlane.f32.xlu1 %v1391_v30  ;;  %1398 = vadd.xlane.f32.xlu0 %v1397_v29  ;;  %v1230_v30 = vmul.f32 %v582_v48, %v582_v48 }
  0x80   :  { %6195 = vmatmul.mubr.msk.f32.gmra.mxu0 %vm584_vm0, %v577_v58 }
  0x81   :  { %6197 = vmatprep.mubr.msk.f32.mxu0 %vm584_vm0, %v578_v35  ;;  %v1231_v35 = vmul.f32 %v583_v36, %v583_v36  ;;  %v7342_v52 = vsel %vm584_vm0, %v1230_v30, 0.0 }
  0x83   :  { %1401 = vadd.xlane.f32.xlu1 %v1400_v17  ;;  %1413 = vadd.xlane.f32.xlu0 %v1412_v38 }
  0x84   :  { %6198 = vmatmul.mubr.msk.f32.gmra.mxu0 %vm584_vm0, %v579_v47 }
  0x85   :  { %6200 = vmatprep.mubr.msk.f32.mxu0 %vm584_vm0, %v580_v27 }
  0x87   :  { %1404 = vadd.xlane.f32.xlu1 %v1403_v43  ;;  %1416 = vadd.xlane.f32.xlu0 %v1415_v45 }
  0x88   :  { %6201 = vmatmul.mubr.msk.f32.gmra.mxu0 %vm584_vm0, %v581_v46 }
  0x89   :  { %6203 = vmatprep.mubr.msk.f32.mxu0 %vm584_vm0, %v582_v48 }
  0x8b   :  { %1407 = vadd.xlane.f32.xlu1 %v1406_v51 }
  0x8c   :  { %6204 = vmatmul.mubr.msk.f32.gmra.mxu0 %vm584_vm0, %v583_v36 }
  0x8f   :  { %1410 = vadd.xlane.f32.xlu1 %v1409_v54 }
  0x9c   :  { %v1285_v50 = vpop.xlane.xlu1 %1284  ;;  %v1258_v4 = vpop.xlane.xlu0 %1257 }
  0x9d   :  { %v7313_v28 = vadd.f32 %v7304_v18, %v1285_v50  ;;  %v7316_v31 = vadd.f32 %v7304_v18, %v1258_v4  ;;  %v7353_v4 = vsel %vm584_vm0, %v1231_v35, 0.0 }
  0xa0   :  { %v1264_v49 = vpop.xlane.xlu1 %1263  ;;  %v1261_v55 = vpop.xlane.xlu0 %1260 }
  0xa1   :  { %v7319_v29 = vadd.f32 %v7304_v18, %v1264_v49  ;;  %v7322_v37 = vadd.f32 %v7304_v18, %v1261_v55 }
  0xa4   :  { %v1267_v41 = vpop.xlane.xlu1 %1266  ;;  %v1282_v59 = vpop.xlane.xlu0 %1281 }
  0xa5   :  { %v7325_v46 = vadd.f32 %v7304_v18, %v1267_v41  ;;  %v7328_v47 = vadd.f32 %v7304_v18, %v1282_v59 }
  0xa8   :  { %v1273_v60 = vpop.xlane.xlu1 %1272  ;;  %v1270_v61 = vpop.xlane.xlu0 %1269 }
  0xa9   :  { %v7331_v9 = vadd.f32 %v7304_v18, %v1273_v60  ;;  %v7334_v40 = vadd.f32 %v7304_v18, %v1270_v61 }
  0xac   :  { %v1291_v56 = vpop.xlane.xlu1 %1290  ;;  %v1288_v62 = vpop.xlane.xlu0 %1287 }
  0xad   :  { %v7338_v45 = vadd.f32 %v7304_v18, %v1291_v56  ;;  %v7345_v36 = vadd.f32 %v7304_v18, %v1288_v62 }
  0xb0   :  { %v1279_v63 = vpop.xlane.xlu1 %1278  ;;  %v1276_v0 = vpop.xlane.xlu0 %1275 }
  0xb1   :  { %v7348_v54 = vadd.f32 %v7304_v18, %v1279_v63  ;;  %v7356_v49 = vadd.f32 %v7304_v18, %v1276_v0 }
  0xb4   :  { %v1297_v1 = vpop.xlane.xlu1 %1296  ;;  %v1294_v2 = vpop.xlane.xlu0 %1293 }
  0xb5   :  { %v7364_v56 = vadd.f32 %v7304_v18, %v1297_v1  ;;  %v7367_v62 = vadd.f32 %v7304_v18, %v1294_v2 }
  0xb8   :  { %v1303_v53 = vpop.xlane.xlu1 %1302  ;;  %v1300_v3 = vpop.xlane.xlu0 %1299 }
  0xb9   :  { %v7370_v63 = vadd.f32 %v7304_v18, %v1303_v53 }
  0xbc   :  { %v1237_v6 = vpop.xlane.xlu1 %1236  ;;  %v1234_v57 = vpop.xlane.xlu0 %1233 }
  0xbd   :  { %v1431_v22 = vadd.f32 %v7304_v18, %v1237_v6  ;;  %v1430_v33 = vadd.f32 %v7304_v18, %v1234_v57  ;;  %v7375_v57 = vadd.f32 %v7304_v18, %v1300_v3 }
  0xc0   :  { %v7295_v7 = vpop.xlane.xlu1 %1308  ;;  %v7297_v8 = vpop.xlane.xlu0 %1305 }
  0xc1   :  { %v7380_v1 = vadd.f32 %v7304_v18, %v7295_v7  ;;  %v7384_v2 = vadd.f32 %v7304_v18, %v7297_v8 }
  0xc4   :  { %v1243_v14 = vpop.xlane.xlu1 %1242  ;;  %v1240_v24 = vpop.xlane.xlu0 %1239 }
  0xc5   :  { %v1433_v42 = vadd.f32 %v7304_v18, %v1243_v14  ;;  %v1432_v48 = vadd.f32 %v7304_v18, %v1240_v24 }
  0xc8   :  { %v1315_v11 = vpop.xlane.xlu1 %1314  ;;  %v7299_v13 = vpop.xlane.xlu0 %1311 }
  0xc9   :  { %v7388_v53 = vadd.f32 %v7304_v18, %v1315_v11  ;;  %v7394_v7 = vadd.f32 %v7304_v18, %v7299_v13 }
  0xcc   :  { %v1249_v15 = vpop.xlane.xlu1 %1248  ;;  %v1246_v16 = vpop.xlane.xlu0 %1245 }
  0xcd   :  { %v1435_v41 = vadd.f32 %v7304_v18, %v1249_v15  ;;  %v1434_v24 = vadd.f32 %v7304_v18, %v1246_v16 }
  0xd0   :  { %v6112_v19 = vpop.f32.mrf.mxu0  ;;  %v7306_v20 = vpop.xlane.xlu1 %1320 }
  0xd1   :  { %v7308_v10 = vpop.xlane.xlu0 %1317  ;;  %v1495_v34 = vmul.f32 2.0, %v6112_v19  ;;  %v7400_v8 = vadd.f32 %v7304_v18, %v7306_v20 }
  0xd2   :  { %v849_v21 = vpop.f32.mrf.mxu0  ;;  %v7407_v35 = vadd.f32 %v7304_v18, %v7308_v10 }
  0xd3   :  { %v1494_v23 = vmul.f32 2.0, %v849_v21  ;;  %v1559_v32 = vsub.f32 %v1431_v22, %v1495_v34 }
  0xd4   :  { %v6115_v26 = vpop.f32.mrf.mxu0  ;;  %v1255_v27 = vpop.xlane.xlu1 %1254 }
  0xd5   :  { %v1252_v58 = vpop.xlane.xlu0 %1251  ;;  %v1558_v17 = vsub.f32 %v1430_v33, %v1494_v23  ;;  %v1497_v43 = vmul.f32 2.0, %v6115_v26  ;;  %v7350_v50 = vmax.f32 %v1559_v32, 0.0  ;;  %v1437_v16 = vadd.f32 %v7304_v18, %v1255_v27 }
  0xd6   :  { %v859_v39 = vpop.f32.mrf.mxu0  ;;  %v1436_v27 = vadd.f32 %v7304_v18, %v1252_v58 }
  0xd7   :  { %v1496_v12 = vmul.f32 2.0, %v859_v39  ;;  %v7358_v55 = vmax.f32 %v1558_v17, 0.0  ;;  %v1561_v6 = vsub.f32 %v1433_v42, %v1497_v43  ;;  %6563 = vrsqrt.f32 %v7350_v50 }
  0xd8   :  { %v6118_v25 = vpop.f32.mrf.mxu0  ;;  %v1327_v38 = vpop.xlane.xlu1 %1326 }
  0xd9   :  { %v1324_v44 = vpop.xlane.xlu0 %1323  ;;  %v1499_v59 = vmul.f32 2.0, %v6118_v25  ;;  %v1560_v14 = vsub.f32 %v1432_v48, %v1496_v12  ;;  %6565 = vrsqrt.f32 %v7358_v55  ;;  %v7396_v33 = vmax.f32 %v1561_v6, 0.0 }
  0xda   :  { %v869_v51 = vpop.f32.mrf.mxu0  ;;  %v7414_v48 = vadd.f32 %v7304_v18, %v1327_v38  ;;  %v7417_v12 = vadd.f32 %v7304_v18, %v1324_v44 }
  0xdb   :  { %v1498_v15 = vmul.f32 2.0, %v869_v51  ;;  %v1563_v3 = vsub.f32 %v1435_v41, %v1499_v59  ;;  %v7402_v26 = vmax.f32 %v1560_v14, 0.0  ;;  %6567 = vrsqrt.f32 %v7396_v33 }
  0xdc   :  { %v6121_v60 = vpop.f32.mrf.mxu0  ;;  %v7361_v61 = vpop.xlane.xlu1 %1332 }
  0xdd   :  { %v7372_v0 = vpop.xlane.xlu0 %1329  ;;  %v1501_v21 = vmul.f32 2.0, %v6121_v60  ;;  %v1562_v39 = vsub.f32 %v1434_v24, %v1498_v15  ;;  %v7411_v20 = vmax.f32 %v1563_v3, 0.0  ;;  %6569 = vrsqrt.f32 %v7402_v26 }
  0xde   :  { %v879_v19 = vpop.f32.mrf.mxu0  ;;  %v9506_v24 = vmov 0.0  }
  0xdf   :  { %v1500_v30 = vmul.f32 2.0, %v879_v19  ;;  %9557 = vst [vmem:[#allocation6_spill] sm:$0xff] %v7411_v20  ;;  %v1565_v42 = vsub.f32 %v1437_v16, %v1501_v21  ;;  %v7424_v59 = vmax.f32 %v1562_v39, 0.0  ;;  %6206 = vmatprep.subr.bf16.mxu0 %v9506_v24  ;;  %6230 = vmatprep.subr.bf16.mxu1 %v9506_v24 }
  0xe0   :  { %v6124_v22 = vpop.f32.mrf.mxu0  ;;  %v1339_v34 = vpop.xlane.xlu1 %1338 }
  0xe1   :  { %v1503_v11 = vmul.f32 2.0, %v6124_v22  ;;  %v1336_v23 = vpop.xlane.xlu0 %1335  ;;  %9558 = vst [vmem:[#allocation7_spill] sm:$0xff] %v7424_v59  ;;  %v1564_v60 = vsub.f32 %v1436_v27, %v1500_v30  ;;  %v7446_v30 = vadd.f32 %v7304_v18, %v7361_v61  ;;  %v7450_v27 = vadd.f32 %v7304_v18, %v7372_v0 }
  0xe2   :  { %v889_v32 = vpop.f32.mrf.mxu0  ;;  %v7459_v61 = vadd.f32 %v7304_v18, %v1339_v34 }
  0xe3   :  { %v1567_v13 = vsub.f32 %v7322_v37, %v1503_v11  ;;  %v1502_v17 = vmul.f32 2.0, %v889_v32  ;;  %v7442_v11 = vmax.f32 %v1564_v60, 0.0 }
  0xe4   :  { %v6127_v43 = vpop.f32.mrf.mxu0  ;;  %v1342_v58 = vpop.xlane.xlu1 %1341 }
  0xe5   :  { %v7420_v10 = vmax.f32 %v1567_v13, 0.0  ;;  %v1566_v37 = vsub.f32 %v7316_v31, %v1502_v17  ;;  %v1505_v51 = vmul.f32 2.0, %v6127_v43  ;;  %v1354_v41 = vpop.xlane.xlu0 %1353  ;;  %v7433_v31 = vmax.f32 %v1565_v42, 0.0  ;;  %9560 = vst [vmem:[#allocation9_spill] sm:$0xff] %v7442_v11  ;;  %v6564_v42 = vpop.eup %6563 }
  0xe6   :  { %v899_v6 = vpop.f32.mrf.mxu0  ;;  %v7472_v34 = vadd.f32 %v7304_v18, %v1354_v41 }
  0xe7   :  { %6571 = vrsqrt.f32 %v7420_v10  ;;  %v7427_v38 = vmax.f32 %v1566_v37, 0.0  ;;  %v1569_v44 = vsub.f32 %v7325_v46, %v1505_v51  ;;  %v1504_v14 = vmul.f32 2.0, %v899_v6  ;;  %9559 = vst [vmem:[#allocation8_spill] sm:$0xff] %v7433_v31  ;;  %v6566_v51 = vpop.eup %6565 }
  0xe8   :  { %6573 = vrsqrt.f32 %v7411_v20  ;;  %v6130_v15 = vpop.f32.mrf.mxu0  ;;  %v1345_v19 = vpop.xlane.xlu1 %1344  ;;  %vm1751_vm1 = vcmp.eq.f32.partialorder %v7420_v10, inf  ;;  %v7486_v41 = vmul.f32 %v6566_v51, %v7358_v55  ;;  %vm1753_vm3 = vcmp.eq.f32.partialorder %v7420_v10, 0.0 }
  0xe9   :  { %6575 = vrsqrt.f32 %v7427_v38  ;;  %v7438_v16 = vmax.f32 %v1569_v44, 0.0  ;;  %v1568_v46 = vsub.f32 %v7319_v29, %v1504_v14  ;;  %v1507_v22 = vmul.f32 2.0, %v6130_v15  ;;  %v1357_v29 = vpop.xlane.xlu0 %1356 }
  0xea   :  { %6577 = vrsqrt.f32 %v7424_v59  ;;  %v909_v39 = vpop.f32.mrf.mxu0  ;;  %v7465_v44 = vadd.f32 %v7304_v18, %v1336_v23  ;;  %v7479_v23 = vmul.f32 %v6564_v42, %v7350_v50  ;;  %vm1744_vm2 = vcmp.eq.f32.partialorder %v7427_v38, inf }
  0xeb   :  { %6579 = vrsqrt.f32 %v7438_v16  ;;  %v7453_v32 = vmax.f32 %v1568_v46, 0.0  ;;  %v1506_v13 = vmul.f32 2.0, %v909_v39  ;;  %v1571_v43 = vsub.f32 %v7331_v9, %v1507_v22 }
  0xec   :  { %6581 = vrsqrt.f32 %v7433_v31  ;;  %v6133_v37 = vpop.f32.mrf.mxu0  ;;  %v1348_v14 = vpop.xlane.xlu1 %1347  ;;  %v7469_v9 = vadd.f32 %v7304_v18, %v1342_v58  ;;  %vm1746_vm4 = vcmp.eq.f32.partialorder %v7427_v38, 0.0  ;;  %vm1765_vm5 = vcmp.eq.f32.partialorder %v7438_v16, inf }
  0xed   :  { %6583 = vrsqrt.f32 %v7453_v32  ;;  %v1570_v60 = vsub.f32 %v7334_v40, %v1506_v13  ;;  %v1509_v6 = vmul.f32 2.0, %v6133_v37  ;;  %v7481_v13 = vmax.f32 %v1571_v43, 0.0  ;;  %v1363_v42 = vpop.xlane.xlu0 %1362  ;;  %v7494_v43 = vpop.eup %6567 }
  0xee   :  { %6585 = vrsqrt.f32 %v7442_v11  ;;  %v919_v15 = vpop.f32.mrf.mxu0  ;;  %9561 = vst [vmem:[#allocation10_spill] sm:$0xff] %v7494_v43  ;;  %v7515_v3 = vadd.f32 %v7304_v18, %v1348_v14  ;;  %vm1758_vm6 = vcmp.eq.f32.partialorder %v7453_v32, inf  ;;  %vm1767_vm7 = vcmp.eq.f32.partialorder %v7438_v16, 0.0 }
  0xef   :  { %v7475_v22 = vmax.f32 %v1570_v60, 0.0  ;;  %v1573_v40 = vsub.f32 %v7348_v54, %v1509_v6  ;;  %v1508_v39 = vmul.f32 2.0, %v919_v15  ;;  %v7499_v15 = vadd.f32 %v7304_v18, %v1345_v19 }
  0xf0   :  { %v6136_v37 = vpop.f32.mrf.mxu0  ;;  %v1351_v17 = vpop.xlane.xlu1 %1350  ;;  %vm1760_vm8 = vcmp.eq.f32.partialorder %v7453_v32, 0.0  ;;  %vm1779_vm11 = vcmp.eq.f32.partialorder %v7481_v13, inf  ;;  %vm1781_vm13 = vcmp.eq.f32.partialorder %v7481_v13, 0.0 }
  0xf1   :  { %v7488_v0 = vmax.f32 %v1573_v40, 0.0  ;;  %v1572_v60 = vsub.f32 %v7356_v49, %v1508_v39  ;;  %v1511_v46 = vmul.f32 2.0, %v6136_v37  ;;  %6587 = vrsqrt.f32 %v7475_v22  ;;  %v7504_v40 = vpop.eup %6569  ;;  %v1378_v5 = vpop.xlane.xlu0 %1377 }
  0xf2   :  { %v929_v6 = vpop.f32.mrf.mxu0  ;;  %v7502_v49 = vadd.f32 %v7304_v18, %v1357_v29  ;;  %6589 = vrsqrt.f32 %v7481_v13  ;;  %v7532_v54 = vadd.f32 %v7304_v18, %v1351_v17  ;;  %vm1772_vm9 = vcmp.eq.f32.partialorder %v7475_v22, inf }
  0xf3   :  { %v7506_v39 = vmax.f32 %v1572_v60, 0.0  ;;  %v1575_v37 = vsub.f32 %v7313_v28, %v1511_v46  ;;  %v1510_v24 = vmul.f32 2.0, %v929_v6  ;;  %v7518_v60 = vadd.f32 %v7304_v18, %v1363_v42 }
  0xf4   :  { %v6572_v25 = vpop.eup %6571  ;;  %v6139_v19 = vpop.f32.mrf.mxu0  ;;  %6591 = vrsqrt.f32 %v7488_v0  ;;  %vm1774_vm10 = vcmp.eq.f32.partialorder %v7475_v22, 0.0  ;;  %vm1793_vm15 = vcmp.eq.f32.partialorder %v7488_v0, inf  ;;  %vm1795_vm0 = vcmp.eq.f32.partialorder %v7488_v0, 0.0 }
  0xf5   :  { %v7520_v28 = vpop.eup %6573  ;;  %v7523_v46 = vmax.f32 %v1575_v37, 0.0  ;;  %v1574_v6 = vsub.f32 %v7328_v47, %v1510_v24  ;;  %v1513_v21 = vmul.f32 2.0, %v6139_v19  ;;  %6593 = vrsqrt.f32 %v7506_v39 }
  0xf6   :  { %9562 = vst [vmem:[#allocation11_spill] sm:$0xff] %v7520_v28  ;;  %v6576_v29 = vpop.eup %6575  ;;  %v939_v14 = vpop.f32.mrf.mxu0  ;;  %v1750_v42 = vmul.f32 %v6572_v25, %v7420_v10  ;;  %vm1786_vm12 = vcmp.eq.f32.partialorder %v7506_v39, inf  ;;  %vm1788_vm14 = vcmp.eq.f32.partialorder %v7506_v39, 0.0 }
  0xf7   :  { %v7534_v37 = vpop.eup %6577  ;;  %v7536_v58 = vmax.f32 %v1574_v6, 0.0  ;;  %v1577_v47 = vsub.f32 %v7338_v45, %v1513_v21  ;;  %v1512_v24 = vmul.f32 2.0, %v939_v14  ;;  %v1743_v25 = vmul.f32 %v6576_v29, %v7427_v38 }
  0xf8   :  { %9563 = vst [vmem:[#allocation12_spill] sm:$0xff] %v7534_v37  ;;  %v6580_v31 = vpop.eup %6579  ;;  %v6142_v11 = vpop.f32.mrf.mxu0  ;;  %v1752_v17 = vsel %vm1751_vm1, %v7420_v10, %v1750_v42  ;;  %v7547_v6 = vadd.f32 %v7304_v18, %v1378_v5  ;;  %6595 = vrsqrt.f32 %v7523_v46  ;;  %v9565_v5 = vand.u32 2147483648, %v7420_v10 }
  0xf9   :  { %v7549_v45 = vpop.eup %6581  ;;  %v7552_v21 = vmax.f32 %v1577_v47, 0.0  ;;  %v1576_v14 = vsub.f32 %v7345_v36, %v1512_v24  ;;  %v1515_v19 = vmul.f32 2.0, %v6142_v11  ;;  %6597 = vrsqrt.f32 %v7536_v58 }
  0xfa   :  { %9564 = vst [vmem:[#allocation13_spill] sm:$0xff] %v7549_v45  ;;  %v6584_v28 = vpop.eup %6583  ;;  %v949_v29 = vpop.f32.mrf.mxu0  ;;  %v1745_v42 = vsel %vm1744_vm2, %v7427_v38, %v1743_v25  ;;  %v1755_v51 = vsel %vm1753_vm3, %v9565_v5, %v1752_v17  ;;  %v1764_v45 = vmul.f32 %v6580_v31, %v7438_v16  ;;  %v9567_v25 = vand.u32 2147483648, %v7427_v38 }
  0xfb   :  { %v7564_v47 = vpop.eup %6585  ;;  %6599 = vrsqrt.f32 %v7552_v21  ;;  %v7567_v36 = vmax.f32 %v1576_v14, 0.0  ;;  %v1579_v11 = vsub.f32 %v7364_v56, %v1515_v19  ;;  %v1514_v24 = vmul.f32 2.0, %v949_v29 }
  0xfc   :  { %9566 = vst [vmem:[#allocation14_spill] sm:$0xff] %v7564_v47  ;;  %v6145_v37 = vpop.f32.mrf.mxu0  ;;  %v1748_v10 = vsel %vm1746_vm4, %v9567_v25, %v1745_v42  ;;  %v2143_v17 = vmul.f32 1.25, %v1755_v51  ;;  %v1757_v31 = vmul.f32 %v6584_v28, %v7453_v32  ;;  %v1766_v5 = vsel %vm1765_vm5, %v7438_v16, %v1764_v45 }
  0xfd   :  { %6601 = vrsqrt.f32 %v7567_v36  ;;  %v7580_v14 = vmax.f32 %v1579_v11, 0.0  ;;  %v1578_v56 = vsub.f32 %v7367_v62, %v1514_v24  ;;  %v1517_v19 = vmul.f32 2.0, %v6145_v37 }
  0xfe   :  { %v959_v29 = vpop.f32.mrf.mxu0  ;;  %v2142_v47 = vmul.f32 1.25, %v1748_v10  ;;  %v2207_v38 = vsub.f32 1.0, %v2143_v17  ;;  %v1759_v51 = vsel %vm1758_vm6, %v7453_v32, %v1757_v31  ;;  %v9568_v28 = vand.u32 2147483648, %v7438_v16  ;;  %v6588_v42 = vpop.eup %6587 }
  0xff   :  { %6603 = vrsqrt.f32 %v7580_v14  ;;  %v7592_v11 = vmax.f32 %v1578_v56, 0.0  ;;  %v1581_v62 = vsub.f32 %v7370_v63, %v1517_v19  ;;  %v1516_v37 = vmul.f32 2.0, %v959_v29 }
 0x100   :  { %v1769_v45 = vsel %vm1767_vm7, %v9568_v28, %v1766_v5  ;;  %v6148_v24 = vpop.f32.mrf.mxu0  ;;  %v2206_v25 = vsub.f32 1.0, %v2142_v47  ;;  %v2271_v10 = vmax.f32 %v2207_v38, 0.0  ;;  %v9569_v17 = vand.u32 2147483648, %v7453_v32  ;;  %v6590_v5 = vpop.eup %6589 }
 0x101   :  { %v2145_v31 = vmul.f32 1.25, %v1769_v45  ;;  %6605 = vrsqrt.f32 %v7592_v11  ;;  %v7603_v63 = vmax.f32 %v1581_v62, 0.0  ;;  %v1580_v56 = vsub.f32 %v7375_v57, %v1516_v37  ;;  %v6592_v47 = vpop.eup %6591 }
 0x102   :  { %v1762_v16 = vsel %vm1760_vm8, %v9569_v17, %v1759_v51  ;;  %v1519_v19 = vmul.f32 2.0, %v6148_v24  ;;  %v2270_v29 = vmax.f32 %v2206_v25, 0.0  ;;  %v969_v38 = vpop.f32.mrf.mxu0  ;;  %v1771_v32 = vmul.f32 %v6588_v42, %v7475_v22  ;;  %v6594_v51 = vpop.eup %6593 }
 0x103   :  { %v2144_v28 = vmul.f32 1.25, %v1762_v16  ;;  %v2209_v20 = vsub.f32 1.0, %v2145_v31  ;;  %6607 = vrsqrt.f32 %v7603_v63  ;;  %v7609_v45 = vmax.f32 %v1580_v56, 0.0  ;;  %v7622_v31 = vpop.xlane.xlu1 %1359 }
 0x104   :  { %v1583_v62 = vsub.f32 %v7380_v1, %v1519_v19  ;;  %v1518_v17 = vmul.f32 2.0, %v969_v38  ;;  %v2330_v57 = vpack.c.bf16 %v2271_v10, %v2270_v29  ;;  %v6151_v59 = vpop.f32.mrf.mxu0  ;;  %v1773_v25 = vsel %vm1772_vm9, %v7475_v22, %v1771_v32 }
 0x105   :  { %v2208_v37 = vsub.f32 1.0, %v2144_v28  ;;  %v2273_v24 = vmax.f32 %v2209_v20, 0.0  ;;  %6609 = vrsqrt.f32 %v7609_v45  ;;  %v1521_v1 = vmul.f32 2.0, %v6151_v59  ;;  %v6596_v10 = vpop.eup %6595 }
 0x106   :  { %v7618_v42 = vmax.f32 %v1583_v62, 0.0  ;;  %v1582_v16 = vsub.f32 %v7384_v2, %v1518_v17  ;;  %vm1800_vm1 = vcmp.eq.f32.partialorder %v7536_v58, inf  ;;  %2631 = vxpose.xlu0.c.b16.start.end [1/1] (short) (narrow) %v2330_v57, 16  ;;  %v9570_v56 = vand.u32 2147483648, %v7475_v22  ;;  %v979_v38 = vpop.f32.mrf.mxu0  ;;  %v6598_v32 = vpop.eup %6597 }
 0x107   :  { %v2272_v20 = vmax.f32 %v2208_v37, 0.0  ;;  %v1778_v29 = vmul.f32 %v6590_v5, %v7481_v13  ;;  %v1785_v28 = vmul.f32 %v6594_v51, %v7506_v39  ;;  %v1585_v59 = vsub.f32 %v7388_v53, %v1521_v1 }
 0x108   :  { %v1776_v19 = vsel %vm1774_vm10, %v9570_v56, %v1773_v25  ;;  %6611 = vrsqrt.f32 %v7618_v42  ;;  %v7631_v2 = vmax.f32 %v1582_v16, 0.0  ;;  %v7634_v17 = vpop.eup %6599  ;;  %v1520_v37 = vmul.f32 2.0, %v979_v38  ;;  %v6154_v51 = vpop.f32.mrf.mxu0 }
 0x109   :  { %v2146_v62 = vmul.f32 1.25, %v1776_v19  ;;  %v2331_v57 = vpack.c.bf16 %v2273_v24, %v2272_v20  ;;  %v1780_v22 = vsel %vm1779_vm11, %v7481_v13, %v1778_v29  ;;  %v1787_v5 = vsel %vm1786_vm12, %v7506_v39, %v1785_v28 }
 0x10a   :  { %vm1807_vm2 = vcmp.eq.f32.partialorder %v7523_v46, inf  ;;  %6613 = vrsqrt.f32 %v7631_v2  ;;  %v7644_v25 = vmax.f32 %v1585_v59, 0.0  ;;  %v9572_v53 = vand.u32 2147483648, %v7481_v13  ;;  %v6602_v1 = vpop.eup %6601  ;;  %v989_v28 = vpop.f32.mrf.mxu0 }
 0x10b   :  { %v2210_v16 = vsub.f32 1.0, %v2146_v62  ;;  %vm1809_vm3 = vcmp.eq.f32.partialorder %v7523_v46, 0.0  ;;  %2691 = vxpose.xlu1.c.b16.start.end [1/1] (short) (narrow) %v2331_v57, 16  ;;  %v1584_v56 = vsub.f32 %v7394_v7, %v1520_v37  ;;  %v9573_v19 = vand.u32 2147483648, %v7506_v39 }
 0x10c   :  { %9571 = vst [vmem:[#allocation15_spill] sm:$0xff] %v7644_v25  ;;  %v1783_v24 = vsel %vm1781_vm13, %v9572_v53, %v1780_v22  ;;  %v1792_v38 = vmul.f32 %v6592_v47, %v7488_v0  ;;  %6615 = vrsqrt.f32 %v7644_v25  ;;  %v1523_v62 = vmul.f32 2.0, %v6154_v51  ;;  %v7658_v22 = vpop.xlane.xlu1 %1365  ;;  %v7660_v53 = vpop.eup %6603 }
 0x10d   :  { %v2147_v20 = vmul.f32 1.25, %v1783_v24  ;;  %v1790_v29 = vsel %vm1788_vm14, %v9573_v19, %v1787_v5  ;;  %v2274_v13 = vmax.f32 %v2210_v16, 0.0  ;;  %v7662_v24 = vmax.f32 %v1584_v56, 0.0  ;;  %v6157_v47 = vpop.f32.mrf.mxu0 }
 0x10e   :  { %v2148_v59 = vmul.f32 1.25, %v1790_v29  ;;  %v1794_v7 = vsel %vm1793_vm15, %v7488_v0, %v1792_v38  ;;  %v1799_v39 = vmul.f32 %v6598_v32, %v7536_v58  ;;  %v9575_v37 = vand.u32 2147483648, %v7488_v0 }
 0x10f   :  { %v2211_v57 = vsub.f32 1.0, %v2147_v20  ;;  %9574 = vst [vmem:[#allocation16_spill] sm:$0xff] %v7662_v24  ;;  %v1587_v16 = vsub.f32 %v7400_v8, %v1523_v62  ;;  %vm1802_vm4 = vcmp.eq.f32.partialorder %v7536_v58, 0.0  ;;  %v6606_v20 = vpop.eup %6605  ;;  %6617 = vrsqrt.f32 %v7662_v24  ;;  %v7678_v29 = vpop.f32.mrf.mxu0 }
 0x110   :  { %v1797_v5 = vsel %vm1795_vm0, %v9575_v37, %v1794_v7  ;;  %v2212_v51 = vsub.f32 1.0, %v2148_v59  ;;  %v1801_v32 = vsel %vm1800_vm1, %v7536_v58, %v1799_v39  ;;  %v1803_v0 = vand.u32 2147483648, %v7536_v58  ;;  %v7684_v59 = vpop.eup %6607 }
 0x111   :  { %v2275_v56 = vmax.f32 %v2211_v57, 0.0  ;;  %v2149_v19 = vmul.f32 1.25, %v1797_v5  ;;  %v7680_v25 = vmax.f32 %v1587_v16, 0.0  ;;  %v1806_v8 = vmul.f32 %v6596_v10, %v7523_v46  ;;  %v7687_v5 = vpop.f32.mrf.mxu0  ;;  %v7696_v16 = vpop.xlane.xlu1 %1368 }
 0x112   :  { %v2276_v38 = vmax.f32 %v2212_v51, 0.0  ;;  %v1810_v7 = vand.u32 2147483648, %v7523_v46  ;;  %v1522_v37 = vmul.f32 2.0, %v989_v28  ;;  %v1804_v39 = vsel %vm1802_vm4, %v1803_v0, %v1801_v32 }
 0x113   :  { %9576 = vst [vmem:[#allocation17_spill] sm:$0xff] %v7680_v25  ;;  %v2332_v62 = vpack.c.bf16 %v2275_v56, %v2274_v13  ;;  %v2213_v57 = vsub.f32 1.0, %v2149_v19  ;;  %6619 = vrsqrt.f32 %v7680_v25  ;;  %v1808_v51 = vsel %vm1807_vm2, %v7523_v46, %v1806_v8  ;;  %v7698_v13 = vpop.eup %6609  ;;  %v1009_v58 = vpop.f32.mrf.mxu0 }
 0x114   :  { %v1813_v10 = vmul.f32 %v6602_v1, %v7567_v36  ;;  %v1811_v28 = vsel %vm1809_vm3, %v1810_v7, %v1808_v51  ;;  %v2150_v19 = vmul.f32 1.25, %v1804_v39  ;;  %v1586_v24 = vsub.f32 %v7407_v35, %v1522_v37 }
 0x115   :  { %2751 = vxpose.xlu0.c.b16.start.end [1/1] (short) (narrow) %v2332_v62, 16  ;;  %v2277_v56 = vmax.f32 %v2213_v57, 0.0  ;;  %v2151_v32 = vmul.f32 1.25, %v1811_v28  ;;  %vm1814_vm5 = vcmp.eq.f32.partialorder %v7567_v36, inf  ;;  %vm1816_vm6 = vcmp.eq.f32.partialorder %v7567_v36, 0.0  ;;  %v7706_v0 = vpop.eup %6611  ;;  %v6163_v57 = vpop.f32.mrf.mxu0 }
 0x116   :  { %v1817_v1 = vand.u32 2147483648, %v7567_v36  ;;  %v2214_v25 = vsub.f32 1.0, %v2150_v19  ;;  %v7708_v62 = vmax.f32 %v1586_v24, 0.0  ;;  %v1815_v46 = vsel %vm1814_vm5, %v7567_v36, %v1813_v10  ;;  %v7720_v19 = vpop.xlane.xlu1 %1371 }
 0x117   :  { %v2333_v8 = vpack.c.bf16 %v2277_v56, %v2276_v38  ;;  %v2215_v7 = vsub.f32 1.0, %v2151_v32  ;;  %v1820_v35 = vmul.f32 %v7634_v17, %v7552_v21  ;;  %vm1821_vm7 = vcmp.eq.f32.partialorder %v7552_v21, inf  ;;  %v7714_v37 = vpop.eup %6613  ;;  %v1019_v38 = vpop.f32.mrf.mxu0 }
 0x118   :  { %9577 = vst [vmem:[#allocation18_spill] sm:$0xff] %v7708_v62  ;;  %v1818_v39 = vsel %vm1816_vm6, %v1817_v1, %v1815_v46  ;;  %v2278_v51 = vmax.f32 %v2214_v25, 0.0  ;;  %6621 = vrsqrt.f32 %v7708_v62  ;;  %vm1823_vm8 = vcmp.eq.f32.partialorder %v7552_v21, 0.0 }
 0x119   :  { %2811 = vxpose.xlu1.c.b16.start.end [1/1] (short) (narrow) %v2333_v8, 16  ;;  %v1824_v24 = vand.u32 2147483648, %v7552_v21  ;;  %v2279_v36 = vmax.f32 %v2215_v7, 0.0  ;;  %v1822_v10 = vsel %vm1821_vm7, %v7552_v21, %v1820_v35  ;;  %v2152_v56 = vmul.f32 1.25, %v1818_v39  ;;  %v7722_v17 = vpop.eup %6615  ;;  %v6166_v25 = vpop.f32.mrf.mxu0 }
 0x11a   :  { %v1525_v28 = vmul.f32 2.0, %v6157_v47  ;;  %9578 = vst [vmem:[#allocation19_spill] sm:$0xff] %v7722_v17  ;;  %v1827_v1 = vmul.f32 %v6606_v20, %v7592_v11  ;;  %vm1828_vm9 = vcmp.eq.f32.partialorder %v7592_v11, inf  ;;  %vm1830_vm10 = vcmp.eq.f32.partialorder %v7592_v11, 0.0  ;;  %v7728_v21 = vpop.xlane.xlu0 %1380 }
 0x11b   :  { %v1825_v32 = vsel %vm1823_vm8, %v1824_v24, %v1822_v10  ;;  %v2334_v8 = vpack.c.bf16 %v2279_v36, %v2278_v51  ;;  %v2216_v62 = vsub.f32 1.0, %v2152_v56  ;;  %v1831_v39 = vand.u32 2147483648, %v7592_v11  ;;  %v1029_v20 = vpop.f32.mrf.mxu0 }
 0x11c   :  { %v2153_v46 = vmul.f32 1.25, %v1825_v32  ;;  %v1589_v7 = vsub.f32 %v7414_v48, %v1525_v28  ;;  %v1829_v47 = vsel %vm1828_vm9, %v7592_v11, %v1827_v1  ;;  %v1834_v35 = vmul.f32 %v7660_v53, %v7580_v14  ;;  %v7735_v24 = vpop.eup %6617 }
 0x11d   :  { %vm1835_vm11 = vcmp.eq.f32.partialorder %v7580_v14, inf  ;;  %9579 = vst [vmem:[#allocation20_spill] sm:$0xff] %v7735_v24  ;;  %2871 = vxpose.xlu1.c.b16.start.end [1/1] (short) (narrow) %v2334_v8, 16  ;;  %v2280_v36 = vmax.f32 %v2216_v62, 0.0  ;;  %vm1837_vm12 = vcmp.eq.f32.partialorder %v7580_v14, 0.0  ;;  %v1832_v48 = vsel %vm1830_vm10, %v1831_v39, %v1829_v47  ;;  %v6169_v32 = vpop.f32.mrf.mxu0 }
 0x11e   :  { %v2217_v51 = vsub.f32 1.0, %v2153_v46  ;;  %v7737_v10 = vmax.f32 %v1589_v7, 0.0  ;;  %v1836_v56 = vsel %vm1835_vm11, %v7580_v14, %v1834_v35  ;;  %v1838_v28 = vand.u32 2147483648, %v7580_v14  ;;  %v7747_v46 = vpop.xlane.xlu1 %1374  ;;  %v7753_v43 = vpop.xlane.xlu0 %1383 }
 0x11f   :  { %v1524_v53 = vmul.f32 2.0, %v7678_v29  ;;  %v2154_v8 = vmul.f32 1.25, %v1832_v48  ;;  %v1527_v62 = vmul.f32 2.0, %v7687_v5  ;;  %v1526_v47 = vmul.f32 2.0, %v1009_v58  ;;  %v1039_v35 = vpop.f32.mrf.mxu0 }
 0x120   :  { %9580 = vst [vmem:[#allocation21_spill] sm:$0xff] %v7737_v10  ;;  %v2281_v1 = vmax.f32 %v2217_v51, 0.0  ;;  %6623 = vrsqrt.f32 %v7737_v10  ;;  %v7749_v7 = vpop.eup %6619  ;;  %v1839_v17 = vsel %vm1837_vm12, %v1838_v28, %v1836_v56  ;;  %v1529_v39 = vmul.f32 2.0, %v6163_v57 }
 0x121   :  { %9581 = vst [vmem:[#allocation22_spill] sm:$0xff] %v7749_v7  ;;  %v1588_v11 = vsub.f32 %v7417_v12, %v1524_v53  ;;  %v2155_v24 = vmul.f32 1.25, %v1839_v17  ;;  %v2218_v29 = vsub.f32 1.0, %v2154_v8  ;;  %v1591_v51 = vsub.f32 %v7446_v30, %v1527_v62  ;;  %v6172_v56 = vpop.f32.mrf.mxu0 }
 0x122   :  { %v2335_v14 = vpack.c.bf16 %v2281_v1, %v2280_v36  ;;  %v1590_v5 = vsub.f32 %v7450_v27, %v1526_v47  ;;  %v1593_v10 = vsub.f32 %v7459_v61, %v1529_v39  ;;  %v1528_v7 = vmul.f32 2.0, %v1019_v38  ;;  %v7771_v1 = vpop.xlane.xlu1 %1392  ;;  %v1387_v47 = vpop.xlane.xlu0 %1386 }
 0x123   :  { %v7755_v48 = vmax.f32 %v1588_v11, 0.0  ;;  %v2219_v12 = vsub.f32 1.0, %v2155_v24  ;;  %v2282_v58 = vmax.f32 %v2218_v29, 0.0  ;;  %v7759_v57 = vmax.f32 %v1591_v51, 0.0  ;;  %v1049_v53 = vpop.f32.mrf.mxu0 }
 0x124   :  { %2931 = vxpose.xlu0.c.b16.start.end [1/1] (short) (narrow) %v2335_v14, 16  ;;  %v1531_v36 = vmul.f32 2.0, %v6166_v25  ;;  %v7762_v17 = vmax.f32 %v1590_v5, 0.0  ;;  %v7764_v30 = vmax.f32 %v1593_v10, 0.0  ;;  %v1592_v28 = vsub.f32 %v7465_v44, %v1528_v7 }
 0x125   :  { %6625 = vrsqrt.f32 %v7755_v48  ;;  %v7767_v27 = vpop.eup %6621  ;;  %v2283_v61 = vmax.f32 %v2219_v12, 0.0  ;;  %v1530_v24 = vmul.f32 2.0, %v1029_v20  ;;  %v1533_v8 = vmul.f32 2.0, %v6169_v32  ;;  %v6175_v62 = vpop.f32.mrf.mxu0 }
 0x126   :  { %6627 = vrsqrt.f32 %v7759_v57  ;;  %v1595_v38 = vsub.f32 %v7499_v15, %v1531_v36  ;;  %v7774_v25 = vmax.f32 %v1592_v28, 0.0  ;;  %v1532_v10 = vmul.f32 2.0, %v1039_v35  ;;  %v1402_v36 = vpop.xlane.xlu1 %1401 }
 0x127   :  { %6629 = vrsqrt.f32 %v7762_v17  ;;  %v2336_v11 = vpack.c.bf16 %v2283_v61, %v2282_v58  ;;  %v1594_v7 = vsub.f32 %v7469_v9, %v1530_v24  ;;  %v1535_v20 = vmul.f32 2.0, %v6172_v56  ;;  %v1059_v14 = vpop.f32.mrf.mxu0 }
 0x128   :  { %6631 = vrsqrt.f32 %v7764_v30  ;;  %v7777_v44 = vmax.f32 %v1595_v38, 0.0  ;;  %v1596_v15 = vsub.f32 %v7515_v3, %v1532_v10  ;;  %v1597_v39 = vsub.f32 %v7532_v54, %v1533_v8  ;;  %v1390_v8 = vpop.xlane.xlu0 %1389 }
 0x129   :  { %6633 = vrsqrt.f32 %v7774_v25  ;;  %2991 = vxpose.xlu1.c.b16.start.end [1/1] (short) (narrow) %v2336_v11, 16  ;;  %v7784_v32 = vmax.f32 %v1594_v7, 0.0  ;;  %v1534_v35 = vmul.f32 2.0, %v1049_v53  ;;  %v1537_v29 = vmul.f32 2.0, %v6175_v62  ;;  %v6178_v56 = vpop.f32.mrf.mxu0 }
 0x12a   :  { %6635 = vrsqrt.f32 %v7777_v44  ;;  %v7786_v51 = vmax.f32 %v1596_v15, 0.0  ;;  %v7788_v5 = vmax.f32 %v1597_v39, 0.0  ;;  %v1472_v9 = vadd.f32 %v7304_v18, %v7622_v31 }
 0x12b   :  { %v1599_v3 = vsub.f32 %v7502_v49, %v1535_v20  ;;  %6637 = vrsqrt.f32 %v7784_v32  ;;  %v1598_v54 = vsub.f32 %v7472_v34, %v1534_v35  ;;  %v1536_v12 = vmul.f32 2.0, %v1059_v14  ;;  %v1069_v49 = vpop.f32.mrf.mxu0 }
 0x12c   :  { %v1539_v58 = vmul.f32 2.0, %v6178_v56  ;;  %6639 = vrsqrt.f32 %v7786_v51  ;;  %v1474_v61 = vadd.f32 %v7304_v18, %v7658_v22  ;;  %v1601_v31 = vsub.f32 %v7518_v60, %v1537_v29 }
 0x12d   :  { %v7795_v28 = vpop.eup %6623  ;;  %v7798_v53 = vmax.f32 %v1599_v3, 0.0  ;;  %6641 = vrsqrt.f32 %v7788_v5  ;;  %v7804_v38 = vmax.f32 %v1598_v54, 0.0  ;;  %v1600_v34 = vsub.f32 %v1472_v9, %v1536_v12  ;;  %v6181_v62 = vpop.f32.mrf.mxu0 }
 0x12e   :  { %v1538_v24 = vmul.f32 2.0, %v1069_v49  ;;  %v7807_v10 = vmax.f32 %v1601_v31, 0.0  ;;  %v1475_v11 = vadd.f32 %v7304_v18, %v7696_v16  ;;  %v1476_v22 = vadd.f32 %v7304_v18, %v7720_v19  ;;  %v1405_v9 = vpop.xlane.xlu1 %1404  ;;  %v1396_v49 = vpop.xlane.xlu0 %1395 }
 0x12f   :  { %6643 = vrsqrt.f32 %v7798_v53  ;;  %v7814_v60 = vmax.f32 %v1600_v34, 0.0  ;;  %v1541_v15 = vmul.f32 2.0, %v6181_v62  ;;  %v1079_v39 = vpop.f32.mrf.mxu0  ;;  %v1479_v14 = vadd.f32 %v7304_v18, %v7728_v21 }
 0x130   :  { %6645 = vrsqrt.f32 %v7804_v38  ;;  %v1602_v7 = vsub.f32 %v1474_v61, %v1538_v24  ;;  %v1603_v20 = vsub.f32 %v1475_v11, %v1539_v58  ;;  %v1477_v16 = vadd.f32 %v7304_v18, %v7747_v46 }
 0x131   :  { %1419 = vadd.xlane.f32.xlu0 %v7342_v52  ;;  %6647 = vrsqrt.f32 %v7807_v10  ;;  %v1540_v29 = vmul.f32 2.0, %v1079_v39  ;;  %v7829_v52 = vadd.f32 %v7304_v18, %v7753_v43  ;;  %v6184_v21 = vpop.f32.mrf.mxu0  ;;  %v7837_v46 = vadd.f32 %v7304_v18, %v7771_v1  ;;  %v7854_v1 = vld [vmem:[%s9503_s4] ss:$0 sm:$0xff] }
 0x132   :  { %v7822_v35 = vpop.eup %6625  ;;  %6649 = vrsqrt.f32 %v7814_v60  ;;  %v7825_v19 = vmax.f32 %v1602_v7, 0.0  ;;  %v7833_v56 = vmax.f32 %v1603_v20, 0.0  ;;  %v1605_v54 = vsub.f32 %v1477_v16, %v1541_v15 }
 0x133   :  { %v7831_v3 = vpop.eup %6627  ;;  %v1481_v12 = vadd.f32 %v7304_v18, %v1387_v47  ;;  %v1543_v61 = vmul.f32 2.0, %v6184_v21  ;;  %v1604_v43 = vsub.f32 %v1476_v22, %v1540_v29  ;;  %v7844_v31 = vadd.f32 %v7304_v18, %v1402_v36  ;;  %v1089_v24 = vpop.f32.mrf.mxu0 }
 0x134   :  { %9582 = vst [vmem:[#allocation23_spill] sm:$0xff] %v7825_v19  ;;  %9583 = vst [vmem:[#allocation24_spill] sm:$0xff] %v7833_v56  ;;  %v7840_v58 = vpop.eup %6629  ;;  %6651 = vrsqrt.f32 %v7825_v19  ;;  %v7849_v62 = vmax.f32 %v1605_v54, 0.0  ;;  %v7857_v47 = vadd.f32 %v7854_v1, %v1390_v8  ;;  %v7860_v11 = vadd.f32 %v7854_v1, %v1405_v9 }
 0x135   :  { %v7846_v34 = vpop.eup %6631  ;;  %6653 = vrsqrt.f32 %v7833_v56  ;;  %v7864_v36 = vmax.f32 %v1604_v43, 0.0  ;;  %v1607_v22 = vsub.f32 %v1479_v14, %v1543_v61  ;;  %v1542_v7 = vmul.f32 2.0, %v1089_v24  ;;  %v6187_v8 = vpop.f32.mrf.mxu0 }
 0x136   :  { %v7862_v18 = vpop.eup %6633  ;;  %v7867_v15 = vadd.f32 %v7854_v1, %v1396_v49  ;;  %vm1688_vm13 = vcmp.eq.f32.partialorder %v7358_v55, inf  ;;  %vm1695_vm14 = vcmp.eq.f32.partialorder %v7350_v50, inf  ;;  %1422 = vadd.xlane.f32.xlu1 %v7353_v4  ;;  %6655 = vrsqrt.f32 %v7849_v62  ;;  %v1399_v24 = vpop.xlane.xlu0 %1398 }
 0x137   :  { %v7871_v20 = vpop.eup %6635  ;;  %v1841_v39 = vmul.f32 %v7698_v13, %v7609_v45  ;;  %vm1842_vm15 = vcmp.eq.f32.partialorder %v7609_v45, inf  ;;  %vm1844_vm0 = vcmp.eq.f32.partialorder %v7609_v45, 0.0  ;;  %6657 = vrsqrt.f32 %v7864_v36  ;;  %v1099_v9 = vpop.f32.mrf.mxu0 }
 0x138   :  { %v7880_v14 = vmax.f32 %v1607_v22, 0.0  ;;  %v1606_v16 = vsub.f32 %v7547_v6, %v1542_v7  ;;  %v1545_v29 = vmul.f32 2.0, %v6187_v8  ;;  %vm1690_vm1 = vcmp.eq.f32.partialorder %v7358_v55, 0.0  ;;  %v7885_v4 = vpop.eup %6637 }
 0x139   :  { %vm1697_vm2 = vcmp.eq.f32.partialorder %v7350_v50, 0.0  ;;  %v1843_v13 = vsel %vm1842_vm15, %v7609_v45, %v1841_v39  ;;  %v1845_v21 = vand.u32 2147483648, %v7609_v45  ;;  %v1848_v54 = vmul.f32 %v7684_v59, %v7603_v63  ;;  %v7892_v61 = vpop.eup %6639  ;;  %v6190_v7 = vpop.f32.mrf.mxu0 }
 0x13a   :  { %9584 = vst [vmem:[#allocation25_spill] sm:$0xff] %v7880_v14  ;;  %vm1849_vm3 = vcmp.eq.f32.partialorder %v7603_v63, inf  ;;  %6659 = vrsqrt.f32 %v7880_v14  ;;  %v7895_v6 = vmax.f32 %v1606_v16, 0.0  ;;  %v1544_v43 = vmul.f32 2.0, %v1099_v9  ;;  %v7897_v22 = vpop.eup %6641  ;;  %v1408_v9 = vpop.xlane.xlu1 %1407 }
 0x13b   :  { %v1609_v49 = vsub.f32 %v1481_v12, %v1545_v29  ;;  %v1846_v8 = vsel %vm1844_vm0, %v1845_v21, %v1843_v13  ;;  %v1850_v39 = vsel %vm1849_vm3, %v7603_v63, %v1848_v54  ;;  %vm1851_vm4 = vcmp.eq.f32.partialorder %v7603_v63, 0.0  ;;  %v1109_v45 = vpop.f32.mrf.mxu0 }
 0x13c   :  { %9585 = vst [vmem:[#allocation26_spill] sm:$0xff] %v7895_v6  ;;  %v1852_v59 = vand.u32 2147483648, %v7603_v63  ;;  %v7904_v56 = vpop.eup %6643  ;;  %6661 = vrsqrt.f32 %v7895_v6  ;;  %v1608_v16 = vsub.f32 %v7829_v52, %v1544_v43  ;;  %v1547_v12 = vmul.f32 2.0, %v6190_v7 }
 0x13d   :  { %9586 = vst [vmem:[#allocation27_spill] sm:$0xff] %v7904_v56  ;;  %v7908_v29 = vmax.f32 %v1609_v49, 0.0  ;;  %v7910_v14 = vpop.eup %6645  ;;  %v2156_v21 = vmul.f32 1.25, %v1846_v8  ;;  %v7913_v54 = vadd.f32 %v7854_v1, %v1408_v9  ;;  %v1485_v63 = vadd.f32 %v7854_v1, %v1399_v24  ;;  %v6193_v7 = vpop.f32.mrf.mxu0 }
 0x13e   :  { %v1853_v13 = vsel %vm1851_vm4, %v1852_v59, %v1850_v39  ;;  %v7916_v19 = vpop.eup %6647  ;;  %v7918_v56 = vmax.f32 %v1608_v16, 0.0  ;;  %v1611_v52 = vsub.f32 %v7837_v46, %v1547_v12  ;;  %v1546_v43 = vmul.f32 2.0, %v1109_v45 }
 0x13f   :  { %9587 = vst [vmem:[#allocation28_spill] sm:$0xff] %v7908_v29  ;;  %6663 = vrsqrt.f32 %v7908_v29  ;;  %v7922_v49 = vpop.eup %6649  ;;  %v2157_v6 = vmul.f32 1.25, %v1853_v13  ;;  %v2220_v39 = vsub.f32 1.0, %v2156_v21  ;;  %v1689_v8 = vsel %vm1688_vm13, %v7358_v55, %v7486_v41  ;;  %v1119_v9 = vpop.f32.mrf.mxu0 }
 0x140   :  { %9588 = vst [vmem:[#allocation29_spill] sm:$0xff] %v7918_v56  ;;  %v1696_v24 = vsel %vm1695_vm14, %v7350_v50, %v7479_v23  ;;  %6665 = vrsqrt.f32 %v7918_v56  ;;  %v7933_v46 = vmax.f32 %v1611_v52, 0.0  ;;  %v1549_v59 = vmul.f32 2.0, %v6193_v7 }
 0x141   :  { %v1610_v16 = vsub.f32 %v7857_v47, %v1546_v43  ;;  %v7936_v12 = vpop.eup %6651  ;;  %v2221_v45 = vsub.f32 1.0, %v2157_v6  ;;  %v7938_v13 = vmax.f32 %v2220_v39, 0.0  ;;  %v9591_v41 = vand.u32 2147483648, %v7358_v55  ;;  %v6196_v7 = vpop.f32.mrf.mxu0 }
 0x142   :  { %9589 = vst [vmem:[#allocation30_spill] sm:$0xff] %v7933_v46  ;;  %9590 = vst [vmem:[#allocation31_spill] sm:$0xff] %v7936_v12  ;;  %v9592_v23 = vand.u32 2147483648, %v7350_v50  ;;  %v7948_v29 = vpop.eup %6653  ;;  %6667 = vrsqrt.f32 %v7933_v46  ;;  %v1548_v43 = vmul.f32 2.0, %v1119_v9  ;;  %v1613_v6 = vsub.f32 %v1485_v63, %v1549_v59 }
 0x143   :  { %v1692_v21 = vsel %vm1690_vm1, %v9591_v41, %v1689_v8  ;;  %9593 = vst [vmem:[#allocation32_spill] sm:$0xff] %v7948_v29  ;;  %v7951_v47 = vmax.f32 %v1610_v16, 0.0  ;;  %v7953_v39 = vmax.f32 %v2221_v45, 0.0  ;;  %v1855_v55 = vmul.f32 %v7714_v37, %v7631_v2  ;;  %v7957_v8 = vpop.eup %6655  ;;  %v1129_v63 = vpop.f32.mrf.mxu0 }
 0x144   :  { %v1699_v52 = vsel %vm1697_vm2, %v9592_v23, %v1696_v24  ;;  %v2134_v12 = vmul.f32 1.25, %v1692_v21  ;;  %v1551_v50 = vmul.f32 2.0, %v6196_v7  ;;  %v1612_v24 = vsub.f32 %v7867_v15, %v1548_v43  ;;  %v7963_v16 = vpop.eup %6657 }
 0x145   :  { %9594 = vst [vmem:[#allocation33_spill] sm:$0xff] %v7951_v47  ;;  %v2135_v56 = vmul.f32 1.25, %v1699_v52  ;;  %6669 = vrsqrt.f32 %v7951_v47  ;;  %v7961_v41 = vmax.f32 %v1613_v6, 0.0  ;;  %vm1856_vm5 = vcmp.eq.f32.partialorder %v7631_v2, inf  ;;  %v1414_v47 = vpop.xlane.xlu0 %1413 }
 0x146   :  { %v2198_v9 = vsub.f32 1.0, %v2134_v12  ;;  %v1615_v37 = vsub.f32 %v7860_v11, %v1551_v50  ;;  %v7969_v21 = vmax.f32 %v1612_v24, 0.0  ;;  %v1550_v23 = vmul.f32 2.0, %v1129_v63  ;;  %v1411_v50 = vpop.xlane.xlu1 %1410 }
 0x147   :  { %9595 = vst [vmem:[#allocation34_spill] sm:$0xff] %v7961_v41  ;;  %v2199_v45 = vsub.f32 1.0, %v2135_v56  ;;  %6671 = vrsqrt.f32 %v7961_v41  ;;  %vm1702_vm6 = vcmp.eq.f32.partialorder %v7402_v26, inf  ;;  %v7973_v15 = vpop.eup %6659  ;;  %v1857_v12 = vsel %vm1856_vm5, %v7631_v2, %v1855_v55  ;;  %v6199_v56 = vpop.f32.mrf.mxu0 }
 0x148   :  { %9596 = vst [vmem:[#allocation35_spill] sm:$0xff] %v7969_v21  ;;  %9597 = vst [vmem:[#allocation36_spill] sm:$0xff] %v7973_v15  ;;  %v7975_v52 = vmax.f32 %v2198_v9, 0.0  ;;  %vm1858_vm7 = vcmp.eq.f32.partialorder %v7631_v2, 0.0  ;;  %vm1704_vm8 = vcmp.eq.f32.partialorder %v7402_v26, 0.0  ;;  %vm1709_vm9 = vcmp.eq.f32.partialorder %v7396_v33, inf }
 0x149   :  { %v7977_v43 = vmax.f32 %v2199_v45, 0.0  ;;  %v7983_v11 = vmax.f32 %v1615_v37, 0.0  ;;  %6673 = vrsqrt.f32 %v7969_v21  ;;  %v1614_v6 = vsub.f32 %v7844_v31, %v1550_v23  ;;  %v7989_v24 = vpop.eup %6661  ;;  %v1139_v9 = vpop.f32.mrf.mxu0 }
 0x14a   :  { %v1859_v7 = vand.u32 2147483648, %v7631_v2  ;;  %vm1711_vm10 = vcmp.eq.f32.partialorder %v7396_v33, 0.0  ;;  %9599 = vst [vmem:[#allocation38_spill] sm:$0xff] %v7989_v24  ;;  %v1862_v63 = vmul.f32 %v7706_v0, %v7618_v42  ;;  %vm1863_vm11 = vcmp.eq.f32.partialorder %v7618_v42, inf }
 0x14b   :  { %9598 = vst [vmem:[#allocation37_spill] sm:$0xff] %v7983_v11  ;;  %vm1865_vm12 = vcmp.eq.f32.partialorder %v7618_v42, 0.0  ;;  %6675 = vrsqrt.f32 %v7983_v11  ;;  %v7998_v31 = vmax.f32 %v1614_v6, 0.0  ;;  %v1866_v37 = vand.u32 2147483648, %v7618_v42 }
 0x14c   :  { %v1860_v45 = vsel %vm1858_vm7, %v1859_v7, %v1857_v12  ;;  %v8003_v23 = vpop.eup %6663  ;;  %v1864_v55 = vsel %vm1863_vm11, %v7618_v42, %v1862_v63  ;;  %v1553_v0 = vmul.f32 2.0, %v6199_v56  ;;  %v1489_v46 = vadd.f32 %v7854_v1, %v1411_v50  ;;  %v9603_v50 = vld [vmem:[#allocation10_spill] sm:$0xff] }
 0x14d   :  { %9600 = vst [vmem:[#allocation39_spill] sm:$0xff] %v7998_v31  ;;  %9601 = vst [vmem:[#allocation40_spill] sm:$0xff] %v8003_v23  ;;  %v2158_v59 = vmul.f32 1.25, %v1860_v45  ;;  %6677 = vrsqrt.f32 %v7998_v31  ;;  %v1867_v15 = vsel %vm1865_vm12, %v1866_v37, %v1864_v55  ;;  %v8009_v6 = vadd.f32 %v7854_v1, %v1414_v47  ;;  %v8011_v2 = vpop.eup %6665  ;;  %v9604_v45 = vld [vmem:[#allocation18_spill] sm:$0xff]  ;;  %v9615_v23 = vld [vmem:[#allocation16_spill] sm:$0xff] }
 0x14e   :  { %v1552_v11 = vmul.f32 2.0, %v1139_v9  ;;  %9602 = vst [vmem:[#allocation41_spill] sm:$0xff] %v8011_v2  ;;  %v2159_v12 = vmul.f32 1.25, %v1867_v15  ;;  %v1617_v24 = vsub.f32 %v1489_v46, %v1553_v0  ;;  %v1701_v42 = vmul.f32 %v7504_v40, %v7402_v26  ;;  %v9616_v2 = vld [vmem:[#allocation20_spill] sm:$0xff] }
 0x14f   :  { %v2222_v7 = vsub.f32 1.0, %v2158_v59  ;;  %v1708_v63 = vmul.f32 %v9603_v50, %v7396_v33  ;;  %v1883_v55 = vmul.f32 %v7767_v27, %v9604_v45  ;;  %vm1884_vm13 = vcmp.eq.f32.partialorder %v9604_v45, inf  ;;  %v8021_v47 = vpop.eup %6667 }
 0x150   :  { %v1616_v56 = vsub.f32 %v7913_v54, %v1552_v11  ;;  %9605 = vst [vmem:[#allocation10_spill] sm:$0xff] %v8021_v47  ;;  %v2223_v9 = vsub.f32 1.0, %v2159_v12  ;;  %v8025_v59 = vmax.f32 %v1617_v24, 0.0  ;;  %v1703_v40 = vsel %vm1702_vm6, %v7402_v26, %v1701_v42  ;;  %v6202_v54 = vpop.f32.mrf.mxu0 }
 0x151   :  { %v8023_v37 = vmax.f32 %v2222_v7, 0.0  ;;  %v9608_v15 = vand.u32 2147483648, %v7402_v26  ;;  %v1710_v11 = vsel %vm1709_vm9, %v7396_v33, %v1708_v63  ;;  %v1885_v0 = vsel %vm1884_vm13, %v9604_v45, %v1883_v55 }
 0x152   :  { %9606 = vst [vmem:[#allocation18_spill] sm:$0xff] %v8025_v59  ;;  %v8030_v46 = vmax.f32 %v1616_v56, 0.0  ;;  %v8040_v24 = vpop.eup %6669  ;;  %v8042_v12 = vmax.f32 %v2223_v9, 0.0  ;;  %6679 = vrsqrt.f32 %v8025_v59  ;;  %v9610_v7 = vand.u32 2147483648, %v7396_v33  ;;  %v1417_v33 = vpop.xlane.xlu0 %1416 }
 0x153   :  { %v1706_v27 = vsel %vm1704_vm8, %v9608_v15, %v1703_v40  ;;  %9609 = vst [vmem:[#allocation43_spill] sm:$0xff] %v8040_v24  ;;  %vm1886_vm14 = vcmp.eq.f32.partialorder %v9604_v45, 0.0  ;;  %v1887_v50 = vand.u32 2147483648, %v9604_v45  ;;  %v9612_v40 = vld [vmem:[#allocation17_spill] sm:$0xff]  ;;  %v9613_v15 = vld [vmem:[#allocation22_spill] sm:$0xff]  ;;  %v1491_v59 = vadd.f32 %v7854_v1, %v1417_v33 }
 0x154   :  { %9607 = vst [vmem:[#allocation42_spill] sm:$0xff] %v8030_v46  ;;  %v1713_v42 = vsel %vm1711_vm10, %v9610_v7, %v1710_v11  ;;  %v2136_v56 = vmul.f32 1.25, %v1706_v27  ;;  %6681 = vrsqrt.f32 %v8030_v46  ;;  %v8052_v63 = vpop.eup %6671  ;;  %v1890_v31 = vmul.f32 %v9613_v15, %v9612_v40  ;;  %v1149_v27 = vpop.f32.mrf.mxu0  ;;  %v93_v45 = vld [vmem:[%s9501_s2] sm:$0xff] }
 0x155   :  { %v2137_v26 = vmul.f32 1.25, %v1713_v42  ;;  %9611 = vst [vmem:[#allocation44_spill] sm:$0xff] %v8052_v63  ;;  %vm1891_vm15 = vcmp.eq.f32.partialorder %v9612_v40, inf  ;;  %v1888_v7 = vsel %vm1886_vm14, %v1887_v50, %v1885_v0  ;;  %vm1893_vm0 = vcmp.eq.f32.partialorder %v9612_v40, 0.0 }
 0x156   :  { %v2200_v9 = vsub.f32 1.0, %v2136_v56  ;;  %v1894_v42 = vand.u32 2147483648, %v9612_v40  ;;  %v94_v56 = vld [vmem:[%s9501_s2 + $0x8] sm:$0xff]  ;;  %v8067_v55 = vpop.eup %6673  ;;  %v1892_v47 = vsel %vm1891_vm15, %v9612_v40, %v1890_v31  ;;  %v1555_v0 = vmul.f32 2.0, %v6202_v54 }
 0x157   :  { %v2201_v11 = vsub.f32 1.0, %v2137_v26  ;;  %9614 = vst [vmem:[#allocation17_spill] sm:$0xff] %v8067_v55  ;;  %v2162_v26 = vmul.f32 1.25, %v1888_v7  ;;  %v1554_v46 = vmul.f32 2.0, %v1149_v27  ;;  %v2358_v29 = vpack.c.bf16 %v94_v56, %v93_v45  ;;  %v9617_v27 = vld [vmem:[#allocation15_spill] sm:$0xff] }
 0x158   :  { %v8069_v15 = vmax.f32 %v2200_v9, 0.0  ;;  %v1895_v24 = vsel %vm1893_vm0, %v1894_v42, %v1892_v47  ;;  %v8075_v63 = vpop.eup %6675  ;;  %v1869_v55 = vmul.f32 %v9616_v2, %v9615_v23  ;;  %v1619_v31 = vsub.f32 %v1491_v59, %v1555_v0 }
 0x159   :  { %v8072_v50 = vmax.f32 %v2201_v11, 0.0  ;;  %v2163_v41 = vmul.f32 1.25, %v1895_v24  ;;  %v2226_v21 = vsub.f32 1.0, %v2162_v26  ;;  %v1618_v54 = vsub.f32 %v8009_v6, %v1554_v46  ;;  %6207 = vmatpush3.bf16.msra.mxu0 %v2358_v29  ;;  %v9618_v6 = vld [vmem:[#allocation19_spill] sm:$0xff] }
 0x15a   :  { %vm1870_vm1 = vcmp.eq.f32.partialorder %v9615_v23, inf  ;;  %v8083_v47 = vpop.eup %6677  ;;  %vm1872_vm2 = vcmp.eq.f32.partialorder %v9615_v23, 0.0  ;;  %v8089_v33 = vmax.f32 %v1619_v31, 0.0  ;;  %v1873_v59 = vand.u32 2147483648, %v9615_v23  ;;  %v9619_v11 = vld [vmem:[#allocation7_spill] sm:$0xff] }
 0x15b   :  { %v2327_v9 = vpack.c.bf16 %v8072_v50, %v8069_v15  ;;  %v2227_v1 = vsub.f32 1.0, %v2163_v41  ;;  %v8085_v40 = vmax.f32 %v2226_v21, 0.0  ;;  %v1871_v24 = vsel %vm1870_vm1, %v9615_v23, %v1869_v55  ;;  %v9621_v21 = vld [vmem:[#allocation6_spill] sm:$0xff] }
 0x15c   :  { %v8091_v2 = vmax.f32 %v1618_v54, 0.0  ;;  %v1876_v46 = vmul.f32 %v9618_v6, %v9617_v27  ;;  %vm1716_vm3 = vcmp.eq.f32.partialorder %v9619_v11, inf  ;;  %v9620_v7 = vmov 0.0  }
 0x15d   :  { %6212 = vmatprep.subr.bf16.mxu0 %v9620_v7  ;;  %v2291_v41 = vmax.f32 %v2227_v1, 0.0  ;;  %vm1877_vm4 = vcmp.eq.f32.partialorder %v9617_v27, inf  ;;  %vm1879_vm5 = vcmp.eq.f32.partialorder %v9617_v27, 0.0  ;;  %v1880_v29 = vand.u32 2147483648, %v9617_v27 }
 0x15e   :  { %vm1718_vm6 = vcmp.eq.f32.partialorder %v9619_v11, 0.0  ;;  %vm1723_vm7 = vcmp.eq.f32.partialorder %v9621_v21, inf  ;;  %6683 = vrsqrt.f32 %v8089_v33  ;;  %v1874_v23 = vsel %vm1872_vm2, %v1873_v59, %v1871_v24  ;;  %v9623_v59 = vld [vmem:[#allocation21_spill] sm:$0xff] }
 0x15f   :  { %v1878_v55 = vsel %vm1877_vm4, %v9617_v27, %v1876_v46  ;;  %v1897_v42 = vmul.f32 %v7822_v35, %v7755_v48  ;;  %vm1725_vm8 = vcmp.eq.f32.partialorder %v9621_v21, 0.0  ;;  %v2340_v45 = vpack.c.bf16 %v2291_v41, %v8085_v40  ;;  %v8110_v0 = vpop.eup %6679 }
 0x160   :  { %6685 = vrsqrt.f32 %v8091_v2  ;;  %v1881_v56 = vsel %vm1879_vm5, %v1880_v29, %v1878_v55  ;;  %v2160_v26 = vmul.f32 1.25, %v1874_v23  ;;  %v9622_v31 = vpack.c.bf16 %v7953_v39, %v7938_v13  ;;  %v9624_v23 = vld [vmem:[#allocation12_spill] sm:$0xff] }
 0x161   :  { %v2161_v54 = vmul.f32 1.25, %v1881_v56  ;;  %vm1898_vm9 = vcmp.eq.f32.partialorder %v7755_v48, inf  ;;  %vm1900_vm10 = vcmp.eq.f32.partialorder %v7755_v48, 0.0  ;;  %v1901_v35 = vand.u32 2147483648, %v7755_v48  ;;  %v8118_v1 = vpop.eup %6681  ;;  %v9626_v56 = vld [vmem:[#allocation11_spill] sm:$0xff] }
 0x162   :  { %3051 = vxpose.xlu0.c.b16.start.end [1/1] (short) (narrow) %v9622_v31, 16  ;;  %v2224_v40 = vsub.f32 1.0, %v2160_v26  ;;  %v1899_v24 = vsel %vm1898_vm9, %v7755_v48, %v1897_v42  ;;  %v1904_v27 = vmul.f32 %v7795_v28, %v9623_v59  ;;  %vm1905_vm11 = vcmp.eq.f32.partialorder %v9623_v59, inf }
 0x163   :  { %v2225_v6 = vsub.f32 1.0, %v2161_v54  ;;  %v1902_v13 = vsel %vm1900_vm10, %v1901_v35, %v1899_v24  ;;  %vm1907_vm12 = vcmp.eq.f32.partialorder %v9623_v59, 0.0  ;;  %v1908_v39 = vand.u32 2147483648, %v9623_v59 }
 0x164   :  { %v2288_v46 = vmax.f32 %v2224_v40, 0.0  ;;  %v1906_v41 = vsel %vm1905_vm11, %v9623_v59, %v1904_v27  ;;  %v2164_v29 = vmul.f32 1.25, %v1902_v13  ;;  %v1715_v55 = vmul.f32 %v9624_v23, %v9619_v11 }
 0x165   :  { %v9625_v48 = vpack.c.bf16 %v8042_v12, %v8023_v37  ;;  %v2289_v28 = vmax.f32 %v2225_v6, 0.0  ;;  %v1909_v42 = vsel %vm1907_vm12, %v1908_v39, %v1906_v41  ;;  %v1722_v26 = vmul.f32 %v9626_v56, %v9621_v21 }
 0x166   :  { %v1925_v31 = vmul.f32 %v7862_v18, %v7774_v25  ;;  %v2165_v54 = vmul.f32 1.25, %v1909_v42  ;;  %v2228_v35 = vsub.f32 1.0, %v2164_v29  ;;  %v1717_v40 = vsel %vm1716_vm3, %v9619_v11, %v1715_v55  ;;  %v9630_v42 = vld [vmem:[#allocation9_spill] sm:$0xff] }
 0x167   :  { %3111 = vxpose.xlu0.c.b16.start.end [1/1] (short) (narrow) %v9625_v48, 16  ;;  %vm1926_vm13 = vcmp.eq.f32.partialorder %v7774_v25, inf  ;;  %v9627_v37 = vpack.c.bf16 %v7977_v43, %v7975_v52  ;;  %v2339_v12 = vpack.c.bf16 %v2289_v28, %v2288_v46  ;;  %v9628_v24 = vand.u32 2147483648, %v9619_v11 }
 0x168   :  { %v1724_v18 = vsel %vm1723_vm7, %v9621_v21, %v1722_v26  ;;  %v1927_v27 = vsel %vm1926_vm13, %v7774_v25, %v1925_v31  ;;  %v2229_v6 = vsub.f32 1.0, %v2165_v54  ;;  %v2292_v13 = vmax.f32 %v2228_v35, 0.0 }
 0x169   :  { %2390 = vxpose.xlu1.c.b16.start.end [1/1] (short) (narrow) %v9627_v37, 16  ;;  %v1720_v59 = vsel %vm1718_vm6, %v9628_v24, %v1717_v40  ;;  %v9629_v39 = vand.u32 2147483648, %v9621_v21  ;;  %vm1928_vm14 = vcmp.eq.f32.partialorder %v7774_v25, 0.0  ;;  %v1929_v46 = vand.u32 2147483648, %v7774_v25  ;;  %v9632_v24 = vld [vmem:[#allocation8_spill] sm:$0xff] }
 0x16a   :  { %v2138_v43 = vmul.f32 1.25, %v1720_v59  ;;  %v1932_v41 = vmul.f32 %v7846_v34, %v7764_v30  ;;  %v2293_v29 = vmax.f32 %v2229_v6, 0.0  ;;  %vm1933_vm15 = vcmp.eq.f32.partialorder %v7764_v30, inf  ;;  %v9631_v34 = vld [vmem:[#allocation14_spill] sm:$0xff]  ;;  %v9633_v59 = vld [vmem:[#allocation13_spill] sm:$0xff] }
 0x16b   :  { %v1727_v52 = vsel %vm1725_vm8, %v9629_v39, %v1724_v18  ;;  %2451 = vxpose.xlu0.c.b16.start.end [1/1] (short) (narrow) %v2327_v9, 16  ;;  %vm1935_vm0 = vcmp.eq.f32.partialorder %v7764_v30, 0.0  ;;  %v1930_v55 = vsel %vm1928_vm14, %v1929_v46, %v1927_v27  ;;  %v1936_v50 = vand.u32 2147483648, %v7764_v30  ;;  %v8166_v9 = vpop.eup %6683 }
 0x16c   :  { %v2139_v11 = vmul.f32 1.25, %v1727_v52  ;;  %v2202_v23 = vsub.f32 1.0, %v2138_v43  ;;  %v1934_v15 = vsel %vm1933_vm15, %v7764_v30, %v1932_v41  ;;  %v2341_v48 = vpack.c.bf16 %v2293_v29, %v2292_v13 }
 0x16d   :  { %3231 = vxpose.xlu1.c.b16.start.end [1/1] (short) (narrow) %v2340_v45, 16  ;;  %v2168_v28 = vmul.f32 1.25, %v1930_v55  ;;  %v1729_v56 = vmul.f32 %v9631_v34, %v9630_v42  ;;  %v8170_v26 = vpop.eup %6685  ;;  %v1937_v54 = vsel %vm1935_vm0, %v1936_v50, %v1934_v15  ;;  %vm1730_vm1 = vcmp.eq.f32.partialorder %v9630_v42, inf }
 0x16e   :  { %v2203_v21 = vsub.f32 1.0, %v2139_v11  ;;  %v2266_v25 = vmax.f32 %v2202_v23, 0.0  ;;  %vm1732_vm2 = vcmp.eq.f32.partialorder %v9630_v42, 0.0  ;;  %v2169_v45 = vmul.f32 1.25, %v1937_v54 }
 0x16f   :  { %3171 = vxpose.xlu0.c.b16.start.end [1/1] (short) (narrow) %v2339_v12, 16  ;;  %v2232_v35 = vsub.f32 1.0, %v2168_v28  ;;  %v1731_v30 = vsel %vm1730_vm1, %v9630_v42, %v1729_v56  ;;  %v1733_v40 = vand.u32 2147483648, %v9630_v42  ;;  %v1736_v18 = vmul.f32 %v9633_v59, %v9632_v24 }
 0x170   :  { %v2267_v31 = vmax.f32 %v2203_v21, 0.0  ;;  %vm1737_vm3 = vcmp.eq.f32.partialorder %v9632_v24, inf  ;;  %vm1739_vm4 = vcmp.eq.f32.partialorder %v9632_v24, 0.0  ;;  %v2233_v12 = vsub.f32 1.0, %v2169_v45 }
 0x171   :  { %3291 = vxpose.xlu1.c.b16.start.end [1/1] (short) (narrow) %v2341_v48, 16  ;;  %v2296_v27 = vmax.f32 %v2232_v35, 0.0  ;;  %v1734_v6 = vsel %vm1732_vm2, %v1733_v40, %v1731_v30  ;;  %v1740_v13 = vand.u32 2147483648, %v9632_v24  ;;  %v1738_v39 = vsel %vm1737_vm3, %v9632_v24, %v1736_v18 }
 0x172   :  { %v2328_v37 = vpack.c.bf16 %v2267_v31, %v2266_v25  ;;  %v2140_v52 = vmul.f32 1.25, %v1734_v6  ;;  %v1953_v43 = vmul.f32 %v7892_v61, %v7786_v51  ;;  %vm1954_vm5 = vcmp.eq.f32.partialorder %v7786_v51, inf }
 0x173   :  { %v2297_v11 = vmax.f32 %v2233_v12, 0.0  ;;  %v1741_v46 = vsel %vm1739_vm4, %v1740_v13, %v1738_v39  ;;  %vm1956_vm6 = vcmp.eq.f32.partialorder %v7786_v51, 0.0  ;;  %v1957_v41 = vand.u32 2147483648, %v7786_v51 }
 0x174   :  { %2511 = vxpose.xlu0.c.b16.start.end [1/1] (short) (narrow) %v2328_v37, 16  ;;  %v2141_v29 = vmul.f32 1.25, %v1741_v46  ;;  %v2204_v23 = vsub.f32 1.0, %v2140_v52  ;;  %v1955_v21 = vsel %vm1954_vm5, %v7786_v51, %v1953_v43  ;;  %v1960_v55 = vmul.f32 %v7897_v22, %v7788_v5 }
 0x175   :  { %v2343_v15 = vpack.c.bf16 %v2297_v11, %v2296_v27  ;;  %v1958_v50 = vsel %vm1956_vm6, %v1957_v41, %v1955_v21  ;;  %vm1961_vm7 = vcmp.eq.f32.partialorder %v7788_v5, inf  ;;  %vm1963_vm8 = vcmp.eq.f32.partialorder %v7788_v5, 0.0 }
 0x176   :  { %v2205_v61 = vsub.f32 1.0, %v2141_v29  ;;  %v2268_v48 = vmax.f32 %v2204_v23, 0.0  ;;  %v1962_v25 = vsel %vm1961_vm7, %v7788_v5, %v1960_v55  ;;  %v1964_v28 = vand.u32 2147483648, %v7788_v5 }
 0x177   :  { %3411 = vxpose.xlu1.c.b16.start.end [1/1] (short) (narrow) %v2343_v15, 16  ;;  %v2172_v42 = vmul.f32 1.25, %v1958_v50  ;;  %v1911_v51 = vmul.f32 %v7840_v58, %v7762_v17  ;;  %vm1912_vm9 = vcmp.eq.f32.partialorder %v7762_v17, inf  ;;  %vm1914_vm10 = vcmp.eq.f32.partialorder %v7762_v17, 0.0 }
 0x178   :  { %v2269_v22 = vmax.f32 %v2205_v61, 0.0  ;;  %v1965_v34 = vsel %vm1963_vm8, %v1964_v28, %v1962_v25  ;;  %v1915_v56 = vand.u32 2147483648, %v7762_v17  ;;  %v1918_v31 = vmul.f32 %v7831_v3, %v7759_v57 }
 0x179   :  { %v2173_v54 = vmul.f32 1.25, %v1965_v34  ;;  %v2236_v45 = vsub.f32 1.0, %v2172_v42  ;;  %v1913_v5 = vsel %vm1912_vm9, %v7762_v17, %v1911_v51  ;;  %vm1919_vm11 = vcmp.eq.f32.partialorder %v7759_v57, inf }
 0x17a   :  { %v2329_v35 = vpack.c.bf16 %v2269_v22, %v2268_v48  ;;  %v1916_v30 = vsel %vm1914_vm10, %v1915_v56, %v1913_v5  ;;  %v1920_v58 = vsel %vm1919_vm11, %v7759_v57, %v1918_v31  ;;  %vm1921_vm12 = vcmp.eq.f32.partialorder %v7759_v57, 0.0 }
 0x17b   :  { %v2237_v40 = vsub.f32 1.0, %v2173_v54  ;;  %v2300_v37 = vmax.f32 %v2236_v45, 0.0  ;;  %v1922_v24 = vand.u32 2147483648, %v7759_v57  ;;  %v2166_v59 = vmul.f32 1.25, %v1916_v30 }
 0x17c   :  { %2571 = vxpose.xlu0.c.b16.start.end [1/1] (short) (narrow) %v2329_v35, 16  ;;  %v1981_v3 = vmul.f32 %v7922_v49, %v7814_v60  ;;  %vm1982_vm13 = vcmp.eq.f32.partialorder %v7814_v60, inf  ;;  %vm1984_vm14 = vcmp.eq.f32.partialorder %v7814_v60, 0.0  ;;  %v1985_v17 = vand.u32 2147483648, %v7814_v60 }
 0x17d   :  { %v2301_v18 = vmax.f32 %v2237_v40, 0.0  ;;  %v1923_v12 = vsel %vm1921_vm12, %v1922_v24, %v1920_v58  ;;  %v2230_v27 = vsub.f32 1.0, %v2166_v59  ;;  %v1988_v6 = vmul.f32 %v7916_v19, %v7807_v10 }
 0x17e   :  { %v2167_v13 = vmul.f32 1.25, %v1923_v12  ;;  %v1983_v57 = vsel %vm1982_vm13, %v7814_v60, %v1981_v3  ;;  %vm1989_vm15 = vcmp.eq.f32.partialorder %v7807_v10, inf  ;;  %vm1991_vm0 = vcmp.eq.f32.partialorder %v7807_v10, 0.0 }
 0x17f   :  { %v2345_v49 = vpack.c.bf16 %v2301_v18, %v2300_v37  ;;  %v2294_v39 = vmax.f32 %v2230_v27, 0.0  ;;  %v1986_v52 = vsel %vm1984_vm14, %v1985_v17, %v1983_v57  ;;  %v1990_v43 = vsel %vm1989_vm15, %v7807_v10, %v1988_v6  ;;  %v9634_v17 = vld [vmem:[#allocation27_spill] sm:$0xff] }
 0x180   :  { %v2231_v11 = vsub.f32 1.0, %v2167_v13  ;;  %v1992_v46 = vand.u32 2147483648, %v7807_v10  ;;  %v2176_v41 = vmul.f32 1.25, %v1986_v52  ;;  %v1939_v29 = vmul.f32 %v7885_v4, %v7784_v32 }
 0x181   :  { %3531 = vxpose.xlu1.c.b16.start.end [1/1] (short) (narrow) %v2345_v49, 16  ;;  %vm1940_vm1 = vcmp.eq.f32.partialorder %v7784_v32, inf  ;;  %vm1942_vm2 = vcmp.eq.f32.partialorder %v7784_v32, 0.0  ;;  %v1943_v60 = vand.u32 2147483648, %v7784_v32  ;;  %v1946_v19 = vmul.f32 %v7871_v20, %v7777_v44 }
 0x182   :  { %v2295_v23 = vmax.f32 %v2231_v11, 0.0  ;;  %v1993_v21 = vsel %vm1991_vm0, %v1992_v46, %v1990_v43  ;;  %v2240_v55 = vsub.f32 1.0, %v2176_v41  ;;  %v1941_v15 = vsel %vm1940_vm1, %v7784_v32, %v1939_v29  ;;  %v9637_v41 = vld [vmem:[#allocation28_spill] sm:$0xff] }
 0x183   :  { %v2177_v10 = vmul.f32 1.25, %v1993_v21  ;;  %v1944_v50 = vsel %vm1942_vm2, %v1943_v60, %v1941_v15  ;;  %vm1947_vm3 = vcmp.eq.f32.partialorder %v7777_v44, inf  ;;  %vm1949_vm4 = vcmp.eq.f32.partialorder %v7777_v44, 0.0  ;;  %v9638_v29 = vld [vmem:[#allocation40_spill] sm:$0xff] }
 0x184   :  { %v2342_v4 = vpack.c.bf16 %v2295_v23, %v2294_v39  ;;  %v2304_v61 = vmax.f32 %v2240_v55, 0.0  ;;  %v1948_v48 = vsel %vm1947_vm3, %v7777_v44, %v1946_v19  ;;  %v1950_v25 = vand.u32 2147483648, %v7777_v44  ;;  %v9635_v39 = vld [vmem:[#allocation29_spill] sm:$0xff]  ;;  %v102_v19 = vld [vmem:[%s9501_s2 + $0x48] sm:$0xff] }
 0x185   :  { %v2241_v28 = vsub.f32 1.0, %v2177_v10  ;;  %v2170_v42 = vmul.f32 1.25, %v1944_v50  ;;  %v2009_v20 = vmul.f32 %v7963_v16, %v7864_v36  ;;  %vm2010_vm5 = vcmp.eq.f32.partialorder %v7864_v36, inf }
 0x186   :  { %3351 = vxpose.xlu0.c.b16.start.end [1/1] (short) (narrow) %v2342_v4, 16  ;;  %v1951_v32 = vsel %vm1949_vm4, %v1950_v25, %v1948_v48  ;;  %vm2012_vm6 = vcmp.eq.f32.partialorder %v7864_v36, 0.0  ;;  %v2013_v51 = vand.u32 2147483648, %v7864_v36  ;;  %v2016_v22 = vmul.f32 %v7957_v8, %v7849_v62 }
 0x187   :  { %v2305_v34 = vmax.f32 %v2241_v28, 0.0  ;;  %v2171_v56 = vmul.f32 1.25, %v1951_v32  ;;  %v2234_v31 = vsub.f32 1.0, %v2170_v42  ;;  %v2011_v44 = vsel %vm2010_vm5, %v7864_v36, %v2009_v20  ;;  %v9639_v28 = vld [vmem:[#allocation23_spill] sm:$0xff] }
 0x188   :  { %v2014_v54 = vsel %vm2012_vm6, %v2013_v51, %v2011_v44  ;;  %vm2017_vm7 = vcmp.eq.f32.partialorder %v7849_v62, inf  ;;  %vm2019_vm8 = vcmp.eq.f32.partialorder %v7849_v62, 0.0  ;;  %v2020_v16 = vand.u32 2147483648, %v7849_v62  ;;  %v9640_v42 = vld [vmem:[#allocation31_spill] sm:$0xff]  ;;  %v9641_v44 = vld [vmem:[#allocation24_spill] sm:$0xff] }
 0x189   :  { %v2347_v45 = vpack.c.bf16 %v2305_v34, %v2304_v61  ;;  %v2235_v5 = vsub.f32 1.0, %v2171_v56  ;;  %v2298_v35 = vmax.f32 %v2234_v31, 0.0  ;;  %v2018_v30 = vsel %vm2017_vm7, %v7849_v62, %v2016_v22 }
 0x18a   :  { %v2021_v58 = vsel %vm2019_vm8, %v2020_v16, %v2018_v30  ;;  %v2180_v40 = vmul.f32 1.25, %v2014_v54  ;;  %v1967_v8 = vmul.f32 %v7910_v14, %v7804_v38  ;;  %vm1968_vm9 = vcmp.eq.f32.partialorder %v7804_v38, inf  ;;  %v9642_v54 = vld [vmem:[#allocation32_spill] sm:$0xff] }
 0x18b   :  { %3651 = vxpose.xlu1.c.b16.start.end [1/1] (short) (narrow) %v2347_v45, 16  ;;  %v2299_v36 = vmax.f32 %v2235_v5, 0.0  ;;  %v2181_v37 = vmul.f32 1.25, %v2021_v58  ;;  %vm1970_vm10 = vcmp.eq.f32.partialorder %v7804_v38, 0.0  ;;  %v1971_v24 = vand.u32 2147483648, %v7804_v38 }
 0x18c   :  { %v2244_v59 = vsub.f32 1.0, %v2180_v40  ;;  %v1969_v3 = vsel %vm1968_vm9, %v7804_v38, %v1967_v8  ;;  %v1974_v62 = vmul.f32 %v9634_v17, %v7798_v53  ;;  %vm1975_vm11 = vcmp.eq.f32.partialorder %v7798_v53, inf  ;;  %v9636_v38 = vld [vmem:[#allocation41_spill] sm:$0xff] }
 0x18d   :  { %v2344_v18 = vpack.c.bf16 %v2299_v36, %v2298_v35  ;;  %v2245_v12 = vsub.f32 1.0, %v2181_v37  ;;  %v1972_v14 = vsel %vm1970_vm10, %v1971_v24, %v1969_v3  ;;  %vm1977_vm12 = vcmp.eq.f32.partialorder %v7798_v53, 0.0  ;;  %v9643_v36 = vld [vmem:[#allocation35_spill] sm:$0xff]  ;;  %v9644_v37 = vld [vmem:[#allocation17_spill] sm:$0xff] }
 0x18e   :  { %v2308_v27 = vmax.f32 %v2244_v59, 0.0  ;;  %v1976_v6 = vsel %vm1975_vm11, %v7798_v53, %v1974_v62  ;;  %v1978_v13 = vand.u32 2147483648, %v7798_v53  ;;  %v2174_v57 = vmul.f32 1.25, %v1972_v14  ;;  %v101_v53 = vld [vmem:[%s9501_s2 + $0x40] sm:$0xff] }
 0x18f   :  { %3471 = vxpose.xlu0.c.b16.start.end [1/1] (short) (narrow) %v2344_v18, 16  ;;  %v2309_v49 = vmax.f32 %v2245_v12, 0.0  ;;  %v2037_v52 = vmul.f32 %v9636_v38, %v9635_v39  ;;  %vm2038_vm13 = vcmp.eq.f32.partialorder %v9635_v39, inf  ;;  %vm2040_vm14 = vcmp.eq.f32.partialorder %v9635_v39, 0.0  ;;  %v9645_v18 = vld [vmem:[#allocation34_spill] sm:$0xff]  ;;  %v9646_v12 = vld [vmem:[#allocation44_spill] sm:$0xff] }
 0x190   :  { %v1979_v43 = vsel %vm1977_vm12, %v1978_v13, %v1976_v6  ;;  %v2238_v11 = vsub.f32 1.0, %v2174_v57  ;;  %v2041_v46 = vand.u32 2147483648, %v9635_v39  ;;  %v2044_v60 = vmul.f32 %v9638_v29, %v9637_v41 }
 0x191   :  { %v2349_v23 = vpack.c.bf16 %v2309_v49, %v2308_v27  ;;  %v2175_v21 = vmul.f32 1.25, %v1979_v43  ;;  %v2039_v55 = vsel %vm2038_vm13, %v9635_v39, %v2037_v52  ;;  %vm2045_vm15 = vcmp.eq.f32.partialorder %v9637_v41, inf  ;;  %v2639_v27 = vpop.trf.xlu0 }
 0x192   :  { %v2302_v15 = vmax.f32 %v2238_v11, 0.0  ;;  %v2042_v10 = vsel %vm2040_vm14, %v2041_v46, %v2039_v55  ;;  %v2046_v50 = vsel %vm2045_vm15, %v9637_v41, %v2044_v60  ;;  %vm2047_vm0 = vcmp.eq.f32.partialorder %v9637_v41, 0.0  ;;  %v9647_v46 = vld [vmem:[#allocation26_spill] sm:$0xff]  ;;  %v9650_v55 = vld [vmem:[#allocation36_spill] sm:$0xff] }
 0x193   :  { %3771 = vxpose.xlu1.c.b16.start.end [1/1] (short) (narrow) %v2349_v23, 16  ;;  %v2239_v4 = vsub.f32 1.0, %v2175_v21  ;;  %v2048_v61 = vand.u32 2147483648, %v9637_v41  ;;  %v2184_v48 = vmul.f32 1.25, %v2042_v10  ;;  %v2362_v25 = vpack.c.bf16 %v102_v19, %v101_v53  ;;  %v9648_v41 = vld [vmem:[#allocation38_spill] sm:$0xff]  ;;  %v9649_v21 = vld [vmem:[#allocation25_spill] sm:$0xff] }
 0x194   :  { %v1995_v20 = vmul.f32 %v9640_v42, %v9639_v28  ;;  %vm1996_vm1 = vcmp.eq.f32.partialorder %v9639_v28, inf  ;;  %vm1998_vm2 = vcmp.eq.f32.partialorder %v9639_v28, 0.0  ;;  %vm6717_vm3 = vmmov 0  }
 0x195   :  { %v2303_v32 = vmax.f32 %v2239_v4, 0.0  ;;  %v2049_v51 = vsel %vm2047_vm0, %v2048_v61, %v2046_v50  ;;  %v2248_v22 = vsub.f32 1.0, %v2184_v48  ;;  %6231 = vmatpush3.bf16.msra.mxu1 %v2362_v25  ;;  %6232 = vmatprep.mubr.msk.bf16.mxu1 %vm6717_vm3, %v9620_v7  ;;  %v1999_v34 = vand.u32 2147483648, %v9639_v28 }
 0x196   :  { %v2185_v56 = vmul.f32 1.25, %v2049_v51  ;;  %v1997_v31 = vsel %vm1996_vm1, %v9639_v28, %v1995_v20  ;;  %v2002_v16 = vmul.f32 %v9642_v54, %v9641_v44  ;;  %vm2003_vm4 = vcmp.eq.f32.partialorder %v9641_v44, inf  ;;  %6236 = vmatprep.subr.bf16.mxu1 %v9620_v7  ;;  %6208 = vmatprep.mubr.msk.bf16.mxu0 %vm6717_vm3, %v9620_v7 }
 0x197   :  { %v2346_v45 = vpack.c.bf16 %v2303_v32, %v2302_v15  ;;  %v2312_v5 = vmax.f32 %v2248_v22, 0.0  ;;  %v2000_v35 = vsel %vm1998_vm2, %v1999_v34, %v1997_v31  ;;  %vm2005_vm5 = vcmp.eq.f32.partialorder %v9641_v44, 0.0  ;;  %v9651_v32 = vld [vmem:[#allocation42_spill] sm:$0xff] }
 0x198   :  { %v2249_v30 = vsub.f32 1.0, %v2185_v56  ;;  %v2004_v58 = vsel %vm2003_vm4, %v9641_v44, %v2002_v16  ;;  %v2006_v40 = vand.u32 2147483648, %v9641_v44  ;;  %v2178_v8 = vmul.f32 1.25, %v2000_v35  ;;  %v9652_v34 = vld [vmem:[#allocation18_spill] sm:$0xff] }
 0x199   :  { %3591 = vxpose.xlu0.c.b16.start.end [1/1] (short) (narrow) %v2346_v45, 16  ;;  %v2065_v24 = vmul.f32 %v9644_v37, %v9643_v36  ;;  %vm2066_vm6 = vcmp.eq.f32.partialorder %v9643_v36, inf  ;;  %vm2068_vm7 = vcmp.eq.f32.partialorder %v9643_v36, 0.0  ;;  %v2069_v59 = vand.u32 2147483648, %v9643_v36  ;;  %v103_v45 = vld [vmem:[%s9501_s2 + $0x50] sm:$0xff] }
 0x19a   :  { %v2313_v3 = vmax.f32 %v2249_v30, 0.0  ;;  %v2007_v17 = vsel %vm2005_vm5, %v2006_v40, %v2004_v58  ;;  %v2242_v62 = vsub.f32 1.0, %v2178_v8  ;;  %v2072_v14 = vmul.f32 %v9646_v12, %v9645_v18 }
 0x19b   :  { %v2179_v6 = vmul.f32 1.25, %v2007_v17  ;;  %v2067_v13 = vsel %vm2066_vm6, %v9643_v36, %v2065_v24  ;;  %vm2073_vm8 = vcmp.eq.f32.partialorder %v9645_v18, inf  ;;  %vm2075_vm9 = vcmp.eq.f32.partialorder %v9645_v18, 0.0  ;;  %v9653_v24 = vld [vmem:[#allocation33_spill] sm:$0xff] }
 0x19c   :  { %v2351_v57 = vpack.c.bf16 %v2313_v3, %v2312_v5  ;;  %v2306_v49 = vmax.f32 %v2242_v62, 0.0  ;;  %v2070_v39 = vsel %vm2068_vm7, %v2069_v59, %v2067_v13  ;;  %v2074_v38 = vsel %vm2073_vm8, %v9645_v18, %v2072_v14  ;;  %v9654_v59 = vld [vmem:[#allocation43_spill] sm:$0xff] }
 0x19d   :  { %v2243_v52 = vsub.f32 1.0, %v2179_v6  ;;  %v2076_v43 = vand.u32 2147483648, %v9645_v18  ;;  %v2188_v11 = vmul.f32 1.25, %v2070_v39  ;;  %vm2406_vm10 = vcmask 130048  }
 0x19e   :  { %3891 = vxpose.xlu1.c.b16.start.end [1/1] (short) (narrow) %v2351_v57, 16  ;;  %6233 = vmatmul.mubr.msk.bf16.vlgmr.msra.gmra.mxu1 %vm2406_vm10, %v2639_v27  ;;  %v2023_v29 = vmul.f32 %v9648_v41, %v9647_v46  ;;  %vm2024_vm11 = vcmp.eq.f32.partialorder %v9647_v46, inf  ;;  %vm2026_vm12 = vcmp.eq.f32.partialorder %v9647_v46, 0.0  ;;  %v2027_v60 = vand.u32 2147483648, %v9647_v46  ;;  %v2699_v27 = vpop.trf.xlu1  ;;  %v9655_v57 = vld [vmem:[#allocation30_spill] sm:$0xff] }
 0x19f   :  { %v2307_v53 = vmax.f32 %v2243_v52, 0.0  ;;  %v2077_v19 = vsel %vm2075_vm9, %v2076_v43, %v2074_v38  ;;  %v2252_v23 = vsub.f32 1.0, %v2188_v11  ;;  %v2030_v15 = vmul.f32 %v9650_v55, %v9649_v21  ;;  %6238 = vmatprep.mubr.msk.bf16.mxu1 %vm6717_vm3, %v9620_v7 }
 0x1a0   :  { %v2189_v10 = vmul.f32 1.25, %v2077_v19  ;;  %v2025_v50 = vsel %vm2024_vm11, %v9647_v46, %v2023_v29  ;;  %vm2031_vm13 = vcmp.eq.f32.partialorder %v9649_v21, inf  ;;  %vm2033_vm14 = vcmp.eq.f32.partialorder %v9649_v21, 0.0  ;;  %v9657_v29 = vld [vmem:[#allocation39_spill] sm:$0xff] }
 0x1a1   :  { %v2348_v4 = vpack.c.bf16 %v2307_v53, %v2306_v49  ;;  %v2316_v61 = vmax.f32 %v2252_v23, 0.0  ;;  %v2028_v48 = vsel %vm2026_vm12, %v2027_v60, %v2025_v50  ;;  %v2032_v25 = vsel %vm2031_vm13, %v9649_v21, %v2030_v15  ;;  %v9656_v49 = vld [vmem:[#allocation10_spill] sm:$0xff] }
 0x1a2   :  { %v2253_v28 = vsub.f32 1.0, %v2189_v10  ;;  %v2034_v42 = vand.u32 2147483648, %v9649_v21  ;;  %v2182_v20 = vmul.f32 1.25, %v2028_v48  ;;  %v2093_v51 = vmul.f32 %v8118_v1, %v9651_v32  ;;  %v104_v1 = vld [vmem:[%s9501_s2 + $0x58] sm:$0xff]  ;;  %v9658_v10 = vld [vmem:[#allocation37_spill] sm:$0xff] }
 0x1a3   :  { %3711 = vxpose.xlu0.c.b16.start.end [1/1] (short) (narrow) %v2348_v4, 16  ;;  %vm2094_vm15 = vcmp.eq.f32.partialorder %v9651_v32, inf  ;;  %vm2096_vm0 = vcmp.eq.f32.partialorder %v9651_v32, 0.0  ;;  %v2097_v22 = vand.u32 2147483648, %v9651_v32  ;;  %v2100_v56 = vmul.f32 %v8110_v0, %v9652_v34  ;;  %v106_v4 = vld [vmem:[%s9501_s2 + $0x68] sm:$0xff] }
 0x1a4   :  { %v2317_v31 = vmax.f32 %v2253_v28, 0.0  ;;  %v2035_v44 = vsel %vm2033_vm14, %v2034_v42, %v2032_v25  ;;  %v2246_v54 = vsub.f32 1.0, %v2182_v20  ;;  %v2095_v16 = vsel %vm2094_vm15, %v9651_v32, %v2093_v51 }
 0x1a5   :  { %v2183_v5 = vmul.f32 1.25, %v2035_v44  ;;  %v2098_v35 = vsel %vm2096_vm0, %v2097_v22, %v2095_v16  ;;  %vm2101_vm1 = vcmp.eq.f32.partialorder %v9652_v34, inf  ;;  %vm2103_vm2 = vcmp.eq.f32.partialorder %v9652_v34, 0.0 }
 0x1a6   :  { %v2353_v0 = vpack.c.bf16 %v2317_v31, %v2316_v61  ;;  %v2310_v30 = vmax.f32 %v2246_v54, 0.0  ;;  %v2102_v58 = vsel %vm2101_vm1, %v9652_v34, %v2100_v56  ;;  %v2104_v40 = vand.u32 2147483648, %v9652_v34  ;;  %v2759_v54 = vpop.trf.xlu0 }
 0x1a7   :  { %v2247_v8 = vsub.f32 1.0, %v2183_v5  ;;  %v2192_v36 = vmul.f32 1.25, %v2098_v35  ;;  %v2363_v37 = vpack.c.bf16 %v104_v1, %v103_v45  ;;  %v2051_v3 = vmul.f32 %v9654_v59, %v9653_v24  ;;  %v108_v1 = vld [vmem:[%s9501_s2 + $0x78] sm:$0xff] }
 0x1a8   :  { %4011 = vxpose.xlu1.c.b16.start.end [1/1] (short) (narrow) %v2353_v0, 16  ;;  %v2105_v17 = vsel %vm2103_vm2, %v2104_v40, %v2102_v58  ;;  %vm2052_vm4 = vcmp.eq.f32.partialorder %v9653_v24, inf  ;;  %vm2054_vm5 = vcmp.eq.f32.partialorder %v9653_v24, 0.0  ;;  %v2055_v62 = vand.u32 2147483648, %v9653_v24 }
 0x1a9   :  { %v2311_v18 = vmax.f32 %v2247_v8, 0.0  ;;  %v2193_v12 = vmul.f32 1.25, %v2105_v17  ;;  %v2256_v14 = vsub.f32 1.0, %v2192_v36  ;;  %6237 = vmatpush3.bf16.msra.mxu1 %v2363_v37  ;;  %v2053_v6 = vsel %vm2052_vm4, %v9653_v24, %v2051_v3  ;;  %v6205_v8 = vpop.f32.mrf.mxu0  ;;  %v2819_v3 = vpop.trf.xlu1  ;;  %v109_v17 = vld [vmem:[%s9501_s2 + $0x80] sm:$0xff] }
 0x1aa   :  { %v2056_v13 = vsel %vm2054_vm5, %v2055_v62, %v2053_v6  ;;  %v2058_v39 = vmul.f32 %v9656_v49, %v9655_v57  ;;  %vm2059_vm6 = vcmp.eq.f32.partialorder %v9655_v57, inf  ;;  %vm2061_vm7 = vcmp.eq.f32.partialorder %v9655_v57, 0.0  ;;  %6242 = vmatprep.subr.bf16.mxu1 %v9620_v7 }
 0x1ab   :  { %v2350_v38 = vpack.c.bf16 %v2311_v18, %v2310_v30  ;;  %v2257_v52 = vsub.f32 1.0, %v2193_v12  ;;  %v2320_v43 = vmax.f32 %v2256_v14, 0.0  ;;  %v2062_v11 = vand.u32 2147483648, %v9655_v57  ;;  %v2939_v14 = vpop.trf.xlu0 }
 0x1ac   :  { %v2060_v46 = vsel %vm2059_vm6, %v9655_v57, %v2058_v39  ;;  %v2186_v41 = vmul.f32 1.25, %v2056_v13  ;;  %6239 = vmatmul.mubr.msk.bf16.vlgmr.msra.gmra.mxu1 %vm2406_vm10, %v2699_v27  ;;  %v2079_v60 = vmul.f32 %v8083_v47, %v9657_v29  ;;  %vm2080_vm8 = vcmp.eq.f32.partialorder %v9657_v29, inf  ;;  %v105_v47 = vld [vmem:[%s9501_s2 + $0x60] sm:$0xff]  ;;  %v1159_v27 = vpop.f32.mrf.mxu0 }
 0x1ad   :  { %3831 = vxpose.xlu0.c.b16.start.end [1/1] (short) (narrow) %v2350_v38, 16  ;;  %v2321_v53 = vmax.f32 %v2257_v52, 0.0  ;;  %v2063_v19 = vsel %vm2061_vm7, %v2062_v11, %v2060_v46  ;;  %vm2082_vm9 = vcmp.eq.f32.partialorder %v9657_v29, 0.0  ;;  %v2083_v23 = vand.u32 2147483648, %v9657_v29  ;;  %6244 = vmatprep.mubr.msk.bf16.mxu1 %vm6717_vm3, %v9620_v7  ;;  %v2879_v57 = vpop.trf.xlu1  ;;  %v6692_v52 = vld [vmem:[%s9503_s4] ss:$0 sm:$0xff] }
 0x1ae   :  { %v2187_v21 = vmul.f32 1.25, %v2063_v19  ;;  %v2250_v55 = vsub.f32 1.0, %v2186_v41  ;;  %v2081_v15 = vsel %vm2080_vm8, %v9657_v29, %v2079_v60  ;;  %v2086_v50 = vmul.f32 %v8075_v63, %v9658_v10  ;;  %v111_v11 = vld [vmem:[%s9501_s2 + $0x90] sm:$0xff]  ;;  %v112_v46 = vld [vmem:[%s9501_s2 + $0x98] sm:$0xff] }
 0x1af   :  { %v2355_v61 = vpack.c.bf16 %v2321_v53, %v2320_v43  ;;  %v2084_v48 = vsel %vm2082_vm9, %v2083_v23, %v2081_v15  ;;  %vm2087_vm11 = vcmp.eq.f32.partialorder %v9658_v10, inf  ;;  %vm2089_vm12 = vcmp.eq.f32.partialorder %v9658_v10, 0.0  ;;  %v95_v15 = vld [vmem:[%s9501_s2 + $0x10] sm:$0xff] }
 0x1b0   :  { %v2251_v25 = vsub.f32 1.0, %v2187_v21  ;;  %v2314_v28 = vmax.f32 %v2250_v55, 0.0  ;;  %v2088_v42 = vsel %vm2087_vm11, %v9658_v10, %v2086_v50  ;;  %v2090_v63 = vand.u32 2147483648, %v9658_v10  ;;  %v96_v10 = vld [vmem:[%s9501_s2 + $0x18] sm:$0xff] }
 0x1b1   :  { %4131 = vxpose.xlu1.c.b16.start.end [1/1] (short) (narrow) %v2355_v61, 16  ;;  %v2190_v20 = vmul.f32 1.25, %v2084_v48  ;;  %v2364_v32 = vpack.c.bf16 %v106_v4, %v105_v47  ;;  %v2107_v51 = vmul.f32 %v8170_v26, %v8091_v2  ;;  %vm2108_vm13 = vcmp.eq.f32.partialorder %v8091_v2, inf  ;;  %v107_v26 = vld [vmem:[%s9501_s2 + $0x70] sm:$0xff]  ;;  %v2999_v41 = vpop.trf.xlu1  ;;  %v113_v47 = vld [vmem:[%s9501_s2 + $0xa0] sm:$0xff]  ;;  %v114_v4 = vld [vmem:[%s9501_s2 + $0xa8] sm:$0xff] }
 0x1b2   :  { %v2315_v22 = vmax.f32 %v2251_v25, 0.0  ;;  %v2091_v34 = vsel %vm2089_vm12, %v2090_v63, %v2088_v42  ;;  %vm2110_vm14 = vcmp.eq.f32.partialorder %v8091_v2, 0.0  ;;  %v2111_v56 = vand.u32 2147483648, %v8091_v2 }
 0x1b3   :  { %v2191_v31 = vmul.f32 1.25, %v2091_v34  ;;  %v2254_v44 = vsub.f32 1.0, %v2190_v20  ;;  %6243 = vmatpush3.bf16.msra.mxu1 %v2364_v32  ;;  %v2109_v16 = vsel %vm2108_vm13, %v8091_v2, %v2107_v51  ;;  %v2114_v45 = vmul.f32 %v8166_v9, %v8089_v33  ;;  %v97_v20 = vld [vmem:[%s9501_s2 + $0x20] sm:$0xff]  ;;  %v98_v32 = vld [vmem:[%s9501_s2 + $0x28] sm:$0xff]  ;;  %v115_v51 = vld [vmem:[%s9501_s2 + $0xb0] sm:$0xff] }
 0x1b4   :  { %v2352_v5 = vpack.c.bf16 %v2315_v22, %v2314_v28  ;;  %v2112_v35 = vsel %vm2110_vm14, %v2111_v56, %v2109_v16  ;;  %vm2115_vm15 = vcmp.eq.f32.partialorder %v8089_v33, inf  ;;  %vm2117_vm0 = vcmp.eq.f32.partialorder %v8089_v33, 0.0  ;;  %6248 = vmatprep.subr.bf16.mxu1 %v9620_v7  ;;  %v116_v22 = vld [vmem:[%s9501_s2 + $0xb8] sm:$0xff] }
 0x1b5   :  { %v2255_v2 = vsub.f32 1.0, %v2191_v31  ;;  %v2318_v0 = vmax.f32 %v2254_v44, 0.0  ;;  %v2116_v9 = vsel %vm2115_vm15, %v8089_v33, %v2114_v45  ;;  %v2118_v30 = vand.u32 2147483648, %v8089_v33  ;;  %v110_v33 = vld [vmem:[%s9501_s2 + $0x88] sm:$0xff]  ;;  %v99_v45 = vld [vmem:[%s9501_s2 + $0x30] sm:$0xff] }
 0x1b6   :  { %3951 = vxpose.xlu0.c.b16.start.end [1/1] (short) (narrow) %v2352_v5, 16  ;;  %v2194_v58 = vmul.f32 1.25, %v2112_v35  ;;  %6245 = vmatmul.mubr.msk.bf16.vlgmr.msra.gmra.mxu1 %vm2406_vm10, %v2759_v54  ;;  %v2365_v40 = vpack.c.bf16 %v108_v1, %v107_v26  ;;  %v2366_v6 = vpack.c.bf16 %v110_v33, %v109_v17  ;;  %v1556_v49 = vmul.f32 2.0, %v1159_v27  ;;  %v100_v26 = vld [vmem:[%s9501_s2 + $0x38] sm:$0xff]  ;;  %v127_v17 = vld [vmem:[%s9501_s2 + $0x110] sm:$0xff] }
 0x1b7   :  { %v2319_v36 = vmax.f32 %v2255_v2, 0.0  ;;  %v2119_v37 = vsel %vm2117_vm0, %v2118_v30, %v2116_v9  ;;  %6250 = vmatprep.mubr.msk.bf16.mxu1 %vm6717_vm3, %v9620_v7  ;;  %v2367_v60 = vpack.c.bf16 %v112_v46, %v111_v11  ;;  %v1557_v21 = vmul.f32 2.0, %v6205_v8  ;;  %v117_v2 = vld [vmem:[%s9501_s2 + $0xc0] sm:$0xff]  ;;  %v128_v33 = vld [vmem:[%s9501_s2 + $0x118] sm:$0xff]  ;;  %v122_v46 = vld [vmem:[%s9501_s2 + $0xe8] sm:$0xff] }
 0x1b8   :  { %v2195_v24 = vmul.f32 1.25, %v2119_v37  ;;  %v2258_v59 = vsub.f32 1.0, %v2194_v58  ;;  %6249 = vmatpush3.bf16.msra.mxu1 %v2365_v40  ;;  %v2359_v48 = vpack.c.bf16 %v96_v10, %v95_v15  ;;  %v2368_v42 = vpack.c.bf16 %v114_v4, %v113_v47  ;;  %v121_v11 = vld [vmem:[%s9501_s2 + $0xe0] sm:$0xff]  ;;  %v140_v47 = vld [vmem:[%s9501_s2 + $0x178] sm:$0xff] }
 0x1b9   :  { %v2354_v62 = vpack.c.bf16 %v2319_v36, %v2318_v0  ;;  %6254 = vmatprep.subr.bf16.mxu1 %v9620_v7  ;;  %v2360_v34 = vpack.c.bf16 %v98_v32, %v97_v20  ;;  %v2369_v44 = vpack.c.bf16 %v116_v22, %v115_v51  ;;  %v118_v0 = vld [vmem:[%s9501_s2 + $0xc8] sm:$0xff]  ;;  %v2361_v30 = vpack.c.bf16 %v100_v26, %v99_v45  ;;  %v125_v4 = vld [vmem:[%s9501_s2 + $0x100] sm:$0xff] }
 0x1ba   :  { %v2259_v18 = vsub.f32 1.0, %v2195_v24  ;;  %v2322_v12 = vmax.f32 %v2258_v59, 0.0  ;;  %v1420_v38 = vpop.xlane.xlu0 %1419  ;;  %v2370_v36 = vpack.c.bf16 %v118_v0, %v117_v2  ;;  %v129_v20 = vld [vmem:[%s9501_s2 + $0x120] sm:$0xff]  ;;  %v130_v32 = vld [vmem:[%s9501_s2 + $0x128] sm:$0xff]  ;;  %v152_v2 = vld [vmem:[%s9501_s2 + $0x1d8] sm:$0xff]  ;;  %vm5612_vm6 = vcmask 392192  }
 0x1bb   :  { %4071 = vxpose.xlu0.c.b16.start.end [1/1] (short) (narrow) %v2354_v62, 16  ;;  %v1492_v43 = vadd.f32 %v6692_v52, %v1420_v38  ;;  %v137_v0 = vld [vmem:[%s9501_s2 + $0x160] sm:$0xff]  ;;  %vm5617_vm7 = vcmask 523264   ;;  %vm5622_vm8 = vcmask 654336   ;;  %vm5627_vm9 = vcmask 785408  }
 0x1bc   :  { %v2323_v13 = vmax.f32 %v2259_v18, 0.0  ;;  %v119_v18 = vld [vmem:[%s9501_s2 + $0xd0] sm:$0xff]  ;;  %vm5632_vm11 = vcmask 916480  }
 0x1bd   :  { %v1620_v29 = vsub.f32 %v1492_v43, %v1556_v49  ;;  %v132_v43 = vld [vmem:[%s9501_s2 + $0x138] sm:$0xff] }
 0x1be   :  { %v2356_v39 = vpack.c.bf16 %v2323_v13, %v2322_v12  ;;  %6251 = vmatmul.mubr.msk.bf16.vlgmr.msra.gmra.mxu1 %vm2406_vm10, %v2819_v3  ;;  %v120_v12 = vld [vmem:[%s9501_s2 + $0xd8] sm:$0xff] }
 0x1bf   :  { %6255 = vmatpush3.bf16.msra.mxu1 %v2366_v6  ;;  %6256 = vmatprep.mubr.msk.bf16.mxu1 %vm6717_vm3, %v9620_v7  ;;  %v1684_v53 = vmax.f32 %v1620_v29, 0.0  ;;  %v1423_v19 = vpop.xlane.xlu1 %1422  ;;  %v2375_v6 = vpack.c.bf16 %v128_v33, %v127_v17  ;;  %v2371_v49 = vpack.c.bf16 %v120_v12, %v119_v18  ;;  %v145_v18 = vld [vmem:[%s9501_s2 + $0x1a0] sm:$0xff]  ;;  %v146_v12 = vld [vmem:[%s9501_s2 + $0x1a8] sm:$0xff] }
 0x1c0   :  { %4191 = vxpose.xlu0.c.b16.start.end [1/1] (short) (narrow) %v2356_v39, 16  ;;  %6260 = vmatprep.subr.bf16.mxu1 %v9620_v7  ;;  %v1493_v55 = vadd.f32 %v6692_v52, %v1423_v19  ;;  %v131_v52 = vld [vmem:[%s9501_s2 + $0x130] sm:$0xff]  ;;  %v136_v19 = vld [vmem:[%s9501_s2 + $0x158] sm:$0xff] }
 0x1c1   :  { %6687 = vrsqrt.f32 %v1684_v53  ;;  %vm2122_vm1 = vcmp.eq.f32.partialorder %v1684_v53, inf  ;;  %v2125_v16 = vand.u32 2147483648, %v1684_v53  ;;  %vm2124_vm2 = vcmp.eq.f32.partialorder %v1684_v53, 0.0 }
 0x1c2   :  { %v1621_v50 = vsub.f32 %v1493_v55, %v1557_v21  ;;  %v2377_v29 = vpack.c.bf16 %v132_v43, %v131_v52  ;;  %v124_v21 = vld [vmem:[%s9501_s2 + $0xf8] sm:$0xff] }
 0x1c4   :  { %v8414_v23 = vpop.trf.xlu0  ;;  %v1685_v25 = vmax.f32 %v1621_v50, 0.0  ;;  %v139_v50 = vld [vmem:[%s9501_s2 + $0x170] sm:$0xff] }
 0x1c6   :  { %6257 = vmatmul.mubr.msk.bf16.vlgmr.msra.gmra.mxu1 %vm2406_vm10, %v2879_v57  ;;  %6689 = vrsqrt.f32 %v1685_v25  ;;  %vm2129_vm4 = vcmp.eq.f32.partialorder %v1685_v25, inf  ;;  %v2132_v8 = vand.u32 2147483648, %v1685_v25  ;;  %vm2131_vm5 = vcmp.eq.f32.partialorder %v1685_v25, 0.0 }
 0x1c7   :  { %6261 = vmatpush3.bf16.msra.mxu1 %v2367_v60  ;;  %6262 = vmatprep.mubr.msk.bf16.mxu1 %vm6717_vm3, %v9620_v7  ;;  %v2372_v60 = vpack.c.bf16 %v122_v46, %v121_v11 }
 0x1c8   :  { %6266 = vmatprep.subr.bf16.mxu1 %v9620_v7 }
 0x1c9   :  { %v8432_v61 = vpop.trf.xlu0 }
 0x1cb   :  { %v2398_v28 = vpop.trf.xlu1 }
 0x1cc   :  { %6209 = vmatmul.mubr.msk.bf16.vlgmr.msra.gmra.mxu0 %vm2406_vm10, %v2398_v28 }
 0x1cd   :  { %6213 = vmatpush3.bf16.msra.mxu0 %v2359_v48  ;;  %6214 = vmatprep.mubr.msk.bf16.mxu0 %vm6717_vm3, %v9620_v7  ;;  %v2459_v63 = vpop.trf.xlu0 }
 0x1ce   :  { %6218 = vmatprep.subr.bf16.mxu0 %v9620_v7  ;;  %6263 = vmatmul.mubr.msk.bf16.vlgmr.msra.gmra.mxu1 %vm2406_vm10, %v2939_v14  ;;  %v6688_v56 = vpop.eup %6687 }
 0x1cf   :  { %6267 = vmatpush3.bf16.msra.mxu1 %v2368_v42  ;;  %6268 = vmatprep.mubr.msk.bf16.mxu1 %vm6717_vm3, %v9620_v7  ;;  %v2121_v54 = vmul.f32 %v6688_v56, %v1684_v53  ;;  %v3239_v14 = vpop.trf.xlu1  ;;  %v143_v42 = vld [vmem:[%s9501_s2 + $0x190] sm:$0xff]  ;;  %v2376_v56 = vpack.c.bf16 %v130_v32, %v129_v20 }
 0x1d0   :  { %6272 = vmatprep.subr.bf16.mxu1 %v9620_v7 }
 0x1d1   :  { %v8454_v31 = vpop.trf.xlu0  ;;  %v2123_v1 = vsel %vm2122_vm1, %v1684_v53, %v2121_v54  ;;  %v135_v53 = vld [vmem:[%s9501_s2 + $0x150] sm:$0xff]  ;;  %v133_v54 = vld [vmem:[%s9501_s2 + $0x140] sm:$0xff] }
 0x1d2   :  { %v2126_v5 = vsel %vm2124_vm2, %v2125_v16, %v2123_v1  ;;  %v2379_v15 = vpack.c.bf16 %v136_v19, %v135_v53  ;;  %v134_v16 = vld [vmem:[%s9501_s2 + $0x148] sm:$0xff] }
 0x1d3   :  { %v6690_v35 = vpop.eup %6689  ;;  %v2196_v40 = vmul.f32 1.25, %v2126_v5  ;;  %v3299_v38 = vpop.trf.xlu1  ;;  %v2378_v5 = vpack.c.bf16 %v134_v16, %v133_v54 }
 0x1d4   :  { %6215 = vmatmul.mubr.msk.bf16.vlgmr.msra.gmra.mxu0 %vm2406_vm10, %v2459_v63  ;;  %v2128_v58 = vmul.f32 %v6690_v35, %v1685_v25  ;;  %v144_v63 = vld [vmem:[%s9501_s2 + $0x198] sm:$0xff]  ;;  %v151_v35 = vld [vmem:[%s9501_s2 + $0x1d0] sm:$0xff] }
 0x1d5   :  { %6219 = vmatpush3.bf16.msra.mxu0 %v2360_v34  ;;  %6220 = vmatprep.mubr.msk.bf16.mxu0 %vm6717_vm3, %v9620_v7  ;;  %v2260_v3 = vsub.f32 1.0, %v2196_v40  ;;  %v2383_v22 = vpack.c.bf16 %v144_v63, %v143_v42 }
 0x1d6   :  { %6224 = vmatprep.subr.bf16.mxu0 %v9620_v7  ;;  %6269 = vmatmul.mubr.msk.bf16.vlgmr.msra.gmra.mxu1 %vm2406_vm10, %v2999_v41  ;;  %v2519_v9 = vpop.trf.xlu0  ;;  %v2130_v37 = vsel %vm2129_vm4, %v1685_v25, %v2128_v58  ;;  %v2381_v25 = vpack.c.bf16 %v140_v47, %v139_v50  ;;  %v2387_v58 = vpack.c.bf16 %v152_v2, %v151_v35 }
 0x1d7   :  { %6273 = vmatpush3.bf16.msra.mxu1 %v2369_v44  ;;  %6274 = vmatprep.mubr.msk.bf16.mxu1 %vm6717_vm3, %v9620_v7  ;;  %v2133_v24 = vsel %vm2131_vm5, %v2132_v8, %v2130_v37  ;;  %v2324_v13 = vmax.f32 %v2260_v3, 0.0  ;;  %v148_v44 = vld [vmem:[%s9501_s2 + $0x1b8] sm:$0xff] }
 0x1d8   :  { %6278 = vmatprep.subr.bf16.mxu1 %v9620_v7  ;;  %v2197_v59 = vmul.f32 1.25, %v2133_v24  ;;  %v156_v37 = vld [vmem:[%s9501_s2 + $0x1f8] sm:$0xff]  ;;  %v141_v24 = vld [vmem:[%s9501_s2 + $0x180] sm:$0xff] }
 0x1d9   :  { %v3419_v41 = vpop.trf.xlu1 }
 0x1da   :  { %v2261_v62 = vsub.f32 1.0, %v2197_v59  ;;  %v142_v59 = vld [vmem:[%s9501_s2 + $0x188] sm:$0xff] }
 0x1dc   :  { %6221 = vmatmul.mubr.msk.bf16.vlgmr.msra.gmra.mxu0 %vm2406_vm10, %v2519_v9  ;;  %v2325_v57 = vmax.f32 %v2261_v62, 0.0  ;;  %v138_v9 = vld [vmem:[%s9501_s2 + $0x168] sm:$0xff]  ;;  %v2382_v62 = vpack.c.bf16 %v142_v59, %v141_v24 }
 0x1dd   :  { %6225 = vmatpush3.bf16.msra.mxu0 %v2361_v30  ;;  %6226 = vmatprep.mubr.msk.bf16.mxu0 %vm6717_vm3, %v9620_v7  ;;  %v2380_v8 = vpack.c.bf16 %v138_v9, %v137_v0 }
 0x1de   :  { %6308 = vmatprep.subr.bf16.mxu0 %v9620_v7  ;;  %6275 = vmatmul.mubr.msk.bf16.vlgmr.msra.gmra.mxu1 %vm2406_vm10, %v8414_v23  ;;  %v2579_v27 = vpop.trf.xlu0  ;;  %v2357_v39 = vpack.c.bf16 %v2325_v57, %v2324_v13  ;;  %v123_v23 = vld [vmem:[%s9501_s2 + $0xf0] sm:$0xff]  ;;  %v150_v13 = vld [vmem:[%s9501_s2 + $0x1c8] sm:$0xff] }
 0x1df   :  { %6279 = vmatpush3.bf16.msra.mxu1 %v2370_v36  ;;  %6280 = vmatprep.mubr.msk.bf16.mxu1 %vm6717_vm3, %v9620_v7  ;;  %v2373_v10 = vpack.c.bf16 %v124_v21, %v123_v23  ;;  %v155_v36 = vld [vmem:[%s9501_s2 + $0x1f0] sm:$0xff] }
 0x1e0   :  { %6284 = vmatprep.subr.bf16.mxu1 %v9620_v7  ;;  %4251 = vxpose.xlu1.c.b16.start.end [1/1] (short) (narrow) %v2357_v39, 16  ;;  %v2389_v17 = vpack.c.bf16 %v156_v37, %v155_v36  ;;  %v153_v39 = vld [vmem:[%s9501_s2 + $0x1e0] sm:$0xff] }
 0x1e3   :  { %v3539_v55 = vpop.trf.xlu1 }
 0x1e4   :  { %6227 = vmatmul.mubr.msk.bf16.vlgmr.msra.gmra.mxu0 %vm2406_vm10, %v2579_v27  ;;  %v2384_v27 = vpack.c.bf16 %v146_v12, %v145_v18 }
 0x1e5   :  { %6309 = vmatpush3.bf16.msra.mxu0 %v2375_v6  ;;  %6310 = vmatprep.mubr.msk.bf16.mxu0 %vm6717_vm3, %v9620_v7  ;;  %v149_v6 = vld [vmem:[%s9501_s2 + $0x1c0] sm:$0xff] }
 0x1e6   :  { %6320 = vmatprep.subr.bf16.mxu0 %v9620_v7  ;;  %6281 = vmatmul.mubr.msk.bf16.vlgmr.msra.gmra.mxu1 %vm2406_vm10, %v8432_v61  ;;  %v126_v61 = vld [vmem:[%s9501_s2 + $0x108] sm:$0xff] }
 0x1e7   :  { %6285 = vmatpush3.bf16.msra.mxu1 %v2371_v49  ;;  %6286 = vmatprep.mubr.msk.bf16.mxu1 %vm6717_vm3, %v9620_v7  ;;  %v2374_v28 = vpack.c.bf16 %v126_v61, %v125_v4  ;;  %v2386_v49 = vpack.c.bf16 %v150_v13, %v149_v6  ;;  %v6548_v13 = vld [vmem:[%s9504_s5 + $0x38] sm:$0xff]  }
 0x1e8   :  { %6290 = vmatprep.subr.bf16.mxu1 %v9620_v7  ;;  %v3359_v34 = vpop.trf.xlu0 }
 0x1ec   :  { %6311 = vmatmul.mubr.msk.bf16.vlgmr.msra.gmra.mxu0 %vm2406_vm10, %v3419_v41 }
 0x1ed   :  { %6321 = vmatpush3.bf16.msra.mxu0 %v2377_v29  ;;  %6322 = vmatprep.mubr.msk.bf16.mxu0 %vm6717_vm3, %v9620_v7  ;;  %v3659_v48 = vpop.trf.xlu1 }
 0x1ee   :  { %6332 = vmatprep.subr.bf16.mxu0 %v9620_v7  ;;  %6287 = vmatmul.mubr.msk.bf16.vlgmr.msra.gmra.mxu1 %vm2406_vm10, %v8454_v31  ;;  %v147_v31 = vld [vmem:[%s9501_s2 + $0x1b0] sm:$0xff] }
 0x1ef   :  { %6291 = vmatpush3.bf16.msra.mxu1 %v2372_v60  ;;  %6292 = vmatprep.mubr.msk.bf16.mxu1 %vm6717_vm3, %v9620_v7  ;;  %v2385_v26 = vpack.c.bf16 %v148_v44, %v147_v31 }
 0x1f0   :  { %6296 = vmatprep.subr.bf16.mxu1 %v9620_v7 }
 0x1f1   :  { %v3479_v1 = vpop.trf.xlu0 }
 0x1f4   :  { %6323 = vmatmul.mubr.msk.bf16.vlgmr.msra.gmra.mxu0 %vm2406_vm10, %v3539_v55 }
 0x1f5   :  { %6333 = vmatpush3.bf16.msra.mxu0 %v2379_v15  ;;  %6334 = vmatprep.mubr.msk.bf16.mxu0 %vm6717_vm3, %v9620_v7  ;;  %v3779_v51 = vpop.trf.xlu1  ;;  %v6718_v15 = vmov 1983009808  }
 0x1f6   :  { %6344 = vmatprep.subr.bf16.mxu0 %v9620_v7  ;;  %6293 = vmatmul.mubr.msk.bf16.vlgmr.msra.gmra.mxu1 %vm2406_vm10, %v3239_v14 }
 0x1f7   :  { %6297 = vmatpush3.bf16.msra.mxu1 %v2373_v10  ;;  %6298 = vmatprep.mubr.msk.bf16.mxu1 %vm6717_vm3, %v9620_v7  ;;  %v4314_v10 = vunpack.c.l.s4 %v6718_v15 }
 0x1f8   :  { %6302 = vmatprep.subr.bf16.mxu1 %v9620_v7 }
 0x1f9   :  { %v4315_v47 = vunpack.c.0.s8 %v4314_v10  ;;  %v6720_v10 = vmov 1934713408  }
 0x1fb   :  { %v3599_v40 = vpop.trf.xlu0 }
 0x1fc   :  { %6335 = vmatmul.mubr.msk.bf16.vlgmr.msra.gmra.mxu0 %vm2406_vm10, %v3659_v48 }
 0x1fd   :  { %6345 = vmatpush3.bf16.msra.mxu0 %v2381_v25  ;;  %6346 = vmatprep.mubr.msk.bf16.mxu0 %vm6717_vm3, %v9620_v7  ;;  %v9659_v25 = vld [vmem:[#allocation5_spill] sm:$0xff] }
 0x1fe   :  { %6356 = vmatprep.subr.bf16.mxu0 %v9620_v7  ;;  %6299 = vmatmul.mubr.msk.bf16.vlgmr.msra.gmra.mxu1 %vm2406_vm10, %v3299_v38  ;;  %v154_v38 = vld [vmem:[%s9501_s2 + $0x1e8] sm:$0xff]  ;;  %s6724_s2 = smov 64  }
 0x1ff   :  { %6303 = vmatpush3.bf16.msra.mxu1 %v2374_v28  ;;  %6304 = vmatprep.mubr.msk.bf16.mxu1 %vm6717_vm3, %v9620_v7  ;;  %v2388_v43 = vpack.c.bf16 %v154_v38, %v153_v39  ;;  %v8678_v28 = vsub.s32 %v4315_v47, %v9659_v25 }
 0x200   :  { %6314 = vmatprep.subr.bf16.mxu1 %v9620_v7  ;;  %v3899_v45 = vpop.trf.xlu1 }
 0x204   :  { %6347 = vmatmul.mubr.msk.bf16.vlgmr.msra.gmra.mxu0 %vm2406_vm10, %v3779_v51 }
 0x205   :  { %6357 = vmatpush3.bf16.msra.mxu0 %v2383_v22  ;;  %6358 = vmatprep.mubr.msk.bf16.mxu0 %vm6717_vm3, %v9620_v7  ;;  %v3719_v33 = vpop.trf.xlu0 }
 0x206   :  { %6368 = vmatprep.subr.bf16.mxu0 %v9620_v7  ;;  %6305 = vmatmul.mubr.msk.bf16.vlgmr.msra.gmra.mxu1 %vm2406_vm10, %v3359_v34 }
 0x207   :  { %6315 = vmatpush3.bf16.msra.mxu1 %v2376_v56  ;;  %6316 = vmatprep.mubr.msk.bf16.mxu1 %vm6717_vm3, %v9620_v7 }
 0x208   :  { %6326 = vmatprep.subr.bf16.mxu1 %v9620_v7 }
 0x20a   :  { %v4019_v30 = vpop.trf.xlu1 }
 0x20c   :  { %6359 = vmatmul.mubr.msk.bf16.vlgmr.msra.gmra.mxu0 %vm2406_vm10, %v3899_v45 }
 0x20d   :  { %6369 = vmatpush3.bf16.msra.mxu0 %v2385_v26  ;;  %6370 = vmatprep.mubr.msk.bf16.mxu0 %vm6717_vm3, %v9620_v7 }
 0x20e   :  { %6380 = vmatprep.subr.bf16.mxu0 %v9620_v7  ;;  %6317 = vmatmul.mubr.msk.bf16.vlgmr.msra.gmra.mxu1 %vm2406_vm10, %v3479_v1 }
 0x20f   :  { %6327 = vmatpush3.bf16.msra.mxu1 %v2378_v5  ;;  %6328 = vmatprep.mubr.msk.bf16.mxu1 %vm6717_vm3, %v9620_v7  ;;  %v3839_v14 = vpop.trf.xlu0 }
 0x210   :  { %6338 = vmatprep.subr.bf16.mxu1 %v9620_v7 }
 0x213   :  { %v4139_v3 = vpop.trf.xlu1 }
 0x214   :  { %6371 = vmatmul.mubr.msk.bf16.vlgmr.msra.gmra.mxu0 %vm2406_vm10, %v4019_v30 }
 0x215   :  { %6381 = vmatpush3.bf16.msra.mxu0 %v2387_v58  ;;  %6382 = vmatprep.mubr.msk.bf16.mxu0 %vm6717_vm3, %v9620_v7 }
 0x216   :  { %6392 = vmatprep.subr.bf16.mxu0 %v9620_v7  ;;  %6329 = vmatmul.mubr.msk.bf16.vlgmr.msra.gmra.mxu1 %vm2406_vm10, %v3599_v40 }
 0x217   :  { %6339 = vmatpush3.bf16.msra.mxu1 %v2380_v8  ;;  %6340 = vmatprep.mubr.msk.bf16.mxu1 %vm6717_vm3, %v9620_v7 }
 0x218   :  { %6350 = vmatprep.subr.bf16.mxu1 %v9620_v7  ;;  %v3959_v57 = vpop.trf.xlu0 }
 0x21c   :  { %6383 = vmatmul.mubr.msk.bf16.vlgmr.msra.gmra.mxu0 %vm2406_vm10, %v4139_v3 }
 0x21d   :  { %6393 = vmatpush3.bf16.msra.mxu0 %v2389_v17  ;;  %6394 = vmatprep.mubr.msk.bf16.mxu0 %vm6717_vm3, %v9620_v7  ;;  %v4079_v52 = vpop.trf.xlu0 }
 0x21e   :  { %6341 = vmatmul.mubr.msk.bf16.vlgmr.msra.gmra.mxu1 %vm2406_vm10, %v3719_v33 }
 0x21f   :  { %6351 = vmatpush3.bf16.msra.mxu1 %v2382_v62  ;;  %6352 = vmatprep.mubr.msk.bf16.mxu1 %vm6717_vm3, %v9620_v7 }
 0x220   :  { %6362 = vmatprep.subr.bf16.mxu1 %v9620_v7 }
 0x222   :  { %v4199_v11 = vpop.trf.xlu0 }
 0x226   :  { %6353 = vmatmul.mubr.msk.bf16.vlgmr.msra.gmra.mxu1 %vm2406_vm10, %v3839_v14 }
 0x227   :  { %6363 = vmatpush3.bf16.msra.mxu1 %v2384_v27  ;;  %6364 = vmatprep.mubr.msk.bf16.mxu1 %vm6717_vm3, %v9620_v7 }
 0x228   :  { %6374 = vmatprep.subr.bf16.mxu1 %v9620_v7 }
 0x22e   :  { %6365 = vmatmul.mubr.msk.bf16.vlgmr.msra.gmra.mxu1 %vm2406_vm10, %v3959_v57 }
 0x22f   :  { %6375 = vmatpush3.bf16.msra.mxu1 %v2386_v49  ;;  %6376 = vmatprep.mubr.msk.bf16.mxu1 %vm6717_vm3, %v9620_v7  ;;  %v6719_v49 = vmov 0  }
 0x230   :  { %6386 = vmatprep.subr.bf16.mxu1 %v9620_v7 }
 0x236   :  { %6377 = vmatmul.mubr.msk.bf16.vlgmr.msra.gmra.mxu1 %vm2406_vm10, %v4079_v52 }
 0x237   :  { %6387 = vmatpush3.bf16.msra.mxu1 %v2388_v43  ;;  %6388 = vmatprep.mubr.msk.bf16.mxu1 %vm6717_vm3, %v9620_v7  ;;  %vm5607_vm3 = vcmask 261120  }
 0x238   :  { %5791 = vmatprep.subr.bf16.mxu1 %v6719_v49 }
 0x23e   :  { %6389 = vmatmul.mubr.msk.bf16.vlgmr.msra.gmra.mxu1 %vm2406_vm10, %v4199_v11  ;;  %v6549_v11 = vld [vmem:[%s9504_s5 + $0x30] sm:$0xff]  }
 0x23f   :  { %5792 = vmatpush1.bf16.msra.mxu1 %v6548_v13 }
 0x240   :  { %5793 = vmatprep.subr.bf16.mxu1 %v6719_v49 }
 0x242   :  { %v4259_v46 = vpop.trf.xlu1 }
 0x243   :  { %6395 = vmatmul.mubr.msk.bf16.vlgmr.msra.gmra.mxu0 %vm2406_vm10, %v4259_v46  ;;  %5794 = vmatpush1.bf16.msra.mxu1 %v6549_v11 }
 0x244   :  { %5795 = vmatprep.subr.bf16.mxu1 %v6719_v49 }
 0x25e   :  { %v2684_v41 = vpop.f32.mrf.mxu1 }
 0x260   :  { %v6234_v29 = vpop.f32.mrf.mxu1 }
 0x261   :  { %v6550_v29 = vld [vmem:[%s9504_s5 + $0x28] sm:$0xff]  }
 0x262   :  { %v2687_v60 = vpop.f32.mrf.mxu1  ;;  %5796 = vmatpush1.bf16.msra.mxu1 %v6550_v29 }
 0x263   :  { %5797 = vmatprep.subr.bf16.mxu1 %v6719_v49 }
 0x264   :  { %v6235_v53 = vpop.f32.mrf.mxu1 }
 0x26c   :  { %v2744_v19 = vpop.f32.mrf.mxu1 }
 0x26e   :  { %v6240_v23 = vpop.f32.mrf.mxu1 }
 0x270   :  { %v2747_v21 = vpop.f32.mrf.mxu1 }
 0x272   :  { %v6241_v55 = vpop.f32.mrf.mxu1 }
 0x276   :  { %v2804_v50 = vpop.f32.mrf.mxu1 }
 0x277   :  { %v4343_v4 = vcombine.low %v2684_v41, %v2804_v50  ;;  %v4344_v7 = vcombine.high %v2684_v41, %v2804_v50  ;;  %v4378_v50 = vunpack.c.l.s4 %v6720_v10 }
 0x278   :  { %v6246_v61 = vpop.f32.mrf.mxu1 }
 0x279   :  { %v8681_v51 = vrot.slane %v4343_v4, %v8678_v28  ;;  %v8684_v22 = vrot.slane %v4344_v7, %v8678_v28  ;;  %v6552_v7 = vld [vmem:[%s9504_s5 + $0x18] sm:$0xff]  }
 0x27a   :  { %v2807_v48 = vpop.f32.mrf.mxu1 }
 0x27b   :  { %v4887_v42 = vcombine.low %v2687_v60, %v2807_v48  ;;  %v4888_v63 = vcombine.high %v2687_v60, %v2807_v48 }
 0x27c   :  { %v6247_v20 = vpop.f32.mrf.mxu1 }
 0x27d   :  { %v8701_v35 = vrot.slane %v4887_v42, %v8678_v28  ;;  %v8704_v2 = vrot.slane %v4888_v63, %v8678_v28  ;;  %v4379_v63 = vunpack.c.0.s8 %v4378_v50 }
 0x27e   :  { %v2864_v32 = vpop.f32.mrf.mxu1 }
 0x27f   :  { %v4359_v34 = vcombine.low %v2744_v19, %v2864_v32  ;;  %v4360_v56 = vcombine.high %v2744_v19, %v2864_v32 }
 0x280   :  { %v6252_v31 = vpop.f32.mrf.mxu1 }
 0x281   :  { %v8687_v44 = vrot.slane %v4359_v34, %v8678_v28  ;;  %v8690_v54 = vrot.slane %v4360_v56, %v8678_v28  ;;  %v6553_v56 = vld [vmem:[%s9504_s5 + $0x10] sm:$0xff]  }
 0x282   :  { %v2867_v16 = vpop.f32.mrf.mxu1 }
 0x283   :  { %v4407_v45 = vcombine.low %v8681_v51, %v8687_v44  ;;  %v4408_v26 = vcombine.high %v8681_v51, %v8687_v44  ;;  %v4423_v1 = vcombine.low %v8684_v22, %v8690_v54  ;;  %v4424_v5 = vcombine.high %v8684_v22, %v8690_v54 }
 0x284   :  { %v4903_v0 = vcombine.low %v2747_v21, %v2867_v16  ;;  %v4904_v9 = vcombine.high %v2747_v21, %v2867_v16  ;;  %v6253_v30 = vpop.f32.mrf.mxu1  ;;  %v6551_v21 = vld [vmem:[%s9504_s5 + $0x20] sm:$0xff]  }
 0x285   :  { %5798 = vmatpush1.bf16.msra.mxu1 %v6551_v21  ;;  %v8785_v30 = vsub.s32 %v4379_v63, %v9659_v25 }
 0x286   :  { %v8707_v58 = vrot.slane %v4903_v0, %v8678_v28  ;;  %v8710_v40 = vrot.slane %v4904_v9, %v8678_v28  ;;  %v8712_v8 = vpop.f32.mrf.mxu1  ;;  %5799 = vmatprep.subr.bf16.mxu1 %v6719_v49 }
 0x287   :  { %v8801_v25 = vrot.slane %v4407_v45, %v8785_v30  ;;  %v6555_v45 = vld [vmem:[%s9504_s5] sm:$0xff]  }
 0x288   :  { %v4951_v36 = vcombine.low %v8701_v35, %v8707_v58  ;;  %v4952_v37 = vcombine.high %v8701_v35, %v8707_v58  ;;  %v4967_v24 = vcombine.low %v8704_v2, %v8710_v40  ;;  %v4968_v59 = vcombine.high %v8704_v2, %v8710_v40  ;;  %v6258_v3 = vpop.f32.mrf.mxu1 }
 0x289   :  { %5800 = vmatpush1.bf16.msra.mxu1 %v6552_v7 }
 0x28a   :  { %v8722_v17 = vpop.f32.mrf.mxu1  ;;  %5801 = vmatprep.subr.bf16.mxu1 %v6719_v49 }
 0x28c   :  { %v8724_v33 = vpop.f32.mrf.mxu0  ;;  %v6259_v62 = vpop.f32.mrf.mxu1 }
 0x28d   :  { %5802 = vmatpush1.bf16.msra.mxu1 %v6553_v56 }
 0x28e   :  { %v6210_v18 = vpop.f32.mrf.mxu0  ;;  %v8726_v12 = vpop.f32.mrf.mxu1  ;;  %5803 = vmatprep.subr.bf16.mxu1 %v6719_v49 }
 0x290   :  { %v8728_v14 = vpop.f32.mrf.mxu0  ;;  %v6264_v27 = vpop.f32.mrf.mxu1 }
 0x292   :  { %v6211_v6 = vpop.f32.mrf.mxu0  ;;  %v8733_v57 = vpop.f32.mrf.mxu1 }
 0x293   :  { %v6554_v6 = vld [vmem:[%s9504_s5 + $0x8] sm:$0xff]  }
 0x294   :  { %v8736_v39 = vpop.f32.mrf.mxu0  ;;  %v6265_v38 = vpop.f32.mrf.mxu1  ;;  %5804 = vmatpush1.bf16.msra.mxu1 %v6554_v6 }
 0x295   :  { %5805 = vmatprep.subr.bf16.mxu1 %v6719_v49 }
 0x296   :  { %v6216_v52 = vpop.f32.mrf.mxu0  ;;  %v8739_v43 = vpop.f32.mrf.mxu1 }
 0x297   :  { %v4448_v10 = vcombine.high %v8712_v8, %v8739_v43 }
 0x298   :  { %v8744_v46 = vpop.f32.mrf.mxu0  ;;  %v6270_v41 = vpop.f32.mrf.mxu1  ;;  %5806 = vmatpush1.bf16.msra.mxu1 %v6555_v45 }
 0x299   :  { %5809 = vmatprep.subr.bf16.mxu1 %v6719_v49 }
 0x29a   :  { %v6217_v60 = vpop.f32.mrf.mxu0  ;;  %v8750_v53 = vpop.f32.mrf.mxu1 }
 0x29c   :  { %v8752_v19 = vpop.f32.mrf.mxu0  ;;  %v6271_v23 = vpop.f32.mrf.mxu1 }
 0x29d   :  { %v4311_v61 = vcombine.low %v8724_v33, %v8752_v19 }
 0x29e   :  { %v6222_v55 = vpop.f32.mrf.mxu0  ;;  %v8758_v15 = vpop.f32.mrf.mxu1 }
 0x29f   :  { %v8776_v31 = vrot.slane %v4311_v61, %v8678_v28  ;;  %v4447_v55 = vcombine.low %v8712_v8, %v8739_v43  ;;  %v8846_v61 = vrot.slane %v4968_v59, %v8785_v30 }
 0x2a0   :  { %v2567_v47 = vpop.f32.mrf.mxu0  ;;  %v6276_v4 = vpop.f32.mrf.mxu1 }
 0x2a1   :  { %v4855_v18 = vcombine.low %v8728_v14, %v2567_v47  ;;  %v4856_v27 = vcombine.high %v8728_v14, %v2567_v47  ;;  %v8834_v4 = vrot.slane %v4967_v24, %v8785_v30  ;;  %v4464_v24 = vcombine.high %v8726_v12, %v8758_v15 }
 0x2a2   :  { %v6223_v48 = vpop.f32.mrf.mxu0  ;;  %v8766_v42 = vpop.f32.mrf.mxu1  ;;  %v4455_v56 = vrot.slane %v4447_v55, %v8678_v28 }
 0x2a3   :  { %v8809_v29 = vrot.slane %v4855_v18, %v8678_v28  ;;  %v4870_v60 = vrot.slane %v4856_v27, %v8678_v28  ;;  %v4312_v48 = vcombine.high %v8724_v33, %v8752_v19  ;;  %v5007_v33 = vcombine.high %v8733_v57, %v8766_v42 }
 0x2a4   :  { %v8768_v20 = vpop.f32.mrf.mxu0  ;;  %v6277_v32 = vpop.f32.mrf.mxu1  ;;  %v4478_v18 = vrot.slane %v4464_v24, %v8678_v28 }
 0x2a5   :  { %v4327_v34 = vcombine.low %v8736_v39, %v8768_v20  ;;  %v4326_v27 = vrot.slane %v4312_v48, %v8678_v28 }
 0x2a6   :  { %v6228_v16 = vpop.f32.mrf.mxu0  ;;  %v8779_v0 = vpop.f32.mrf.mxu1 }
 0x2a7   :  { %v8782_v9 = vrot.slane %v4327_v34, %v8678_v28  ;;  %v4328_v34 = vcombine.high %v8736_v39, %v8768_v20  ;;  %v4462_v16 = vrot.slane %v4448_v10, %v8678_v28  ;;  %v4990_v39 = vcombine.low %v8722_v17, %v8750_v53 }
 0x2a8   :  { %v2627_v3 = vpop.f32.mrf.mxu0  ;;  %v6282_v62 = vpop.f32.mrf.mxu1  ;;  %v8904_v10 = vrot.slane %v4408_v26, %v8785_v30 }
 0x2a9   :  { %v4375_v13 = vcombine.low %v8776_v31, %v8782_v9  ;;  %v4871_v23 = vcombine.low %v8744_v46, %v2627_v3  ;;  %v4872_v21 = vcombine.high %v8744_v46, %v2627_v3  ;;  %v8828_v46 = vrot.slane %v4951_v36, %v8785_v30 }
 0x2aa   :  { %v6229_v38 = vpop.f32.mrf.mxu0  ;;  %v8795_v52 = vpop.f32.mrf.mxu1  ;;  %v4463_v36 = vcombine.low %v8726_v12, %v8758_v15  ;;  %v5006_v12 = vcombine.low %v8733_v57, %v8766_v42  ;;  %v4991_v57 = vcombine.high %v8722_v17, %v8750_v53 }
 0x2ab   :  { %v8804_v14 = vrot.slane %v4375_v13, %v8785_v30  ;;  %v8839_v8 = vrot.slane %v4871_v23, %v8678_v28  ;;  %v4886_v43 = vrot.slane %v4872_v21, %v8678_v28  ;;  %v4342_v38 = vrot.slane %v4328_v34, %v8678_v28 }
 0x2ac   :  { %v8806_v11 = vpop.f32.mrf.mxu0  ;;  %v6283_v41 = vpop.f32.mrf.mxu1  ;;  %v4471_v42 = vrot.slane %v4463_v36, %v8678_v28  ;;  %v5014_v53 = vrot.slane %v5006_v12, %v8678_v28  ;;  %v5021_v23 = vrot.slane %v5007_v33, %v8678_v28  ;;  %v5005_v24 = vrot.slane %v4991_v57, %v8678_v28 }
 0x2ad   :  { %v4919_v2 = vcombine.low %v8809_v29, %v8839_v8  ;;  %v4935_v40 = vcombine.low %v4870_v60, %v4886_v43  ;;  %v4936_v59 = vcombine.high %v4870_v60, %v4886_v43  ;;  %v4527_v34 = vcombine.low %v4462_v16, %v4478_v18 }
 0x2ae   :  { %v6312_v47 = vpop.f32.mrf.mxu0  ;;  %v8836_v7 = vpop.f32.mrf.mxu1  ;;  %v4511_v48 = vcombine.low %v4455_v56, %v4471_v42  ;;  %v4391_v51 = vcombine.low %v4326_v27, %v4342_v38  ;;  %v4528_v12 = vcombine.high %v4462_v16, %v4478_v18  ;;  %v8934_v16 = vrot.slane %v4952_v37, %v8785_v30 }
 0x2af   :  { %v8872_v20 = vrot.slane %v4919_v2, %v8785_v30  ;;  %v8875_v3 = vrot.slane %v4935_v40, %v8785_v30  ;;  %v8878_v62 = vrot.slane %v4936_v59, %v8785_v30  ;;  %v4998_v47 = vrot.slane %v4990_v39, %v8678_v28 }
 0x2b0   :  { %v8854_v63 = vpop.f32.mrf.mxu0  ;;  %v6288_v32 = vpop.f32.mrf.mxu1  ;;  %v4376_v59 = vcombine.high %v8776_v31, %v8782_v9  ;;  %v5070_v39 = vcombine.low %v5005_v24, %v5021_v23  ;;  %v8928_v31 = vrot.slane %v4424_v5, %v8785_v30  ;;  %v5071_v9 = vcombine.high %v5005_v24, %v5021_v23 }
 0x2b1   :  { %v4512_v32 = vcombine.high %v4455_v56, %v4471_v42  ;;  %v5054_v33 = vcombine.low %v4998_v47, %v5014_v53  ;;  %v8922_v56 = vrot.slane %v4423_v1, %v8785_v30  ;;  %v4392_v42 = vcombine.high %v4326_v27, %v4342_v38 }
 0x2b2   :  { %v6313_v19 = vpop.f32.mrf.mxu0  ;;  %v8869_v15 = vpop.f32.mrf.mxu1  ;;  %v8937_v18 = vrot.slane %v4511_v48, %v8785_v30  ;;  %v8947_v54 = vrot.slane %v4527_v34, %v8785_v30  ;;  %v8950_v5 = vrot.slane %v4376_v59, %v8785_v30  ;;  %v8953_v35 = vrot.slane %v4391_v51, %v8785_v30 }
 0x2b3   :  { %v5055_v19 = vcombine.high %v4998_v47, %v5014_v53  ;;  %v8944_v22 = vrot.slane %v4512_v32, %v8785_v30  ;;  %v8956_v37 = vrot.slane %v4528_v12, %v8785_v30  ;;  %v8965_v38 = vrot.slane %v5070_v39, %v8785_v30 }
 0x2b4   :  { %v8885_v6 = vpop.f32.mrf.mxu0  ;;  %v6289_v13 = vpop.f32.mrf.mxu1  ;;  %v8968_v47 = vrot.slane %v5071_v9, %v8785_v30  ;;  %v4441_v39 = vcombine.low %v8950_v5, %v8904_v10  ;;  %v4920_v9 = vcombine.high %v8809_v29, %v8839_v8 }
 0x2b5   :  { %v4599_v60 = vcombine.low %v8806_v11, %v8885_v6  ;;  %v8962_v27 = vrot.slane %v5055_v19, %v8785_v30  ;;  %v4440_v19 = vcombine.high %v8804_v14, %v8801_v25 }
 0x2b6   :  { %v6324_v21 = vpop.f32.mrf.mxu0  ;;  %v3284_v43 = vpop.f32.mrf.mxu1 }
 0x2b7   :  { %v4479_v1 = vcombine.low %v8779_v0, %v3284_v43  ;;  %v4480_v53 = vcombine.high %v8779_v0, %v3284_v43  ;;  %v8959_v0 = vrot.slane %v5054_v33, %v8785_v30  ;;  %v8971_v43 = vrot.slane %v4392_v42, %v8785_v30 }
 0x2b8   :  { %v8910_v2 = vpop.f32.mrf.mxu0  ;;  %v6294_v40 = vpop.f32.mrf.mxu1 }
 0x2b9   :  { %v4487_v34 = vrot.slane %v4479_v1, %v8678_v28  ;;  %v4494_v40 = vrot.slane %v4480_v53, %v8678_v28  ;;  %v6556_v53 = vld [vmem:[%s9504_s5 + $0x70] sm:$0xff]  }
 0x2ba   :  { %v6325_v57 = vpop.f32.mrf.mxu0  ;;  %v3287_v13 = vpop.f32.mrf.mxu1  ;;  %5810 = vmatpush2.bf16.msra.mxu1 %v6556_v53 }
 0x2bb   :  { %v5022_v24 = vcombine.low %v8795_v52, %v3287_v13  ;;  %v5023_v48 = vcombine.high %v8795_v52, %v3287_v13  ;;  %v4442_v52 = vcombine.high %v8950_v5, %v8904_v10  ;;  %v4443_v57 = vcombine.low %v8953_v35, %v8922_v56  ;;  %5811 = vmatprep.subr.bf16.mxu1 %v6719_v49  ;;  %v6559_v5 = vld [vmem:[%s9504_s5 + $0x58] sm:$0xff]  }
 0x2bc   :  { %v8941_v21 = vpop.f32.mrf.mxu0  ;;  %v6295_v58 = vpop.f32.mrf.mxu1 }
 0x2bd   :  { %v5030_v58 = vrot.slane %v5022_v24, %v8678_v28 }
 0x2be   :  { %v6336_v23 = vpop.f32.mrf.mxu0  ;;  %v3344_v32 = vpop.f32.mrf.mxu1 }
 0x2bf   :  { %v4495_v59 = vcombine.low %v8836_v7, %v3344_v32  ;;  %v4496_v51 = vcombine.high %v8836_v7, %v3344_v32  ;;  %v5037_v23 = vrot.slane %v5023_v48, %v8678_v28 }
 0x2c0   :  { %v8979_v12 = vpop.f32.mrf.mxu0  ;;  %v6300_v33 = vpop.f32.mrf.mxu1 }
 0x2c1   :  { %v4503_v7 = vrot.slane %v4495_v59, %v8678_v28  ;;  %v4510_v42 = vrot.slane %v4496_v51, %v8678_v28 }
 0x2c2   :  { %v6337_v1 = vpop.f32.mrf.mxu0  ;;  %v3347_v32 = vpop.f32.mrf.mxu1 }
 0x2c3   :  { %v4543_v59 = vcombine.low %v4487_v34, %v4503_v7  ;;  %v4544_v51 = vcombine.high %v4487_v34, %v4503_v7  ;;  %v4559_v33 = vcombine.low %v4494_v40, %v4510_v42  ;;  %v4560_v41 = vcombine.high %v4494_v40, %v4510_v42 }
 0x2c4   :  { %v9004_v1 = vpop.f32.mrf.mxu0  ;;  %v5038_v50 = vcombine.low %v8869_v15, %v3347_v32  ;;  %v5039_v24 = vcombine.high %v8869_v15, %v3347_v32  ;;  %v6301_v26 = vpop.f32.mrf.mxu1  ;;  %v9014_v34 = vrot.slane %v4920_v9, %v8785_v30 }
 0x2c5   :  { %v9017_v40 = vrot.slane %v4543_v59, %v8785_v30  ;;  %v4558_v7 = vrot.slane %v4544_v51, %v8785_v30  ;;  %v4567_v42 = vrot.slane %v4559_v33, %v8785_v30  ;;  %v6557_v26 = vld [vmem:[%s9504_s5 + $0x68] sm:$0xff]   ;;  %v4574_v53 = vrot.slane %v4560_v41, %v8785_v30 }
 0x2c6   :  { %v6348_v15 = vpop.f32.mrf.mxu0  ;;  %v5046_v32 = vrot.slane %v5038_v50, %v8678_v28  ;;  %v5053_v36 = vrot.slane %v5039_v24, %v8678_v28  ;;  %v9027_v9 = vpop.f32.mrf.mxu1  ;;  %v4984_v59 = vcombine.high %v8872_v20, %v8828_v46  ;;  %5812 = vmatpush2.bf16.msra.mxu1 %v6557_v26  ;;  %v4985_v29 = vcombine.low %v9014_v34, %v8934_v16 }
 0x2c7   :  { %v4576_v33 = vcombine.high %v8937_v18, %v9017_v40  ;;  %v4577_v15 = vcombine.low %v8944_v22, %v4558_v7  ;;  %v4578_v48 = vcombine.high %v8944_v22, %v4558_v7  ;;  %5813 = vmatprep.subr.bf16.mxu1 %v6719_v49  ;;  %v4579_v51 = vcombine.low %v8947_v54, %v4567_v42  ;;  %v6558_v22 = vld [vmem:[%s9504_s5 + $0x60] sm:$0xff]  }
 0x2c8   :  { %v9037_v41 = vpop.f32.mrf.mxu0  ;;  %v5086_v50 = vcombine.low %v5030_v58, %v5046_v32  ;;  %v5087_v24 = vcombine.high %v5030_v58, %v5046_v32  ;;  %v5102_v44 = vcombine.low %v5037_v23, %v5053_v36  ;;  %v5103_v55 = vcombine.high %v5037_v23, %v5053_v36  ;;  %v6306_v8 = vpop.f32.mrf.mxu1 }
 0x2c9   :  { %v6414_v45 = vpack.i.bf16 %v4576_v33, %v4440_v19  ;;  %v6419_v17 = vpack.i.bf16 %v4577_v15, %v4441_v39  ;;  %v9059_v39 = vrot.slane %v4599_v60, %v8678_v28  ;;  %v4580_v23 = vcombine.high %v8947_v54, %v4567_v42 }
 0x2ca   :  { %v6349_v13 = vpop.f32.mrf.mxu0  ;;  %v9047_v7 = vrot.slane %v5086_v50, %v8785_v30  ;;  %v9050_v36 = vrot.slane %v5087_v24, %v8785_v30  ;;  %v5110_v58 = vrot.slane %v5102_v44, %v8785_v30  ;;  %v9053_v19 = vpop.f32.mrf.mxu1  ;;  %v4581_v8 = vcombine.low %v8956_v37, %v4574_v53  ;;  %5814 = vmatpush2.bf16.msra.mxu1 %v6558_v22 }
 0x2cb   :  { %6415 = vrot.lane.b32.xlu0 %v6414_v45, %s6721_s22  ;;  %6420 = vrot.lane.b32.xlu1 %v6419_v17, %s6722_s23  ;;  %v6429_v13 = vpack.i.bf16 %v4579_v51, %v4443_v57  ;;  %v5117_v26 = vrot.slane %v5103_v55, %v8785_v30  ;;  %v6424_v60 = vpack.i.bf16 %v4578_v48, %v4442_v52 }
 0x2cc   :  { %v9065_v44 = vpop.f32.mrf.mxu0  ;;  %v5119_v45 = vcombine.high %v8959_v0, %v9047_v7  ;;  %v6307_v17 = vpop.f32.mrf.mxu1  ;;  %v9660_v54 = vcombine.high %v8953_v35, %v8922_v56  ;;  %v9661_v42 = vcombine.low %v8971_v43, %v8928_v31  ;;  %v5122_v51 = vcombine.low %v8965_v38, %v5110_v58  ;;  %5815 = vmatprep.subr.bf16.mxu1 %v6719_v49 }
 0x2cd   :  { %v4582_v33 = vcombine.high %v8956_v37, %v4574_v53  ;;  %v9662_v56 = vcombine.high %v8806_v11, %v8885_v6  ;;  %v5120_v15 = vcombine.low %v8962_v27, %v9050_v36  ;;  %v5123_v37 = vcombine.high %v8965_v38, %v5110_v58 }
 0x2ce   :  { %v6434_v57 = vpack.i.bf16 %v4580_v23, %v9660_v54  ;;  %v9081_v55 = vpack.i.bf16 %v4581_v8, %v9661_v42  ;;  %v6360_v10 = vpop.f32.mrf.mxu0  ;;  %v6449_v52 = vpack.i.bf16 %v5119_v45, %v4984_v59  ;;  %v3524_v48 = vpop.f32.mrf.mxu1  ;;  %v9663_v59 = vcombine.low %v8875_v3, %v8834_v4  ;;  %5816 = vmatpush2.bf16.msra.mxu1 %v6559_v5 }
 0x2cf   :  { %v9093_v35 = vrot.slane %v9662_v56, %v8678_v28  ;;  %6425 = vrot.lane.b32.xlu0 %v6424_v60, %s6723_s26  ;;  %v4583_v53 = vcombine.low %v9027_v9, %v3524_v48  ;;  %v4584_v50 = vcombine.high %v9027_v9, %v3524_v48  ;;  %v9664_v11 = vcombine.high %v8971_v43, %v8928_v31  ;;  %v6561_v48 = vld [vmem:[%s9504_s5 + $0x48] sm:$0xff]  }
 0x2d0   :  { %v6464_v24 = vpack.i.bf16 %v5122_v51, %v9663_v59  ;;  %v9109_v22 = vpop.f32.mrf.mxu0  ;;  %6450 = vrot.lane.b32.xlu1 %v6449_v52, %s6721_s22  ;;  %v6318_v38 = vpop.f32.mrf.mxu1  ;;  %v9665_v58 = vcombine.high %v8875_v3, %v8834_v4  ;;  %v5124_v9 = vcombine.low %v8968_v47, %v5117_v26  ;;  %v5173_v8 = vcombine.low %v8979_v12, %v9037_v41  ;;  %v6560_v3 = vld [vmem:[%s9504_s5 + $0x50] sm:$0xff]  }
 0x2d1   :  { %v9107_v6 = vpack.i.bf16 %v4582_v33, %v9664_v11  ;;  %v5174_v31 = vcombine.high %v8979_v12, %v9037_v41  ;;  %v9123_v43 = vrot.slane %v4583_v53, %v8678_v28  ;;  %v9126_v60 = vrot.slane %v4584_v50, %v8678_v28  ;;  %5817 = vmatprep.subr.bf16.mxu1 %v6719_v49 }
 0x2d2   :  { %v9115_v23 = vpack.i.bf16 %v5123_v37, %v9665_v58  ;;  %v4986_v45 = vcombine.high %v9014_v34, %v8934_v16  ;;  %v6361_v4 = vpop.f32.mrf.mxu0  ;;  %v6454_v47 = vpack.i.bf16 %v5120_v15, %v4985_v29  ;;  %v3527_v26 = vpop.f32.mrf.mxu1  ;;  %v9666_v17 = vcombine.low %v8854_v63, %v8910_v2  ;;  %5818 = vmatpush2.bf16.msra.mxu1 %v6560_v3 }
 0x2d3   :  { %v5121_v42 = vcombine.high %v8962_v27, %v9050_v36  ;;  %v9667_v16 = vcombine.low %v8878_v62, %v8846_v61  ;;  %6430 = vrot.lane.b32.xlu0 %v6429_v13, %s6724_s2  ;;  %v4647_v29 = vcombine.low %v9123_v43, %v9059_v39  ;;  %v4648_v51 = vcombine.high %v9123_v43, %v9059_v39 }
 0x2d4   :  { %v9137_v54 = vrot.slane %v9666_v17, %v8678_v28  ;;  %v4663_v33 = vcombine.low %v9126_v60, %v9093_v35  ;;  %v4664_v27 = vcombine.high %v9126_v60, %v9093_v35  ;;  %v9156_v61 = vpop.f32.mrf.mxu0  ;;  %6455 = vrot.lane.b32.xlu1 %v6454_v47, %s6722_s23  ;;  %v5125_v62 = vcombine.low %v9053_v19, %v3527_v26  ;;  %v6319_v39 = vpop.f32.mrf.mxu1 }
 0x2d5   :  { %v9144_v34 = vpack.i.bf16 %v5124_v9, %v9667_v16  ;;  %v5126_v36 = vcombine.high %v9053_v19, %v3527_v26  ;;  %v9668_v13 = vcombine.high %v8854_v63, %v8910_v2  ;;  %v4736_v5 = vcombine.high %v9065_v44, %v9156_v61  ;;  %5819 = vmatprep.subr.bf16.mxu1 %v6719_v49 }
 0x2d6   :  { %v6372_v52 = vpop.f32.mrf.mxu0  ;;  %v5133_v56 = vrot.slane %v5125_v62, %v8678_v28  ;;  %v6459_v35 = vpack.i.bf16 %v5121_v42, %v4986_v45  ;;  %v3644_v15 = vpop.f32.mrf.mxu1  ;;  %5820 = vmatpush2.bf16.msra.mxu1 %v6561_v48  ;;  %v9669_v3 = vcombine.low %v8941_v21, %v9004_v1  ;;  %v5181_v42 = vrot.slane %v5173_v8, %v8678_v28 }
 0x2d7   :  { %v9165_v10 = vrot.slane %v9668_v13, %v8678_v28  ;;  %v5140_v19 = vrot.slane %v5126_v36, %v8678_v28  ;;  %6435 = vrot.lane.b32.xlu0 %v6434_v57, %s6725_s30  ;;  %5821 = vmatprep.subr.bf16.mxu1 %v6719_v49  ;;  %v6562_v57 = vld [vmem:[%s9504_s5 + $0x40] sm:$0xff]   ;;  %v9219_v16 = vrot.slane %v4647_v29, %v8785_v30  ;;  %s6728_s5 = smov [#allocation2]  }
 0x2d8   :  { %v9176_v63 = vpop.f32.mrf.mxu0  ;;  %v5189_v2 = vcombine.low %v5133_v56, %v9137_v54  ;;  %v5190_v37 = vcombine.high %v5133_v56, %v9137_v54  ;;  %6460 = vrot.lane.b32.xlu1 %v6459_v35, %s6723_s26  ;;  %v6330_v59 = vpop.f32.mrf.mxu1  ;;  %v4639_v47 = vrot.slane %v9669_v3, %v8678_v28  ;;  %v9225_v62 = vrot.slane %v4663_v33, %v8785_v30  ;;  %s5849_s10 = sshll.u32 %s6728_s5, 4  ;;  %s5850_s10 = int_to_ptr.vmem [resolvable:$true] %s5849_s10 }
 0x2d9   :  { %v5205_v53 = vcombine.low %v5140_v19, %v9165_v10  ;;  %v5206_v50 = vcombine.high %v5140_v19, %v9165_v10  ;;  %v5277_v11 = vcombine.high %v9109_v22, %v9176_v63  ;;  %v9228_v36 = vrot.slane %v4664_v27, %v8785_v30  ;;  %s6693_s0 = scalar_lea.vmem %s5850_s10, 512  ;;  %p6698_p1 = scmp.lt.s32.totalorder %s5850_s10, %s5850_s10 }
 0x2da   :  { %v6373_v38 = vpop.f32.mrf.mxu0  ;;  %v3647_v58 = vpop.f32.mrf.mxu1  ;;  %5822 = vmatpush2.bf16.msra.mxu1 %v6562_v57  ;;  %v9231_v12 = vrot.slane %v5189_v2, %v8785_v30  ;;  %v9234_v41 = vrot.slane %v5190_v37, %v8785_v30  ;;  %p6694_p0 = scmp.ne.s32.totalorder %s5850_s10, %s6693_s0  ;;  %p6699_p2 = scmp.lt.s32.totalorder %s6693_s0, %s6693_s0 }
 0x2db   :  { %6440 = vrot.lane.b32.xlu0 %v9081_v55, %s6726_s1  ;;  %v9670_v55 = vcombine.high %v8941_v21, %v9004_v1  ;;  %v5188_v21 = vrot.slane %v5174_v31, %v8678_v28  ;;  %v9251_v19 = vrot.slane %v5205_v53, %v8785_v30 }
 0x2dc   :  { %v9191_v9 = vpop.f32.mrf.mxu0  ;;  %6465 = vrot.lane.b32.xlu1 %v6464_v24, %s6724_s2  ;;  %v6331_v43 = vpop.f32.mrf.mxu1  ;;  %p6700_p3 = por %p6699_p2, %p6698_p1 }
 0x2dd   :  { %v4646_v24 = vrot.slane %v9670_v55, %v8678_v28 }
 0x2de   :  { %v6384_v60 = vpop.f32.mrf.mxu0  ;;  %v3764_v45 = vpop.f32.mrf.mxu1  ;;  %p6701_p4 = pnand %p6700_p3, %p6694_p0 }
 0x2df   :  { %6445 = vrot.lane.b32.xlu0 %v9107_v6, %s6727_s9  ;;  %v4615_v49 = vcombine.low %v3644_v15, %v3764_v45  ;;  %v4616_v4 = vcombine.high %v3644_v15, %v3764_v45 }
 0x2e0   :  { %v9204_v26 = vpop.f32.mrf.mxu0  ;;  %6470 = vrot.lane.b32.xlu1 %v9115_v23, %s6725_s30  ;;  %v6342_v17 = vpop.f32.mrf.mxu1  ;;  %v9222_v23 = vrot.slane %v4648_v51, %v8785_v30 }
 0x2e1   :  { %v4623_v6 = vrot.slane %v4615_v49, %v8678_v28  ;;  %v4630_v54 = vrot.slane %v4616_v4, %v8678_v28 }
 0x2e2   :  { %v6385_v1 = vpop.f32.mrf.mxu0  ;;  %v3767_v13 = vpop.f32.mrf.mxu1 }
 0x2e3   :  { %v4679_v8 = vcombine.low %v4623_v6, %v4639_v47  ;;  %v4680_v10 = vcombine.high %v4623_v6, %v4639_v47  ;;  %v4695_v39 = vcombine.low %v4630_v54, %v4646_v24  ;;  %v4696_v52 = vcombine.high %v4630_v54, %v4646_v24 }
 0x2e4   :  { %6475 = vrot.lane.b32.xlu1 %v9144_v34, %s6726_s1  ;;  %v5157_v31 = vcombine.low %v3647_v58, %v3767_v13  ;;  %v5158_v29 = vcombine.high %v3647_v58, %v3767_v13  ;;  %v6343_v51 = vpop.f32.mrf.mxu1  ;;  %v9254_v34 = vrot.slane %v5206_v50, %v8785_v30 }
 0x2e5   :  { %v9239_v33 = vrot.slane %v4679_v8, %v8785_v30  ;;  %v9242_v27 = vrot.slane %v4680_v10, %v8785_v30  ;;  %v9245_v48 = vrot.slane %v4695_v39, %v8785_v30  ;;  %v9248_v56 = vrot.slane %v4696_v52, %v8785_v30 }
 0x2e6   :  { %v5165_v35 = vrot.slane %v5157_v31, %v8678_v28  ;;  %v5172_v15 = vrot.slane %v5158_v29, %v8678_v28  ;;  %v3884_v2 = vpop.f32.mrf.mxu1 }
 0x2e7   :  { %v4712_v59 = vcombine.high %v9219_v16, %v9239_v33  ;;  %v4713_v38 = vcombine.low %v9222_v23, %v9242_v27  ;;  %v4715_v45 = vcombine.low %v9225_v62, %v9245_v48  ;;  %v4716_v49 = vcombine.high %v9225_v62, %v9245_v48 }
 0x2e8   :  { %v5221_v58 = vcombine.low %v5165_v35, %v5181_v42  ;;  %v5222_v50 = vcombine.high %v5165_v35, %v5181_v42  ;;  %v5237_v57 = vcombine.low %v5172_v15, %v5188_v21  ;;  %v5238_v43 = vcombine.high %v5172_v15, %v5188_v21  ;;  %v6354_v60 = vpop.f32.mrf.mxu1 }
 0x2e9   :  { %v4717_v4 = vcombine.low %v9228_v36, %v9248_v56  ;;  %v4718_v3 = vcombine.high %v9228_v36, %v9248_v56 }
 0x2ea   :  { %v9275_v47 = vrot.slane %v5221_v58, %v8785_v30  ;;  %v9278_v55 = vrot.slane %v5222_v50, %v8785_v30  ;;  %v9281_v24 = vrot.slane %v5237_v57, %v8785_v30  ;;  %v9284_v17 = vrot.slane %v5238_v43, %v8785_v30  ;;  %v3887_v6 = vpop.f32.mrf.mxu1 }
 0x2eb   :  { %v4735_v43 = vcombine.low %v9065_v44, %v9156_v61  ;;  %v5291_v61 = vrot.slane %v5277_v11, %v8678_v28 }
 0x2ec   :  { %v6355_v42 = vpop.f32.mrf.mxu1  ;;  %v5254_v21 = vcombine.high %v9231_v12, %v9275_v47  ;;  %v9671_v62 = vcombine.low %v9251_v19, %v9281_v24  ;;  %v9674_v36 = vcombine.low %v9254_v34, %v9284_v17 }
 0x2ed   :  { %v4743_v32 = vrot.slane %v4735_v43, %v8678_v28 }
 0x2ee   :  { %v4004_v52 = vpop.f32.mrf.mxu1 }
 0x2ef   :  { %v4719_v57 = vcombine.low %v3884_v2, %v4004_v52  ;;  %v4720_v60 = vcombine.high %v3884_v2, %v4004_v52 }
 0x2f0   :  { %v6366_v31 = vpop.f32.mrf.mxu1 }
 0x2f1   :  { %v4727_v37 = vrot.slane %v4719_v57, %v8678_v28  ;;  %v4734_v13 = vrot.slane %v4720_v60, %v8678_v28  ;;  %v4750_v31 = vrot.slane %v4736_v5, %v8678_v28 }
 0x2f2   :  { %v4007_v29 = vpop.f32.mrf.mxu1 }
 0x2f3   :  { %v5261_v1 = vcombine.high %v3887_v6, %v4007_v29  ;;  %v4783_v52 = vcombine.low %v4727_v37, %v4743_v32  ;;  %v4799_v39 = vcombine.low %v4734_v13, %v4750_v31  ;;  %v4800_v10 = vcombine.high %v4734_v13, %v4750_v31 }
 0x2f4   :  { %v6367_v51 = vpop.f32.mrf.mxu1 }
 0x2f5   :  { %v5260_v51 = vcombine.low %v3887_v6, %v4007_v29  ;;  %v5275_v44 = vrot.slane %v5261_v1, %v8678_v28  ;;  %v9319_v6 = vrot.slane %v4783_v52, %v8785_v30  ;;  %v4807_v13 = vrot.slane %v4799_v39, %v8785_v30 }
 0x2f6   :  { %v4124_v35 = vpop.f32.mrf.mxu1 }
 0x2f7   :  { %v5268_v57 = vrot.slane %v5260_v51, %v8678_v28  ;;  %v4814_v51 = vrot.slane %v4800_v10, %v8785_v30 }
 0x2f8   :  { %v6378_v15 = vpop.f32.mrf.mxu1 }
 0x2f9   :  { %v5276_v15 = vcombine.low %v9109_v22, %v9176_v63 }
 0x2fa   :  { %v4127_v58 = vpop.f32.mrf.mxu1 }
 0x2fb   :  { %v5284_v43 = vrot.slane %v5276_v15, %v8678_v28  ;;  %v5340_v15 = vcombine.low %v5275_v44, %v5291_v61 }
 0x2fc   :  { %v6379_v50 = vpop.f32.mrf.mxu1 }
 0x2fd   :  { %v5325_v1 = vcombine.high %v5268_v57, %v5284_v43 }
 0x2fe   :  { %v4244_v42 = vpop.f32.mrf.mxu1 }
 0x2ff   :  { %v4751_v60 = vcombine.low %v4124_v35, %v4244_v42  ;;  %v4752_v53 = vcombine.high %v4124_v35, %v4244_v42  ;;  %v5324_v35 = vcombine.low %v5268_v57, %v5284_v43  ;;  %v5341_v43 = vcombine.high %v5275_v44, %v5291_v61 }
 0x300   :  { %v6390_v54 = vpop.f32.mrf.mxu1 }
 0x301   :  { %v4784_v54 = vcombine.high %v4727_v37, %v4743_v32  ;;  %v4759_v31 = vrot.slane %v4751_v60, %v8678_v28  ;;  %v4766_v22 = vrot.slane %v4752_v53, %v8678_v28  ;;  %v9333_v57 = vrot.slane %v5324_v35, %v8785_v30 }
 0x302   :  { %v4247_v50 = vpop.f32.mrf.mxu1 }
 0x303   :  { %v4304_v5 = vpop.f32.mrf.mxu0  ;;  %v9324_v29 = vrot.slane %v4784_v54, %v8785_v30 }
 0x304   :  { %v6391_v2 = vpop.f32.mrf.mxu1  ;;  %v4767_v32 = vcombine.low %v9191_v9, %v4304_v5  ;;  %v4768_v37 = vcombine.high %v9191_v9, %v4304_v5  ;;  %v5292_v9 = vcombine.low %v4127_v58, %v4247_v50 }
 0x305   :  { %v6396_v42 = vpop.f32.mrf.mxu0  ;;  %v5293_v2 = vcombine.high %v4127_v58, %v4247_v50 }
 0x306   :  { %v4775_v63 = vrot.slane %v4767_v32, %v8678_v28  ;;  %v4782_v11 = vrot.slane %v4768_v37, %v8678_v28  ;;  %v5339_v37 = vrot.slane %v5325_v1, %v8785_v30  ;;  %v5300_v42 = vrot.slane %v5292_v9, %v8678_v28 }
 0x307   :  { %v4307_v52 = vpop.f32.mrf.mxu0  ;;  %v5307_v35 = vrot.slane %v5293_v2, %v8678_v28  ;;  %v5348_v2 = vrot.slane %v5340_v15, %v8785_v30 }
 0x308   :  { %v4815_v54 = vcombine.low %v4759_v31, %v4775_v63  ;;  %v4816_v5 = vcombine.high %v4759_v31, %v4775_v63  ;;  %v4831_v39 = vcombine.low %v4766_v22, %v4782_v11  ;;  %v4832_v8 = vcombine.high %v4766_v22, %v4782_v11 }
 0x309   :  { %v5308_v53 = vcombine.low %v9204_v26, %v4307_v52  ;;  %v5309_v60 = vcombine.high %v9204_v26, %v4307_v52  ;;  %v6397_v32 = vpop.f32.mrf.mxu0 }
 0x30a   :  { %v9339_v10 = vrot.slane %v4815_v54, %v8785_v30  ;;  %v4830_v58 = vrot.slane %v4816_v5, %v8785_v30  ;;  %v4839_v50 = vrot.slane %v4831_v39, %v8785_v30  ;;  %v4846_v26 = vrot.slane %v4832_v8, %v8785_v30 }
 0x30b   :  { %v5316_v44 = vrot.slane %v5308_v53, %v8678_v28  ;;  %v5323_v61 = vrot.slane %v5309_v60, %v8678_v28  ;;  %v5355_v54 = vrot.slane %v5341_v43, %v8785_v30 }
 0x30c   :  { %v4847_v1 = vcombine.low %v9319_v6, %v9339_v10  ;;  %v4848_v31 = vcombine.high %v9319_v6, %v9339_v10  ;;  %v4849_v22 = vcombine.low %v9324_v29, %v4830_v58  ;;  %v4851_v8 = vcombine.low %v4807_v13, %v4839_v50 }
 0x30d   :  { %v5356_v63 = vcombine.low %v5300_v42, %v5316_v44  ;;  %v5357_v11 = vcombine.high %v5300_v42, %v5316_v44  ;;  %v5372_v52 = vcombine.low %v5307_v35, %v5323_v61  ;;  %v5373_v9 = vcombine.high %v5307_v35, %v5323_v61 }
 0x30e   :  { %v6479_v28 = vpack.i.bf16 %v4848_v31, %v4712_v59  ;;  %v6494_v15 = vpack.i.bf16 %v4851_v8, %v4715_v45  ;;  %v4852_v43 = vcombine.high %v4807_v13, %v4839_v50  ;;  %v4853_v32 = vcombine.low %v4814_v51, %v4846_v26 }
 0x30f   :  { %v9359_v5 = vrot.slane %v5356_v63, %v8785_v30  ;;  %v5371_v39 = vrot.slane %v5357_v11, %v8785_v30  ;;  %v5380_v53 = vrot.slane %v5372_v52, %v8785_v30  ;;  %v5387_v60 = vrot.slane %v5373_v9, %v8785_v30 }
 0x310   :  { %6480 = vrot.lane.b32.xlu1 %v6479_v28, %s6721_s22  ;;  %v4854_v42 = vcombine.high %v4814_v51, %v4846_v26  ;;  %v6484_v35 = vpack.i.bf16 %v4849_v22, %v4713_v38  ;;  %v4850_v30 = vcombine.high %v9324_v29, %v4830_v58  ;;  %v6499_v61 = vpack.i.bf16 %v4852_v43, %v4716_v49 }
 0x311   :  { %v5388_v59 = vcombine.low %v9333_v57, %v9359_v5  ;;  %v5389_v44 = vcombine.high %v9333_v57, %v9359_v5  ;;  %v5392_v45 = vcombine.low %v5348_v2, %v5380_v53  ;;  %v6504_v13 = vpack.i.bf16 %v4853_v32, %v4717_v4 }
 0x312   :  { %v5393_v51 = vcombine.high %v5348_v2, %v5380_v53  ;;  %v5390_v38 = vcombine.low %v5339_v37, %v5371_v39  ;;  %v6539_v26 = vpack.i.bf16 %v4854_v42, %v4718_v3  ;;  %v9672_v49 = vcombine.high %v9251_v19, %v9281_v24 }
 0x313   :  { %v6509_v50 = vpack.i.bf16 %v5389_v44, %v5254_v21  ;;  %v6524_v48 = vpack.i.bf16 %v5392_v45, %v9671_v62  ;;  %v5394_v29 = vcombine.low %v5355_v54, %v5387_v60  ;;  %v9673_v21 = vcombine.high %v9222_v23, %v9242_v27 }
 0x314   :  { %6485 = vrot.lane.b32.xlu1 %v6484_v35, %s6722_s23  ;;  %v6529_v4 = vpack.i.bf16 %v5393_v51, %v9672_v49  ;;  %v9675_v3 = vcombine.low %v9234_v41, %v9278_v55  ;;  %v5391_v22 = vcombine.high %v5339_v37, %v5371_v39  ;;  %v9676_v19 = vcombine.high %v9234_v41, %v9278_v55 }
 0x315   :  { %6510 = vrot.lane.b32.xlu0 %v6509_v50, %s6721_s22  ;;  %v6489_v58 = vpack.i.bf16 %v4850_v30, %v9673_v21  ;;  %v6534_v56 = vpack.i.bf16 %v5394_v29, %v9674_v36  ;;  %v9677_v54 = vcombine.low %v8937_v18, %v9017_v40  ;;  %v9678_v8 = vcombine.low %v8804_v14, %v8801_v25 }
 0x316   :  { %v6514_v31 = vpack.i.bf16 %v5390_v38, %v9675_v3  ;;  %v6519_v24 = vpack.i.bf16 %v5391_v22, %v9676_v19  ;;  %v9679_v51 = vcombine.low %v8959_v0, %v9047_v7  ;;  %v9680_v38 = vcombine.low %v8872_v20, %v8828_v46 }
 0x318   :  { %6490 = vrot.lane.b32.xlu1 %v6489_v58, %s6723_s26 }
 0x319   :  { %6515 = vrot.lane.b32.xlu0 %v6514_v31, %s6722_s23 }
 0x31c   :  { %6495 = vrot.lane.b32.xlu1 %v6494_v15, %s6724_s2 }
 0x31d   :  { %6520 = vrot.lane.b32.xlu0 %v6519_v24, %s6723_s26 }
 0x320   :  { %6500 = vrot.lane.b32.xlu1 %v6499_v61, %s6725_s30 }
 0x321   :  { %6525 = vrot.lane.b32.xlu0 %v6524_v48, %s6724_s2 }
 0x324   :  { %6505 = vrot.lane.b32.xlu1 %v6504_v13, %s6726_s1 }
 0x325   :  { %6530 = vrot.lane.b32.xlu0 %v6529_v4, %s6725_s30 }
 0x328   :  { %6540 = vrot.lane.b32.xlu1 %v6539_v26, %s6727_s9 }
 0x329   :  { %6535 = vrot.lane.b32.xlu0 %v6534_v56, %s6726_s1 }
 0x33d   :  { %v6416_v23 = vpop.permute.xlu0 %6415  ;;  %v6421_v27 = vpop.permute.xlu1 %6420 }
 0x33e   :  { %v6418_v37 = vunpack.i.h.bf16 %v6416_v23  ;;  %v6417_v63 = vunpack.i.l.bf16 %v6416_v23  ;;  %v6423_v52 = vunpack.i.h.bf16 %v6421_v27  ;;  %v6422_v9 = vunpack.i.l.bf16 %v6421_v27 }
 0x340   :  { %v5604_v28 = vsel %vm2406_vm10, %v9677_v54, %v6418_v37  ;;  %v5603_v39 = vsel %vm2406_vm10, %v9678_v8, %v6417_v63 }
 0x341   :  { %v6426_v41 = vpop.permute.xlu0 %6425  ;;  %v5609_v18 = vsel %vm5607_vm3, %v5604_v28, %v6423_v52  ;;  %v5608_v40 = vsel %vm5607_vm3, %v5603_v39, %v6422_v9 }
 0x342   :  { %v6451_v34 = vpop.permute.xlu1 %6450  ;;  %v6428_v53 = vunpack.i.h.bf16 %v6426_v41  ;;  %v6427_v60 = vunpack.i.l.bf16 %v6426_v41 }
 0x343   :  { %v6453_v15 = vunpack.i.h.bf16 %v6451_v34  ;;  %v6452_v43 = vunpack.i.l.bf16 %v6451_v34 }
 0x344   :  { %v5613_v14 = vsel %vm5612_vm6, %v5608_v40, %v6427_v60  ;;  %v5614_v61 = vsel %vm5612_vm6, %v5609_v18, %v6428_v53 }
 0x345   :  { %v6431_v55 = vpop.permute.xlu0 %6430  ;;  %v5638_v50 = vsel %vm2406_vm10, %v9679_v51, %v6453_v15  ;;  %v5637_v26 = vsel %vm2406_vm10, %v9680_v38, %v6452_v43  ;;  %v9681_v51 = vcombine.low %v9219_v16, %v9239_v33 }
 0x346   :  { %v6456_v17 = vpop.permute.xlu1 %6455  ;;  %v6433_v32 = vunpack.i.h.bf16 %v6431_v55  ;;  %v6432_v42 = vunpack.i.l.bf16 %v6431_v55 }
 0x347   :  { %v6458_v62 = vunpack.i.h.bf16 %v6456_v17  ;;  %v6457_v48 = vunpack.i.l.bf16 %v6456_v17 }
 0x348   :  { %v5618_v49 = vsel %vm5617_vm7, %v5613_v14, %v6432_v42  ;;  %v5619_v4 = vsel %vm5617_vm7, %v5614_v61, %v6433_v32 }
 0x349   :  { %v6436_v11 = vpop.permute.xlu0 %6435  ;;  %v5641_v41 = vsel %vm5607_vm3, %v5637_v26, %v6457_v48  ;;  %v5642_v34 = vsel %vm5607_vm3, %v5638_v50, %v6458_v62 }
 0x34a   :  { %v6461_v2 = vpop.permute.xlu1 %6460  ;;  %v6438_v44 = vunpack.i.h.bf16 %v6436_v11  ;;  %v6437_v30 = vunpack.i.l.bf16 %v6436_v11 }
 0x34b   :  { %v6463_v29 = vunpack.i.h.bf16 %v6461_v2  ;;  %v6462_v21 = vunpack.i.l.bf16 %v6461_v2 }
 0x34c   :  { %v5623_v36 = vsel %vm5622_vm8, %v5618_v49, %v6437_v30  ;;  %v5624_v0 = vsel %vm5622_vm8, %v5619_v4, %v6438_v44 }
 0x34d   :  { %v6441_v35 = vpop.permute.xlu0 %6440  ;;  %v5645_v17 = vsel %vm5612_vm6, %v5641_v41, %v6462_v21  ;;  %v5646_v37 = vsel %vm5612_vm6, %v5642_v34, %v6463_v29  ;;  %v9682_v21 = vcombine.low %v9231_v12, %v9275_v47 }
 0x34e   :  { %v6466_v25 = vpop.permute.xlu1 %6465  ;;  %v6443_v45 = vunpack.i.h.bf16 %v6441_v35  ;;  %v6442_v13 = vunpack.i.l.bf16 %v6441_v35 }
 0x34f   :  { %v6468_v31 = vunpack.i.h.bf16 %v6466_v25  ;;  %v6467_v22 = vunpack.i.l.bf16 %v6466_v25 }
 0x350   :  { %v5628_v46 = vsel %vm5627_vm9, %v5623_v36, %v6442_v13  ;;  %v5629_v20 = vsel %vm5627_vm9, %v5624_v0, %v6443_v45 }
 0x351   :  { %v6446_v58 = vpop.permute.xlu0 %6445  ;;  %v5649_v11 = vsel %vm5617_vm7, %v5645_v17, %v6467_v22  ;;  %v5650_v52 = vsel %vm5617_vm7, %v5646_v37, %v6468_v31 }
 0x352   :  { %v6448_v7 = vunpack.i.h.bf16 %v6446_v58  ;;  %v6447_v56 = vunpack.i.l.bf16 %v6446_v58  ;;  %v6471_v3 = vpop.permute.xlu1 %6470 }
 0x353   :  { %v6473_v23 = vunpack.i.h.bf16 %v6471_v3  ;;  %v6472_v27 = vunpack.i.l.bf16 %v6471_v3 }
 0x354   :  { %v5633_v19 = vsel %vm5632_vm11, %v5628_v46, %v6447_v56  ;;  %v5634_v24 = vsel %vm5632_vm11, %v5629_v20, %v6448_v7 }
 0x355   :  { %v5661_v55 = vpack.c.bf16 %v5634_v24, %v5633_v19  ;;  %v5653_v54 = vsel %vm5622_vm8, %v5649_v11, %v6472_v27  ;;  %v5654_v28 = vsel %vm5622_vm8, %v5650_v52, %v6473_v23 }
 0x356   :  { %v6476_v63 = vpop.permute.xlu1 %6475 }
 0x357   :  { %v6478_v9 = vunpack.i.h.bf16 %v6476_v63  ;;  %v6477_v2 = vunpack.i.l.bf16 %v6476_v63 }
 0x359   :  { %v5657_v8 = vsel %vm5627_vm9, %v5653_v54, %v6477_v2  ;;  %v5658_v39 = vsel %vm5627_vm9, %v5654_v28, %v6478_v9 }
 0x35a   :  { %v5662_v53 = vpack.c.bf16 %v5658_v39, %v5657_v8 }
 0x35c   :  { %5974 = vmatprep.mubr.msk.bf16.mxu1 %vm5632_vm11, %v5662_v53 }
 0x35d   :  { %5824 = vmatmul.mubr.bf16.vlgmr.msra.gmra.mxu1 %v5661_v55 }
 0x382   :  { %v6481_v60 = vpop.permute.xlu1 %6480 }
 0x383   :  { %v6483_v18 = vunpack.i.h.bf16 %v6481_v60  ;;  %v6482_v40 = vunpack.i.l.bf16 %v6481_v60 }
 0x385   :  { %v5606_v13 = vsel %vm2406_vm10, %v4847_v1, %v6483_v18  ;;  %v5605_v50 = vsel %vm2406_vm10, %v9681_v51, %v6482_v40 }
 0x386   :  { %v6486_v15 = vpop.permute.xlu1 %6485 }
 0x387   :  { %v6511_v43 = vpop.permute.xlu0 %6510  ;;  %v6488_v30 = vunpack.i.h.bf16 %v6486_v15  ;;  %v6487_v25 = vunpack.i.l.bf16 %v6486_v15 }
 0x388   :  { %v6513_v14 = vunpack.i.h.bf16 %v6511_v43  ;;  %v6512_v61 = vunpack.i.l.bf16 %v6511_v43 }
 0x389   :  { %v5610_v48 = vsel %vm5607_vm3, %v5605_v50, %v6487_v25  ;;  %v5611_v49 = vsel %vm5607_vm3, %v5606_v13, %v6488_v30 }
 0x38a   :  { %v6491_v32 = vpop.permute.xlu1 %6490  ;;  %v5639_v6 = vsel %vm2406_vm10, %v9682_v21, %v6512_v61  ;;  %v5640_v16 = vsel %vm2406_vm10, %v5388_v59, %v6513_v14 }
 0x38b   :  { %v6516_v42 = vpop.permute.xlu0 %6515  ;;  %v6493_v38 = vunpack.i.h.bf16 %v6491_v32  ;;  %v6492_v26 = vunpack.i.l.bf16 %v6491_v32 }
 0x38c   :  { %v6518_v4 = vunpack.i.h.bf16 %v6516_v42  ;;  %v6517_v29 = vunpack.i.l.bf16 %v6516_v42 }
 0x38d   :  { %v5615_v56 = vsel %vm5612_vm6, %v5610_v48, %v6492_v26  ;;  %v5616_v3 = vsel %vm5612_vm6, %v5611_v49, %v6493_v38 }
 0x38e   :  { %v6496_v35 = vpop.permute.xlu1 %6495  ;;  %v5643_v20 = vsel %vm5607_vm3, %v5639_v6, %v6517_v29  ;;  %v5644_v57 = vsel %vm5607_vm3, %v5640_v16, %v6518_v4 }
 0x38f   :  { %v6521_v44 = vpop.permute.xlu0 %6520  ;;  %v6498_v33 = vunpack.i.h.bf16 %v6496_v35  ;;  %v6497_v10 = vunpack.i.l.bf16 %v6496_v35 }
 0x390   :  { %v6523_v1 = vunpack.i.h.bf16 %v6521_v44  ;;  %v6522_v58 = vunpack.i.l.bf16 %v6521_v44 }
 0x391   :  { %v5620_v31 = vsel %vm5617_vm7, %v5615_v56, %v6497_v10  ;;  %v5621_v22 = vsel %vm5617_vm7, %v5616_v3, %v6498_v33 }
 0x392   :  { %v6501_v45 = vpop.permute.xlu1 %6500  ;;  %v5647_v23 = vsel %vm5612_vm6, %v5643_v20, %v6522_v58  ;;  %v5648_v27 = vsel %vm5612_vm6, %v5644_v57, %v6523_v1 }
 0x393   :  { %v6526_v62 = vpop.permute.xlu0 %6525  ;;  %v6503_v36 = vunpack.i.h.bf16 %v6501_v45  ;;  %v6502_v0 = vunpack.i.l.bf16 %v6501_v45 }
 0x394   :  { %v6528_v46 = vunpack.i.h.bf16 %v6526_v62  ;;  %v6527_v12 = vunpack.i.l.bf16 %v6526_v62 }
 0x395   :  { %v5625_v41 = vsel %vm5622_vm8, %v5620_v31, %v6502_v0  ;;  %v5626_v34 = vsel %vm5622_vm8, %v5621_v22, %v6503_v36 }
 0x396   :  { %v6506_v7 = vpop.permute.xlu1 %6505  ;;  %v5651_v17 = vsel %vm5617_vm7, %v5647_v23, %v6527_v12  ;;  %v5652_v37 = vsel %vm5617_vm7, %v5648_v27, %v6528_v46 }
 0x397   :  { %v6531_v47 = vpop.permute.xlu0 %6530  ;;  %v6508_v5 = vunpack.i.h.bf16 %v6506_v7  ;;  %v6507_v59 = vunpack.i.l.bf16 %v6506_v7 }
 0x398   :  { %v6533_v19 = vunpack.i.h.bf16 %v6531_v47  ;;  %v6532_v24 = vunpack.i.l.bf16 %v6531_v47 }
 0x399   :  { %v5630_v9 = vsel %vm5627_vm9, %v5625_v41, %v6507_v59  ;;  %v5631_v2 = vsel %vm5627_vm9, %v5626_v34, %v6508_v5 }
 0x39a   :  { %v6541_v55 = vpop.permute.xlu1 %6540  ;;  %v5655_v8 = vsel %vm5622_vm8, %v5651_v17, %v6532_v24  ;;  %v5656_v39 = vsel %vm5622_vm8, %v5652_v37, %v6533_v19 }
 0x39b   :  { %v6536_v63 = vpop.permute.xlu0 %6535  ;;  %v6543_v11 = vunpack.i.h.bf16 %v6541_v55  ;;  %v6542_v52 = vunpack.i.l.bf16 %v6541_v55 }
 0x39c   :  { %v6538_v54 = vunpack.i.h.bf16 %v6536_v63  ;;  %v6537_v28 = vunpack.i.l.bf16 %v6536_v63 }
 0x39d   :  { %v5635_v53 = vsel %vm5632_vm11, %v5630_v9, %v6542_v52  ;;  %v5636_v60 = vsel %vm5632_vm11, %v5631_v2, %v6543_v11 }
 0x39e   :  { %v5659_v15 = vsel %vm5627_vm9, %v5655_v8, %v6537_v28  ;;  %v5660_v43 = vsel %vm5627_vm9, %v5656_v39, %v6538_v54  ;;  %v5663_v32 = vpack.c.bf16 %v5636_v60, %v5635_v53 }
 0x39f   :  { %v5664_v42 = vpack.c.bf16 %v5660_v43, %v5659_v15 }
 0x3a1   :  { %5975 = vmatprep.mubr.msk.bf16.mxu1 %vm5632_vm11, %v5664_v42 }
 0x3a2   :  { %5832 = vmatmul.mubr.bf16.gmra.mxu1 %v5663_v32 }
 0x41d   :  { %v5825_v35 = vpop.f32.mrf.mxu1 }
 0x41e   :  { %5840 = vst [vmem:[#allocation2] sm:$0xff] %v5825_v35 }
 0x41f   :  { %v5827_v18 = vpop.f32.mrf.mxu1 }
 0x421   :  { %v5828_v40 = vpop.f32.mrf.mxu1 }
 0x422   :  { %5841 = vst [vmem:[#allocation2 + $0x8] sm:$0xff] %v5828_v40 }
 0x423   :  { %v5830_v44 = vpop.f32.mrf.mxu1 }
 0x462   :  { %v5833_v30 = vpop.f32.mrf.mxu1 }
 0x463   :  { %5842 = vst [vmem:[#allocation2 + $0x10] sm:$0xff] %v5833_v30 }
 0x464   :  { %v5835_v25 = vpop.f32.mrf.mxu1 }
 0x466   :  { %v5836_v14 = vpop.f32.mrf.mxu1 }
 0x467   :  { %5843 = vst [vmem:[#allocation2 + $0x18] sm:$0xff] %v5836_v14 }
 0x468   :  { %v5838_v61 = vpop.f32.mrf.mxu1 }
 0x469   :  { %6704 = shalt.err (!%p6701_p4)
}
 0x46a   :  { %s6729_s11 = smov 128   ;;  %s6730_s12 = smov 8  }
 0x46b   :  { %5855 = dma.vmem_to_hbm [thread:$0]  %s5850_s10, 512, %s9505_s6, [#allocation3], %s6729_s11, %s6729_s11, %s6730_s12  }
 0x46c   :  { %6713 = dma.done.wait [#allocation3], 512  }
 0x46d   :  { %6714 = vsyncadd [#allocation3], 4294966784 }
 0x46e   :  { %5859 = vsyncpa [#allocation3], 1 }

</bundles_post_ra>
